<compile_context>
chip_gen: v5e
topology: v5e:2x2
jax: 0.10.0
libtpu: 0.0.40
codegen_flags: <defaults>
</compile_context>

<pallas_src>
import jax
import jax.numpy as jnp
from jax.experimental import pallas as pl
from jax.experimental.pallas import tpu as pltpu


def _regulation_kernel(g1_ref, g2_ref, x_ref, o1_ref, o2_ref):
    # g refs: (1, FDp), resident (same block every grid step).
    # x/out refs: (tb, FDp) — lane-dense last dim (multiple of 128).
    x = x_ref[...]
    o1_ref[...] = (g1_ref[...] * x).astype(o1_ref.dtype)
    o2_ref[...] = (g2_ref[...] * x).astype(o2_ref.dtype)


def _tpu_generation():
    """Best-effort TPU generation from device_kind (host-side, cheap)."""
    try:
        kind = jax.devices()[0].device_kind.lower()
    except Exception:
        return 0
    if "7x" in kind or "v7" in kind:
        return 7
    if "v6" in kind:
        return 6
    if "v5" in kind:
        return 5
    if "v4" in kind:
        return 4
    return 0


def _pick_block_rows(B, row_bytes, target_bytes, require_two_steps):
    """Batch tile size: multiple of 8 (or B itself), near target_bytes, prefer
    an exact divisor of B so the last grid step is a full block."""
    if B <= 8:
        return B
    max_rows = max(8, int(target_bytes) // int(row_bytes))
    max_rows -= max_rows % 8
    max_rows = max(8, max_rows)
    if require_two_steps:
        half = (B // 2) - ((B // 2) % 8)
        max_rows = min(max_rows, max(8, half))
    if max_rows >= B:
        return B
    # Prefer the largest divisor of B that is a multiple of 8 and <= max_rows.
    for d in range(max_rows, 7, -8):
        if B % d == 0:
            return d
    return max_rows


def regulation_forward(X, g1, g2, *, tau=1.0, out_dtype=None,
                       block_rows=None, min_pallas_bytes=(256 << 10)):
    """Pallas forward for RegulationModule (use_bn=False).

    X : (B, F, D) array
    g1, g2 : (F,) parameters
    Returns (out1, out2), each (B, F, D) in `out_dtype` (default: X.dtype).
    """
    B, F, D = X.shape
    FD = F * D
    out_dtype = X.dtype if out_dtype is None else out_dtype
    itemsize = jnp.dtype(X.dtype).itemsize

    # Tiny F-length softmax hoisted to plain JAX (touches only F elements).
    gate1 = jax.nn.softmax(g1.astype(jnp.float32) / tau, axis=-1)   # (F,)
    gate2 = jax.nn.softmax(g2.astype(jnp.float32) / tau, axis=-1)   # (F,)

    # Small-problem fast path: XLA fuses the broadcast multiply for free.
    if B * FD * itemsize < min_pallas_bytes:
        o1 = (gate1[None, :, None] * X).astype(out_dtype)
        o2 = (gate2[None, :, None] * X).astype(out_dtype)
        return o1, o2

    gen = _tpu_generation()

    # Keep packed bf16 vregs on chips with a bf16 VALU (v6e/v7x); f32 gates on
    # v5e / unknown.
    if X.dtype == jnp.bfloat16 and gen >= 6:
        gate_dtype = jnp.bfloat16
    else:
        gate_dtype = jnp.float32

    # Lane-dense layout: flatten to (B, F*D) and pad the last dim up to a
    # 128 multiple so every output store is an unmasked full-lane vst.
    pad = (-FD) % 128
    FDp = FD + pad
    g1_row = jnp.repeat(gate1, D).astype(gate_dtype)
    g2_row = jnp.repeat(gate2, D).astype(gate_dtype)
    if pad:
        zeros = jnp.zeros((pad,), gate_dtype)
        g1_row = jnp.concatenate([g1_row, zeros])
        g2_row = jnp.concatenate([g2_row, zeros])
    g1_row = g1_row.reshape(1, FDp)
    g2_row = g2_row.reshape(1, FDp)

    x2d = X.reshape(B, FD)
    if pad:
        x2d = jnp.pad(x2d, ((0, 0), (0, pad)))

    # Generation-aware block sizing.  Pipeline footprint ~= 6 x block bytes
    # (1 input + 2 outputs, double-buffered):
    #   v5e:  2 MiB blocks -> ~12 MiB  (16 MiB scoped-VMEM default)
    #   v6e/v7x: 4 MiB blocks -> ~24 MiB (32 MiB scoped default; v7x has only
    #   64 MiB physical VMEM per TC, so never size toward 128 MiB).
    if gen == 6 or gen >= 7:
        target_block_bytes = 4 << 20
    else:
        target_block_bytes = 2 << 20
    require_two_steps = (gen >= 7)   # shard batch across v7x's 2 TensorCores

    row_bytes = FDp * itemsize
    if block_rows is not None:
        tb = block_rows
        if tb != B:
            tb = max(8, tb - tb % 8)
        tb = min(tb, B)
    else:
        tb = _pick_block_rows(B, row_bytes, target_block_bytes,
                              require_two_steps)
    grid = (pl.cdiv(B, tb),)

    out_shape = (
        jax.ShapeDtypeStruct((B, FDp), out_dtype),
        jax.ShapeDtypeStruct((B, FDp), out_dtype),
    )

    out1, out2 = pl.pallas_call(
        _regulation_kernel,
        out_shape=out_shape,
        grid=grid,
        in_specs=[
            pl.BlockSpec((1, FDp), lambda b: (0, 0)),    # gate1 row (resident)
            pl.BlockSpec((1, FDp), lambda b: (0, 0)),    # gate2 row (resident)
            pl.BlockSpec((tb, FDp), lambda b: (b, 0)),   # X rows
        ],
        out_specs=(
            pl.BlockSpec((tb, FDp), lambda b: (b, 0)),
            pl.BlockSpec((tb, FDp), lambda b: (b, 0)),
        ),
        compiler_params=pltpu.CompilerParams(
            dimension_semantics=("parallel",),
        ),
    )(g1_row, g2_row, x2d)

    if pad:
        out1 = out1[:, :FD]
        out2 = out2[:, :FD]
    return out1.reshape(B, F, D), out2.reshape(B, F, D)


def regulation_reference(X, g1, g2, *, tau=1.0):
    gate1 = jax.nn.softmax(g1 / tau, axis=-1)[None, :, None]
    gate2 = jax.nn.softmax(g2 / tau, axis=-1)[None, :, None]
    return gate1 * X, gate2 * X


def _check(o, r, tol=1e-6):
    assert o.shape == r.shape, (o.shape, r.shape)
    assert jnp.allclose(o.astype(jnp.float32), r.astype(jnp.float32),
                        atol=tol, rtol=tol), float(jnp.max(jnp.abs(o - r)))


if __name__ == "__main__":
    key = jax.random.PRNGKey(0)
    k1, k2, k3, k4, kg1, kg2 = jax.random.split(key, 6)

    # 1) Module-default small shape (batch=2, num_fields=4, embedding_dim=32):
    #    exercises the plain-JAX fast path; params exactly as __init__ (ones).
    B, F, D = 2, 4, 32
    X = jax.random.normal(k1, (B, F, D), dtype=jnp.float32)
    g1 = jnp.ones((F,), dtype=jnp.float32)
    g2 = jnp.ones((F,), dtype=jnp.float32)
    o1, o2 = regulation_forward(X, g1, g2, tau=1.0)
    o1, o2 = jax.block_until_ready(o1), jax.block_until_ready(o2)
    r1, r2 = regulation_reference(X, g1, g2, tau=1.0)
    _check(o1, r1); _check(o2, r2)

    # 2) Pallas path: larger batch, lane-dense FD = 128, non-uniform gates.
    B2 = 4096
    X2 = jax.random.normal(k2, (B2, F, D), dtype=jnp.float32)
    g1r = jax.random.normal(kg1, (F,), dtype=jnp.float32)
    g2r = jax.random.normal(kg2, (F,), dtype=jnp.float32)
    o1, o2 = regulation_forward(X2, g1r, g2r, tau=0.7)
    o1, o2 = jax.block_until_ready(o1), jax.block_until_ready(o2)
    r1, r2 = regulation_reference(X2, g1r, g2r, tau=0.7)
    _check(o1, r1); _check(o2, r2)

    # 3) Ragged batch (B % tb != 0) through the Pallas path: exercises the
    #    masked final block for the X read and both output writes.
    B3 = 100
    X3 = jax.random.normal(k3, (B3, F, D), dtype=jnp.float32)
    o1, o2 = regulation_forward(X3, g1r, g2r, tau=1.0,
                                block_rows=48, min_pallas_bytes=0)
    o1, o2 = jax.block_until_ready(o1), jax.block_until_ready(o2)
    r1, r2 = regulation_reference(X3, g1r, g2r, tau=1.0)
    _check(o1, r1); _check(o2, r2)

    # 4) Non-128-multiple F*D (F=5, D=24 -> FD=120): exercises lane padding.
    F4, D4, B4 = 5, 24, 64
    X4 = jax.random.normal(k4, (B4, F4, D4), dtype=jnp.float32)
    g1b = jax.random.normal(kg1, (F4,), dtype=jnp.float32)
    g2b = jax.random.normal(kg2, (F4,), dtype=jnp.float32)
    o1, o2 = regulation_forward(X4, g1b, g2b, tau=1.0, min_pallas_bytes=0)
    o1, o2 = jax.block_until_ready(o1), jax.block_until_ready(o2)
    r1, r2 = regulation_reference(X4, g1b, g2b, tau=1.0)
    _check(o1, r1); _check(o2, r2)

    print("KERNEL_OK")
</pallas_src>

<mosaic_0001>
module attributes {stable_mosaic.version = 11 : i64} {
  func.func @_regulation_kernel(%arg0: i32, %arg1: memref<1x128xf32, #tpu.memory_space<vmem>>, %arg2: memref<1x128xf32, #tpu.memory_space<vmem>>, %arg3: memref<4096x128xf32, #tpu.memory_space<vmem>>, %arg4: memref<4096x128xf32, #tpu.memory_space<vmem>>, %arg5: memref<4096x128xf32, #tpu.memory_space<vmem>>) attributes {dimension_semantics = [#tpu.dimension_semantics<parallel>], iteration_bounds = array<i64: 1>, scalar_prefetch = 0 : i64, scratch_operands = 0 : i64, tpu.core_type = #tpu.core_type<tc>, window_params = [{pipeline_mode = #tpu.pipeline_mode<synchronous>, transform_indices = @transform_0, window_bounds = array<i64: 1, 128>}, {pipeline_mode = #tpu.pipeline_mode<synchronous>, transform_indices = @transform_1, window_bounds = array<i64: 1, 128>}, {transform_indices = @transform_2, window_bounds = array<i64: 4096, 128>}, {transform_indices = @transform_3, window_bounds = array<i64: 4096, 128>}, {transform_indices = @transform_4, window_bounds = array<i64: 4096, 128>}]} {
    %c0 = arith.constant 0 : index
    %c0_0 = arith.constant 0 : index
    %0 = vector.load %arg3[%c0, %c0_0] : memref<4096x128xf32, #tpu.memory_space<vmem>>, vector<4096x128xf32>
    %c0_1 = arith.constant 0 : index
    %c0_2 = arith.constant 0 : index
    %1 = vector.load %arg1[%c0_1, %c0_2] : memref<1x128xf32, #tpu.memory_space<vmem>>, vector<1x128xf32>
    %2 = vector.broadcast %1 : vector<1x128xf32> to vector<4096x128xf32>
    %3 = arith.mulf %2, %0 : vector<4096x128xf32>
    %c0_3 = arith.constant 0 : index
    %c0_4 = arith.constant 0 : index
    %4 = vector.load %arg4[%c0_3, %c0_4] : memref<4096x128xf32, #tpu.memory_space<vmem>>, vector<4096x128xf32>
    tpu.vector_store %arg4[%c0_3, %c0_4], %3 {strides = array<i32>} : memref<4096x128xf32, #tpu.memory_space<vmem>>, vector<4096x128xf32>,
    %c0_5 = arith.constant 0 : index
    %c0_6 = arith.constant 0 : index
    %5 = vector.load %arg2[%c0_5, %c0_6] : memref<1x128xf32, #tpu.memory_space<vmem>>, vector<1x128xf32>
    %6 = vector.broadcast %5 : vector<1x128xf32> to vector<4096x128xf32>
    %7 = arith.mulf %6, %0 : vector<4096x128xf32>
    %c0_7 = arith.constant 0 : index
    %c0_8 = arith.constant 0 : index
    %8 = vector.load %arg5[%c0_7, %c0_8] : memref<4096x128xf32, #tpu.memory_space<vmem>>, vector<4096x128xf32>
    tpu.vector_store %arg5[%c0_7, %c0_8], %7 {strides = array<i32>} : memref<4096x128xf32, #tpu.memory_space<vmem>>, vector<4096x128xf32>,
    return
  }
  func.func @transform_0(%arg0: i32) -> (i32, i32) {
    %c0_i32 = arith.constant 0 : i32
    %c0_i32_0 = arith.constant 0 : i32
    %c0_i32_1 = arith.constant 0 : i32
    return %c0_i32, %c0_i32_0 : i32, i32
  }
  func.func @transform_1(%arg0: i32) -> (i32, i32) {
    %c0_i32 = arith.constant 0 : i32
    %c0_i32_0 = arith.constant 0 : i32
    %c0_i32_1 = arith.constant 0 : i32
    return %c0_i32, %c0_i32_0 : i32, i32
  }
  func.func @transform_2(%arg0: i32) -> (i32, i32) {
    %c0_i32 = arith.constant 0 : i32
    %c0_i32_0 = arith.constant 0 : i32
    return %arg0, %c0_i32 : i32, i32
  }
  func.func @transform_3(%arg0: i32) -> (i32, i32) {
    %c0_i32 = arith.constant 0 : i32
    %c0_i32_0 = arith.constant 0 : i32
    return %arg0, %c0_i32 : i32, i32
  }
  func.func @transform_4(%arg0: i32) -> (i32, i32) {
    %c0_i32 = arith.constant 0 : i32
    %c0_i32_0 = arith.constant 0 : i32
    return %arg0, %c0_i32 : i32, i32
  }
}

</mosaic_0001>

<bundles_post_ra>
// kernel: tpu_custom_call.1
= control target key start
LH: loop header
LB: loop body
LE: loop exit
PB: predicated region body
PF: predicated region fallthrough
CT: control target
= control target key end

     0   :  { %10 = vsyncpa [#allocation3], 0  ;;  %s4403_s0 = inlined_call_operand.hbm [shape: f32[1,128], index: 0, kind: input, shape index: {}]   ;;  %s4404_s1 = inlined_call_operand.hbm [shape: f32[1,128], index: 1, kind: input, shape index: {}]   ;;  %s4405_s2 = inlined_call_operand.hbm [shape: f32[4096,128], index: 2, kind: input, shape index: {}]   ;;  %s4406_s3 = inlined_call_operand.hbm [shape: f32[4096,128], index: 3, kind: output, shape index: {0}]   ;;  %s4407_s4 = inlined_call_operand.hbm [shape: f32[4096,128], index: 4, kind: output, shape index: {1}]  }
   0x1   :  { %11 = vsyncpa [#allocation6], 0 }
   0x2   :  { %12 = vsyncpa [#allocation4], 0  ;;  %s30_s17 = sshll.u32 %s4404_s1, 4  ;;  %s31_s17 = int_to_ptr.hbm [resolvable:$true] %s30_s17 }
   0x3   :  { %13 = vsyncpa [#allocation10], 0  ;;  %s3320_s18 = smov [#allocation5]   ;;  %s19_s22 = sshll.u32 %s4403_s0, 4  ;;  %s20_s22 = int_to_ptr.hbm [resolvable:$true] %s19_s22 }
   0x4   :  { %s32_s19 = sshll.u32 %s3320_s18, 4  ;;  %s3321_s23 = smov [#allocation2]   ;;  %s33_s19 = int_to_ptr.vmem [resolvable:$true] %s32_s19 }
   0x5   :  { %35 = dma.hbm_to_vmem [thread:$0]  %s31_s17, 16, %s33_s19, [#allocation6]  }
   0x6   :  { %s21_s24 = sshll.u32 %s3321_s23, 4  ;;  %s40_s27 = sshll.u32 %s4405_s2, 4  ;;  %s22_s24 = int_to_ptr.vmem [resolvable:$true] %s21_s24  ;;  %s41_s27 = int_to_ptr.hbm [resolvable:$true] %s40_s27 }
   0x7   :  { %24 = dma.hbm_to_vmem [thread:$0]  %s20_s22, 16, %s22_s24, [#allocation3]  }
   0x8   :  { %s3322_s1 = smov [#allocation7]   ;;  %s3323_s29 = smov 128  }
   0x9   :  { %s42_s28 = sshll.u32 %s3322_s1, 4  ;;  %s3324_s30 = smov 8   ;;  %s43_s28 = int_to_ptr.vmem [resolvable:$true] %s42_s28 }
   0xa   :  { %48 = dma.hbm_to_vmem [thread:$0]  %s41_s27, 65536, %s43_s28, [#allocation6], %s3323_s29, %s3323_s29, %s3324_s30  }
   0xb   :  { %3312 = dma.done.wait [#allocation3], 16  }
   0xc   :  { %3313 = vsyncadd [#allocation3], 4294967280 }
   0xd   :  { %3314 = dma.done.wait [#allocation6], 65552  }
   0xe   :  { %3315 = vsyncadd [#allocation6], 4294901744  ;;  %v61_v0 = vld [vmem:[#allocation7] sm:$0xff]  ;;  %v3364_v1 = vld [vmem:[#allocation2] ss:$0 sm:$0xff]  ;;  %s3325_s0 = smov [#allocation8]  }
   0xf   :  { %v62_v2 = vld [vmem:[#allocation7 + $0x8] sm:$0xff]  ;;  %v63_v3 = vld [vmem:[#allocation7 + $0x10] sm:$0xff]  ;;  %v64_v4 = vld [vmem:[#allocation7 + $0x18] sm:$0xff]  ;;  %v577_v5 = vmul.f32 %v3364_v1, %v61_v0  ;;  %s2633_s2 = sshll.u32 %s3325_s0, 4  ;;  %s2635_s7 = sshll.u32 %s4406_s3, 4  ;;  %s2634_s2 = int_to_ptr.vmem [resolvable:$true] %s2633_s2  ;;  %s2636_s7 = int_to_ptr.hbm [resolvable:$true] %s2635_s7 }
  0x10   :  { %v578_v6 = vmul.f32 %v3364_v1, %v62_v2  ;;  %v579_v7 = vmul.f32 %v3364_v1, %v63_v3  ;;  %v65_v8 = vld [vmem:[#allocation7 + $0x20] sm:$0xff]  ;;  %v66_v9 = vld [vmem:[#allocation7 + $0x28] sm:$0xff]  ;;  %v580_v10 = vmul.f32 %v3364_v1, %v64_v4  ;;  %v67_v11 = vld [vmem:[#allocation7 + $0x30] sm:$0xff]  ;;  %s3326_s3 = smov [#allocation9]   ;;  %s2648_s11 = sshll.u32 %s4407_s4, 4  ;;  %s2649_s11 = int_to_ptr.hbm [resolvable:$true] %s2648_s11 }
  0x11   :  { %1089 = vst [vmem:[#allocation8] sm:$0xff] %v577_v5  ;;  %v581_v12 = vmul.f32 %v3364_v1, %v65_v8  ;;  %v68_v13 = vld [vmem:[#allocation7 + $0x38] sm:$0xff]  ;;  %v582_v14 = vmul.f32 %v3364_v1, %v66_v9  ;;  %v69_v15 = vld [vmem:[#allocation7 + $0x40] sm:$0xff]  ;;  %v583_v16 = vmul.f32 %v3364_v1, %v67_v11  ;;  %v70_v17 = vld [vmem:[#allocation7 + $0x48] sm:$0xff]  ;;  %s2646_s8 = sshll.u32 %s3326_s3, 4  ;;  %s2647_s8 = int_to_ptr.vmem [resolvable:$true] %s2646_s8 }
  0x12   :  { %1090 = vst [vmem:[#allocation8 + $0x8] sm:$0xff] %v578_v6  ;;  %v584_v18 = vmul.f32 %v3364_v1, %v68_v13  ;;  %v71_v19 = vld [vmem:[#allocation7 + $0x50] sm:$0xff]  ;;  %v585_v20 = vmul.f32 %v3364_v1, %v69_v15  ;;  %v72_v21 = vld [vmem:[#allocation7 + $0x58] sm:$0xff]  ;;  %v586_v22 = vmul.f32 %v3364_v1, %v70_v17  ;;  %v73_v23 = vld [vmem:[#allocation7 + $0x60] sm:$0xff] }
  0x13   :  { %1091 = vst [vmem:[#allocation8 + $0x10] sm:$0xff] %v579_v7  ;;  %v587_v24 = vmul.f32 %v3364_v1, %v71_v19  ;;  %v74_v25 = vld [vmem:[#allocation7 + $0x68] sm:$0xff]  ;;  %v588_v26 = vmul.f32 %v3364_v1, %v72_v21  ;;  %v75_v27 = vld [vmem:[#allocation7 + $0x70] sm:$0xff]  ;;  %v589_v28 = vmul.f32 %v3364_v1, %v73_v23  ;;  %v76_v29 = vld [vmem:[#allocation7 + $0x78] sm:$0xff] }
  0x14   :  { %1092 = vst [vmem:[#allocation8 + $0x18] sm:$0xff] %v580_v10  ;;  %v590_v30 = vmul.f32 %v3364_v1, %v74_v25  ;;  %v77_v31 = vld [vmem:[#allocation7 + $0x80] sm:$0xff]  ;;  %v591_v32 = vmul.f32 %v3364_v1, %v75_v27  ;;  %v78_v33 = vld [vmem:[#allocation7 + $0x88] sm:$0xff]  ;;  %v592_v34 = vmul.f32 %v3364_v1, %v76_v29  ;;  %v79_v35 = vld [vmem:[#allocation7 + $0x90] sm:$0xff] }
  0x15   :  { %1093 = vst [vmem:[#allocation8 + $0x20] sm:$0xff] %v581_v12  ;;  %v593_v36 = vmul.f32 %v3364_v1, %v77_v31  ;;  %v80_v37 = vld [vmem:[#allocation7 + $0x98] sm:$0xff]  ;;  %v594_v38 = vmul.f32 %v3364_v1, %v78_v33  ;;  %v81_v39 = vld [vmem:[#allocation7 + $0xa0] sm:$0xff]  ;;  %v595_v40 = vmul.f32 %v3364_v1, %v79_v35  ;;  %v82_v41 = vld [vmem:[#allocation7 + $0xa8] sm:$0xff] }
  0x16   :  { %1094 = vst [vmem:[#allocation8 + $0x28] sm:$0xff] %v582_v14  ;;  %v596_v42 = vmul.f32 %v3364_v1, %v80_v37  ;;  %v83_v43 = vld [vmem:[#allocation7 + $0xb0] sm:$0xff]  ;;  %v597_v44 = vmul.f32 %v3364_v1, %v81_v39  ;;  %v84_v45 = vld [vmem:[#allocation7 + $0xb8] sm:$0xff]  ;;  %v598_v46 = vmul.f32 %v3364_v1, %v82_v41  ;;  %v85_v47 = vld [vmem:[#allocation7 + $0xc0] sm:$0xff] }
  0x17   :  { %1095 = vst [vmem:[#allocation8 + $0x30] sm:$0xff] %v583_v16  ;;  %v599_v48 = vmul.f32 %v3364_v1, %v83_v43  ;;  %v86_v49 = vld [vmem:[#allocation7 + $0xc8] sm:$0xff]  ;;  %v600_v50 = vmul.f32 %v3364_v1, %v84_v45  ;;  %v87_v51 = vld [vmem:[#allocation7 + $0xd0] sm:$0xff]  ;;  %v601_v52 = vmul.f32 %v3364_v1, %v85_v47  ;;  %v88_v53 = vld [vmem:[#allocation7 + $0xd8] sm:$0xff] }
  0x18   :  { %1096 = vst [vmem:[#allocation8 + $0x38] sm:$0xff] %v584_v18  ;;  %v602_v54 = vmul.f32 %v3364_v1, %v86_v49  ;;  %v89_v55 = vld [vmem:[#allocation7 + $0xe0] sm:$0xff]  ;;  %v603_v56 = vmul.f32 %v3364_v1, %v87_v51  ;;  %v90_v57 = vld [vmem:[#allocation7 + $0xe8] sm:$0xff]  ;;  %v604_v58 = vmul.f32 %v3364_v1, %v88_v53  ;;  %v91_v59 = vld [vmem:[#allocation7 + $0xf0] sm:$0xff] }
  0x19   :  { %1097 = vst [vmem:[#allocation8 + $0x40] sm:$0xff] %v585_v20  ;;  %v605_v60 = vmul.f32 %v3364_v1, %v89_v55  ;;  %v92_v61 = vld [vmem:[#allocation7 + $0xf8] sm:$0xff]  ;;  %v606_v62 = vmul.f32 %v3364_v1, %v90_v57  ;;  %v93_v63 = vld [vmem:[#allocation7 + $0x100] sm:$0xff]  ;;  %v607_v0 = vmul.f32 %v3364_v1, %v91_v59  ;;  %v94_v2 = vld [vmem:[#allocation7 + $0x108] sm:$0xff] }
  0x1a   :  { %1098 = vst [vmem:[#allocation8 + $0x48] sm:$0xff] %v586_v22  ;;  %v608_v3 = vmul.f32 %v3364_v1, %v92_v61  ;;  %v95_v4 = vld [vmem:[#allocation7 + $0x110] sm:$0xff]  ;;  %v609_v5 = vmul.f32 %v3364_v1, %v93_v63  ;;  %v96_v6 = vld [vmem:[#allocation7 + $0x118] sm:$0xff]  ;;  %v610_v7 = vmul.f32 %v3364_v1, %v94_v2  ;;  %v97_v8 = vld [vmem:[#allocation7 + $0x120] sm:$0xff] }
  0x1b   :  { %1099 = vst [vmem:[#allocation8 + $0x50] sm:$0xff] %v587_v24  ;;  %v611_v9 = vmul.f32 %v3364_v1, %v95_v4  ;;  %v98_v10 = vld [vmem:[#allocation7 + $0x128] sm:$0xff]  ;;  %v612_v11 = vmul.f32 %v3364_v1, %v96_v6  ;;  %v99_v12 = vld [vmem:[#allocation7 + $0x130] sm:$0xff]  ;;  %v613_v13 = vmul.f32 %v3364_v1, %v97_v8  ;;  %v100_v14 = vld [vmem:[#allocation7 + $0x138] sm:$0xff] }
  0x1c   :  { %1100 = vst [vmem:[#allocation8 + $0x58] sm:$0xff] %v588_v26  ;;  %v614_v15 = vmul.f32 %v3364_v1, %v98_v10  ;;  %v101_v16 = vld [vmem:[#allocation7 + $0x140] sm:$0xff]  ;;  %v615_v17 = vmul.f32 %v3364_v1, %v99_v12  ;;  %v102_v18 = vld [vmem:[#allocation7 + $0x148] sm:$0xff]  ;;  %v616_v19 = vmul.f32 %v3364_v1, %v100_v14  ;;  %v103_v20 = vld [vmem:[#allocation7 + $0x150] sm:$0xff] }
  0x1d   :  { %1101 = vst [vmem:[#allocation8 + $0x60] sm:$0xff] %v589_v28  ;;  %v617_v21 = vmul.f32 %v3364_v1, %v101_v16  ;;  %v104_v22 = vld [vmem:[#allocation7 + $0x158] sm:$0xff]  ;;  %v618_v23 = vmul.f32 %v3364_v1, %v102_v18  ;;  %v105_v24 = vld [vmem:[#allocation7 + $0x160] sm:$0xff]  ;;  %v619_v25 = vmul.f32 %v3364_v1, %v103_v20  ;;  %v106_v26 = vld [vmem:[#allocation7 + $0x168] sm:$0xff] }
  0x1e   :  { %1102 = vst [vmem:[#allocation8 + $0x68] sm:$0xff] %v590_v30  ;;  %v620_v27 = vmul.f32 %v3364_v1, %v104_v22  ;;  %v107_v28 = vld [vmem:[#allocation7 + $0x170] sm:$0xff]  ;;  %v621_v29 = vmul.f32 %v3364_v1, %v105_v24  ;;  %v108_v30 = vld [vmem:[#allocation7 + $0x178] sm:$0xff]  ;;  %v622_v31 = vmul.f32 %v3364_v1, %v106_v26 }
  0x1f   :  { %1103 = vst [vmem:[#allocation8 + $0x70] sm:$0xff] %v591_v32  ;;  %v109_v32 = vld [vmem:[#allocation7 + $0x180] sm:$0xff]  ;;  %v623_v33 = vmul.f32 %v3364_v1, %v107_v28  ;;  %v624_v35 = vmul.f32 %v3364_v1, %v108_v30 }
  0x20   :  { %1104 = vst [vmem:[#allocation8 + $0x78] sm:$0xff] %v592_v34  ;;  %v110_v34 = vld [vmem:[#allocation7 + $0x188] sm:$0xff]  ;;  %v625_v37 = vmul.f32 %v3364_v1, %v109_v32 }
  0x21   :  { %1105 = vst [vmem:[#allocation8 + $0x80] sm:$0xff] %v593_v36  ;;  %v111_v36 = vld [vmem:[#allocation7 + $0x190] sm:$0xff]  ;;  %v626_v39 = vmul.f32 %v3364_v1, %v110_v34 }
  0x22   :  { %1106 = vst [vmem:[#allocation8 + $0x88] sm:$0xff] %v594_v38  ;;  %v112_v38 = vld [vmem:[#allocation7 + $0x198] sm:$0xff]  ;;  %v627_v41 = vmul.f32 %v3364_v1, %v111_v36 }
  0x23   :  { %1107 = vst [vmem:[#allocation8 + $0x90] sm:$0xff] %v595_v40  ;;  %v113_v40 = vld [vmem:[#allocation7 + $0x1a0] sm:$0xff]  ;;  %v628_v43 = vmul.f32 %v3364_v1, %v112_v38 }
  0x24   :  { %1108 = vst [vmem:[#allocation8 + $0x98] sm:$0xff] %v596_v42  ;;  %v114_v42 = vld [vmem:[#allocation7 + $0x1a8] sm:$0xff]  ;;  %v629_v45 = vmul.f32 %v3364_v1, %v113_v40 }
  0x25   :  { %1109 = vst [vmem:[#allocation8 + $0xa0] sm:$0xff] %v597_v44  ;;  %v115_v44 = vld [vmem:[#allocation7 + $0x1b0] sm:$0xff]  ;;  %v630_v47 = vmul.f32 %v3364_v1, %v114_v42 }
  0x26   :  { %1110 = vst [vmem:[#allocation8 + $0xa8] sm:$0xff] %v598_v46  ;;  %v116_v46 = vld [vmem:[#allocation7 + $0x1b8] sm:$0xff]  ;;  %v631_v49 = vmul.f32 %v3364_v1, %v115_v44 }
  0x27   :  { %1111 = vst [vmem:[#allocation8 + $0xb0] sm:$0xff] %v599_v48  ;;  %v117_v48 = vld [vmem:[#allocation7 + $0x1c0] sm:$0xff]  ;;  %v632_v51 = vmul.f32 %v3364_v1, %v116_v46 }
  0x28   :  { %1112 = vst [vmem:[#allocation8 + $0xb8] sm:$0xff] %v600_v50  ;;  %v118_v50 = vld [vmem:[#allocation7 + $0x1c8] sm:$0xff]  ;;  %v633_v53 = vmul.f32 %v3364_v1, %v117_v48 }
  0x29   :  { %1113 = vst [vmem:[#allocation8 + $0xc0] sm:$0xff] %v601_v52  ;;  %v119_v52 = vld [vmem:[#allocation7 + $0x1d0] sm:$0xff]  ;;  %v634_v55 = vmul.f32 %v3364_v1, %v118_v50 }
  0x2a   :  { %1114 = vst [vmem:[#allocation8 + $0xc8] sm:$0xff] %v602_v54  ;;  %v120_v54 = vld [vmem:[#allocation7 + $0x1d8] sm:$0xff]  ;;  %v635_v57 = vmul.f32 %v3364_v1, %v119_v52 }
  0x2b   :  { %1115 = vst [vmem:[#allocation8 + $0xd0] sm:$0xff] %v603_v56  ;;  %v121_v56 = vld [vmem:[#allocation7 + $0x1e0] sm:$0xff]  ;;  %v636_v59 = vmul.f32 %v3364_v1, %v120_v54 }
  0x2c   :  { %1116 = vst [vmem:[#allocation8 + $0xd8] sm:$0xff] %v604_v58  ;;  %v122_v58 = vld [vmem:[#allocation7 + $0x1e8] sm:$0xff]  ;;  %v637_v61 = vmul.f32 %v3364_v1, %v121_v56 }
  0x2d   :  { %1117 = vst [vmem:[#allocation8 + $0xe0] sm:$0xff] %v605_v60  ;;  %v123_v60 = vld [vmem:[#allocation7 + $0x1f0] sm:$0xff]  ;;  %v638_v63 = vmul.f32 %v3364_v1, %v122_v58 }
  0x2e   :  { %1118 = vst [vmem:[#allocation8 + $0xe8] sm:$0xff] %v606_v62  ;;  %v124_v62 = vld [vmem:[#allocation7 + $0x1f8] sm:$0xff]  ;;  %v639_v2 = vmul.f32 %v3364_v1, %v123_v60 }
  0x2f   :  { %1119 = vst [vmem:[#allocation8 + $0xf0] sm:$0xff] %v607_v0  ;;  %v125_v0 = vld [vmem:[#allocation7 + $0x200] sm:$0xff]  ;;  %v640_v4 = vmul.f32 %v3364_v1, %v124_v62 }
  0x30   :  { %1120 = vst [vmem:[#allocation8 + $0xf8] sm:$0xff] %v608_v3  ;;  %v126_v3 = vld [vmem:[#allocation7 + $0x208] sm:$0xff]  ;;  %v641_v6 = vmul.f32 %v3364_v1, %v125_v0 }
  0x31   :  { %1121 = vst [vmem:[#allocation8 + $0x100] sm:$0xff] %v609_v5  ;;  %v127_v5 = vld [vmem:[#allocation7 + $0x210] sm:$0xff]  ;;  %v642_v8 = vmul.f32 %v3364_v1, %v126_v3 }
  0x32   :  { %1122 = vst [vmem:[#allocation8 + $0x108] sm:$0xff] %v610_v7  ;;  %v128_v7 = vld [vmem:[#allocation7 + $0x218] sm:$0xff]  ;;  %v643_v10 = vmul.f32 %v3364_v1, %v127_v5 }
  0x33   :  { %1123 = vst [vmem:[#allocation8 + $0x110] sm:$0xff] %v611_v9  ;;  %v129_v9 = vld [vmem:[#allocation7 + $0x220] sm:$0xff]  ;;  %v644_v12 = vmul.f32 %v3364_v1, %v128_v7 }
  0x34   :  { %1124 = vst [vmem:[#allocation8 + $0x118] sm:$0xff] %v612_v11  ;;  %v130_v11 = vld [vmem:[#allocation7 + $0x228] sm:$0xff]  ;;  %v645_v14 = vmul.f32 %v3364_v1, %v129_v9 }
  0x35   :  { %1125 = vst [vmem:[#allocation8 + $0x120] sm:$0xff] %v613_v13  ;;  %v131_v13 = vld [vmem:[#allocation7 + $0x230] sm:$0xff]  ;;  %v646_v16 = vmul.f32 %v3364_v1, %v130_v11 }
  0x36   :  { %1126 = vst [vmem:[#allocation8 + $0x128] sm:$0xff] %v614_v15  ;;  %v132_v15 = vld [vmem:[#allocation7 + $0x238] sm:$0xff]  ;;  %v647_v18 = vmul.f32 %v3364_v1, %v131_v13 }
  0x37   :  { %1127 = vst [vmem:[#allocation8 + $0x130] sm:$0xff] %v615_v17  ;;  %v133_v17 = vld [vmem:[#allocation7 + $0x240] sm:$0xff]  ;;  %v648_v20 = vmul.f32 %v3364_v1, %v132_v15 }
  0x38   :  { %1128 = vst [vmem:[#allocation8 + $0x138] sm:$0xff] %v616_v19  ;;  %v134_v19 = vld [vmem:[#allocation7 + $0x248] sm:$0xff]  ;;  %v649_v22 = vmul.f32 %v3364_v1, %v133_v17 }
  0x39   :  { %1129 = vst [vmem:[#allocation8 + $0x140] sm:$0xff] %v617_v21  ;;  %v135_v21 = vld [vmem:[#allocation7 + $0x250] sm:$0xff]  ;;  %v650_v24 = vmul.f32 %v3364_v1, %v134_v19 }
  0x3a   :  { %1130 = vst [vmem:[#allocation8 + $0x148] sm:$0xff] %v618_v23  ;;  %v136_v23 = vld [vmem:[#allocation7 + $0x258] sm:$0xff]  ;;  %v651_v26 = vmul.f32 %v3364_v1, %v135_v21 }
  0x3b   :  { %1131 = vst [vmem:[#allocation8 + $0x150] sm:$0xff] %v619_v25  ;;  %v137_v25 = vld [vmem:[#allocation7 + $0x260] sm:$0xff]  ;;  %v652_v28 = vmul.f32 %v3364_v1, %v136_v23 }
  0x3c   :  { %1132 = vst [vmem:[#allocation8 + $0x158] sm:$0xff] %v620_v27  ;;  %v138_v27 = vld [vmem:[#allocation7 + $0x268] sm:$0xff]  ;;  %v653_v30 = vmul.f32 %v3364_v1, %v137_v25 }
  0x3d   :  { %1133 = vst [vmem:[#allocation8 + $0x160] sm:$0xff] %v621_v29  ;;  %v139_v29 = vld [vmem:[#allocation7 + $0x270] sm:$0xff]  ;;  %v654_v32 = vmul.f32 %v3364_v1, %v138_v27 }
  0x3e   :  { %1134 = vst [vmem:[#allocation8 + $0x168] sm:$0xff] %v622_v31  ;;  %v140_v31 = vld [vmem:[#allocation7 + $0x278] sm:$0xff]  ;;  %v655_v34 = vmul.f32 %v3364_v1, %v139_v29 }
  0x3f   :  { %1135 = vst [vmem:[#allocation8 + $0x170] sm:$0xff] %v623_v33  ;;  %v141_v33 = vld [vmem:[#allocation7 + $0x280] sm:$0xff]  ;;  %v656_v36 = vmul.f32 %v3364_v1, %v140_v31 }
  0x40   :  { %1136 = vst [vmem:[#allocation8 + $0x178] sm:$0xff] %v624_v35  ;;  %v142_v35 = vld [vmem:[#allocation7 + $0x288] sm:$0xff]  ;;  %v657_v38 = vmul.f32 %v3364_v1, %v141_v33 }
  0x41   :  { %1137 = vst [vmem:[#allocation8 + $0x180] sm:$0xff] %v625_v37  ;;  %v143_v37 = vld [vmem:[#allocation7 + $0x290] sm:$0xff]  ;;  %v658_v40 = vmul.f32 %v3364_v1, %v142_v35 }
  0x42   :  { %1138 = vst [vmem:[#allocation8 + $0x188] sm:$0xff] %v626_v39  ;;  %v144_v39 = vld [vmem:[#allocation7 + $0x298] sm:$0xff]  ;;  %v659_v42 = vmul.f32 %v3364_v1, %v143_v37 }
  0x43   :  { %1139 = vst [vmem:[#allocation8 + $0x190] sm:$0xff] %v627_v41  ;;  %v145_v41 = vld [vmem:[#allocation7 + $0x2a0] sm:$0xff]  ;;  %v660_v44 = vmul.f32 %v3364_v1, %v144_v39 }
  0x44   :  { %1140 = vst [vmem:[#allocation8 + $0x198] sm:$0xff] %v628_v43  ;;  %v146_v43 = vld [vmem:[#allocation7 + $0x2a8] sm:$0xff]  ;;  %v661_v46 = vmul.f32 %v3364_v1, %v145_v41 }
  0x45   :  { %1141 = vst [vmem:[#allocation8 + $0x1a0] sm:$0xff] %v629_v45  ;;  %v147_v45 = vld [vmem:[#allocation7 + $0x2b0] sm:$0xff]  ;;  %v662_v48 = vmul.f32 %v3364_v1, %v146_v43 }
  0x46   :  { %1142 = vst [vmem:[#allocation8 + $0x1a8] sm:$0xff] %v630_v47  ;;  %v148_v47 = vld [vmem:[#allocation7 + $0x2b8] sm:$0xff]  ;;  %v663_v50 = vmul.f32 %v3364_v1, %v147_v45 }
  0x47   :  { %1143 = vst [vmem:[#allocation8 + $0x1b0] sm:$0xff] %v631_v49  ;;  %v149_v49 = vld [vmem:[#allocation7 + $0x2c0] sm:$0xff]  ;;  %v664_v52 = vmul.f32 %v3364_v1, %v148_v47 }
  0x48   :  { %1144 = vst [vmem:[#allocation8 + $0x1b8] sm:$0xff] %v632_v51  ;;  %v150_v51 = vld [vmem:[#allocation7 + $0x2c8] sm:$0xff]  ;;  %v665_v54 = vmul.f32 %v3364_v1, %v149_v49 }
  0x49   :  { %1145 = vst [vmem:[#allocation8 + $0x1c0] sm:$0xff] %v633_v53  ;;  %v151_v53 = vld [vmem:[#allocation7 + $0x2d0] sm:$0xff]  ;;  %v666_v56 = vmul.f32 %v3364_v1, %v150_v51 }
  0x4a   :  { %1146 = vst [vmem:[#allocation8 + $0x1c8] sm:$0xff] %v634_v55  ;;  %v152_v55 = vld [vmem:[#allocation7 + $0x2d8] sm:$0xff]  ;;  %v667_v58 = vmul.f32 %v3364_v1, %v151_v53 }
  0x4b   :  { %1147 = vst [vmem:[#allocation8 + $0x1d0] sm:$0xff] %v635_v57  ;;  %v153_v57 = vld [vmem:[#allocation7 + $0x2e0] sm:$0xff]  ;;  %v668_v60 = vmul.f32 %v3364_v1, %v152_v55 }
  0x4c   :  { %1148 = vst [vmem:[#allocation8 + $0x1d8] sm:$0xff] %v636_v59  ;;  %v154_v59 = vld [vmem:[#allocation7 + $0x2e8] sm:$0xff]  ;;  %v669_v62 = vmul.f32 %v3364_v1, %v153_v57 }
  0x4d   :  { %1149 = vst [vmem:[#allocation8 + $0x1e0] sm:$0xff] %v637_v61  ;;  %v155_v61 = vld [vmem:[#allocation7 + $0x2f0] sm:$0xff]  ;;  %v670_v0 = vmul.f32 %v3364_v1, %v154_v59 }
  0x4e   :  { %1150 = vst [vmem:[#allocation8 + $0x1e8] sm:$0xff] %v638_v63  ;;  %v156_v63 = vld [vmem:[#allocation7 + $0x2f8] sm:$0xff]  ;;  %v671_v3 = vmul.f32 %v3364_v1, %v155_v61 }
  0x4f   :  { %1151 = vst [vmem:[#allocation8 + $0x1f0] sm:$0xff] %v639_v2  ;;  %v157_v2 = vld [vmem:[#allocation7 + $0x300] sm:$0xff]  ;;  %v672_v5 = vmul.f32 %v3364_v1, %v156_v63 }
  0x50   :  { %1152 = vst [vmem:[#allocation8 + $0x1f8] sm:$0xff] %v640_v4  ;;  %v158_v4 = vld [vmem:[#allocation7 + $0x308] sm:$0xff]  ;;  %v673_v7 = vmul.f32 %v3364_v1, %v157_v2 }
  0x51   :  { %1153 = vst [vmem:[#allocation8 + $0x200] sm:$0xff] %v641_v6  ;;  %v159_v6 = vld [vmem:[#allocation7 + $0x310] sm:$0xff]  ;;  %v674_v9 = vmul.f32 %v3364_v1, %v158_v4 }
  0x52   :  { %1154 = vst [vmem:[#allocation8 + $0x208] sm:$0xff] %v642_v8  ;;  %v160_v8 = vld [vmem:[#allocation7 + $0x318] sm:$0xff]  ;;  %v675_v11 = vmul.f32 %v3364_v1, %v159_v6 }
  0x53   :  { %1155 = vst [vmem:[#allocation8 + $0x210] sm:$0xff] %v643_v10  ;;  %v161_v10 = vld [vmem:[#allocation7 + $0x320] sm:$0xff]  ;;  %v676_v13 = vmul.f32 %v3364_v1, %v160_v8 }
  0x54   :  { %1156 = vst [vmem:[#allocation8 + $0x218] sm:$0xff] %v644_v12  ;;  %v162_v12 = vld [vmem:[#allocation7 + $0x328] sm:$0xff]  ;;  %v677_v15 = vmul.f32 %v3364_v1, %v161_v10 }
  0x55   :  { %1157 = vst [vmem:[#allocation8 + $0x220] sm:$0xff] %v645_v14  ;;  %v163_v14 = vld [vmem:[#allocation7 + $0x330] sm:$0xff]  ;;  %v678_v17 = vmul.f32 %v3364_v1, %v162_v12 }
  0x56   :  { %1158 = vst [vmem:[#allocation8 + $0x228] sm:$0xff] %v646_v16  ;;  %v164_v16 = vld [vmem:[#allocation7 + $0x338] sm:$0xff]  ;;  %v679_v19 = vmul.f32 %v3364_v1, %v163_v14 }
  0x57   :  { %1159 = vst [vmem:[#allocation8 + $0x230] sm:$0xff] %v647_v18  ;;  %v165_v18 = vld [vmem:[#allocation7 + $0x340] sm:$0xff]  ;;  %v680_v21 = vmul.f32 %v3364_v1, %v164_v16 }
  0x58   :  { %1160 = vst [vmem:[#allocation8 + $0x238] sm:$0xff] %v648_v20  ;;  %v166_v20 = vld [vmem:[#allocation7 + $0x348] sm:$0xff]  ;;  %v681_v23 = vmul.f32 %v3364_v1, %v165_v18 }
  0x59   :  { %1161 = vst [vmem:[#allocation8 + $0x240] sm:$0xff] %v649_v22  ;;  %v167_v22 = vld [vmem:[#allocation7 + $0x350] sm:$0xff]  ;;  %v682_v25 = vmul.f32 %v3364_v1, %v166_v20 }
  0x5a   :  { %1162 = vst [vmem:[#allocation8 + $0x248] sm:$0xff] %v650_v24  ;;  %v168_v24 = vld [vmem:[#allocation7 + $0x358] sm:$0xff]  ;;  %v683_v27 = vmul.f32 %v3364_v1, %v167_v22 }
  0x5b   :  { %1163 = vst [vmem:[#allocation8 + $0x250] sm:$0xff] %v651_v26  ;;  %v169_v26 = vld [vmem:[#allocation7 + $0x360] sm:$0xff]  ;;  %v684_v29 = vmul.f32 %v3364_v1, %v168_v24 }
  0x5c   :  { %1164 = vst [vmem:[#allocation8 + $0x258] sm:$0xff] %v652_v28  ;;  %v170_v28 = vld [vmem:[#allocation7 + $0x368] sm:$0xff]  ;;  %v685_v31 = vmul.f32 %v3364_v1, %v169_v26 }
  0x5d   :  { %1165 = vst [vmem:[#allocation8 + $0x260] sm:$0xff] %v653_v30  ;;  %v171_v30 = vld [vmem:[#allocation7 + $0x370] sm:$0xff]  ;;  %v686_v33 = vmul.f32 %v3364_v1, %v170_v28 }
  0x5e   :  { %1166 = vst [vmem:[#allocation8 + $0x268] sm:$0xff] %v654_v32  ;;  %v172_v32 = vld [vmem:[#allocation7 + $0x378] sm:$0xff]  ;;  %v687_v35 = vmul.f32 %v3364_v1, %v171_v30 }
  0x5f   :  { %1167 = vst [vmem:[#allocation8 + $0x270] sm:$0xff] %v655_v34  ;;  %v173_v34 = vld [vmem:[#allocation7 + $0x380] sm:$0xff]  ;;  %v688_v37 = vmul.f32 %v3364_v1, %v172_v32 }
  0x60   :  { %1168 = vst [vmem:[#allocation8 + $0x278] sm:$0xff] %v656_v36  ;;  %v174_v36 = vld [vmem:[#allocation7 + $0x388] sm:$0xff]  ;;  %v689_v39 = vmul.f32 %v3364_v1, %v173_v34 }
  0x61   :  { %1169 = vst [vmem:[#allocation8 + $0x280] sm:$0xff] %v657_v38  ;;  %v175_v38 = vld [vmem:[#allocation7 + $0x390] sm:$0xff]  ;;  %v690_v41 = vmul.f32 %v3364_v1, %v174_v36 }
  0x62   :  { %1170 = vst [vmem:[#allocation8 + $0x288] sm:$0xff] %v658_v40  ;;  %v176_v40 = vld [vmem:[#allocation7 + $0x398] sm:$0xff]  ;;  %v691_v43 = vmul.f32 %v3364_v1, %v175_v38 }
  0x63   :  { %1171 = vst [vmem:[#allocation8 + $0x290] sm:$0xff] %v659_v42  ;;  %v177_v42 = vld [vmem:[#allocation7 + $0x3a0] sm:$0xff]  ;;  %v692_v45 = vmul.f32 %v3364_v1, %v176_v40 }
  0x64   :  { %1172 = vst [vmem:[#allocation8 + $0x298] sm:$0xff] %v660_v44  ;;  %v178_v44 = vld [vmem:[#allocation7 + $0x3a8] sm:$0xff]  ;;  %v693_v47 = vmul.f32 %v3364_v1, %v177_v42 }
  0x65   :  { %1173 = vst [vmem:[#allocation8 + $0x2a0] sm:$0xff] %v661_v46  ;;  %v179_v46 = vld [vmem:[#allocation7 + $0x3b0] sm:$0xff]  ;;  %v694_v49 = vmul.f32 %v3364_v1, %v178_v44 }
  0x66   :  { %1174 = vst [vmem:[#allocation8 + $0x2a8] sm:$0xff] %v662_v48  ;;  %v180_v48 = vld [vmem:[#allocation7 + $0x3b8] sm:$0xff]  ;;  %v695_v51 = vmul.f32 %v3364_v1, %v179_v46 }
  0x67   :  { %1175 = vst [vmem:[#allocation8 + $0x2b0] sm:$0xff] %v663_v50  ;;  %v181_v50 = vld [vmem:[#allocation7 + $0x3c0] sm:$0xff]  ;;  %v696_v53 = vmul.f32 %v3364_v1, %v180_v48 }
  0x68   :  { %1176 = vst [vmem:[#allocation8 + $0x2b8] sm:$0xff] %v664_v52  ;;  %v182_v52 = vld [vmem:[#allocation7 + $0x3c8] sm:$0xff]  ;;  %v697_v55 = vmul.f32 %v3364_v1, %v181_v50 }
  0x69   :  { %1177 = vst [vmem:[#allocation8 + $0x2c0] sm:$0xff] %v665_v54  ;;  %v183_v54 = vld [vmem:[#allocation7 + $0x3d0] sm:$0xff]  ;;  %v698_v57 = vmul.f32 %v3364_v1, %v182_v52 }
  0x6a   :  { %1178 = vst [vmem:[#allocation8 + $0x2c8] sm:$0xff] %v666_v56  ;;  %v184_v56 = vld [vmem:[#allocation7 + $0x3d8] sm:$0xff]  ;;  %v699_v59 = vmul.f32 %v3364_v1, %v183_v54 }
  0x6b   :  { %1179 = vst [vmem:[#allocation8 + $0x2d0] sm:$0xff] %v667_v58  ;;  %v185_v58 = vld [vmem:[#allocation7 + $0x3e0] sm:$0xff]  ;;  %v700_v61 = vmul.f32 %v3364_v1, %v184_v56 }
  0x6c   :  { %1180 = vst [vmem:[#allocation8 + $0x2d8] sm:$0xff] %v668_v60  ;;  %v186_v60 = vld [vmem:[#allocation7 + $0x3e8] sm:$0xff]  ;;  %v701_v63 = vmul.f32 %v3364_v1, %v185_v58 }
  0x6d   :  { %1181 = vst [vmem:[#allocation8 + $0x2e0] sm:$0xff] %v669_v62  ;;  %v187_v62 = vld [vmem:[#allocation7 + $0x3f0] sm:$0xff]  ;;  %v702_v2 = vmul.f32 %v3364_v1, %v186_v60 }
  0x6e   :  { %1182 = vst [vmem:[#allocation8 + $0x2e8] sm:$0xff] %v670_v0  ;;  %v188_v0 = vld [vmem:[#allocation7 + $0x3f8] sm:$0xff]  ;;  %v703_v4 = vmul.f32 %v3364_v1, %v187_v62 }
  0x6f   :  { %1183 = vst [vmem:[#allocation8 + $0x2f0] sm:$0xff] %v671_v3  ;;  %v189_v3 = vld [vmem:[#allocation7 + $0x400] sm:$0xff]  ;;  %v704_v6 = vmul.f32 %v3364_v1, %v188_v0 }
  0x70   :  { %1184 = vst [vmem:[#allocation8 + $0x2f8] sm:$0xff] %v672_v5  ;;  %v190_v5 = vld [vmem:[#allocation7 + $0x408] sm:$0xff]  ;;  %v705_v8 = vmul.f32 %v3364_v1, %v189_v3 }
  0x71   :  { %1185 = vst [vmem:[#allocation8 + $0x300] sm:$0xff] %v673_v7  ;;  %v191_v7 = vld [vmem:[#allocation7 + $0x410] sm:$0xff]  ;;  %v706_v10 = vmul.f32 %v3364_v1, %v190_v5 }
  0x72   :  { %1186 = vst [vmem:[#allocation8 + $0x308] sm:$0xff] %v674_v9  ;;  %v192_v9 = vld [vmem:[#allocation7 + $0x418] sm:$0xff]  ;;  %v707_v12 = vmul.f32 %v3364_v1, %v191_v7 }
  0x73   :  { %1187 = vst [vmem:[#allocation8 + $0x310] sm:$0xff] %v675_v11  ;;  %v193_v11 = vld [vmem:[#allocation7 + $0x420] sm:$0xff]  ;;  %v708_v14 = vmul.f32 %v3364_v1, %v192_v9 }
  0x74   :  { %1188 = vst [vmem:[#allocation8 + $0x318] sm:$0xff] %v676_v13  ;;  %v194_v13 = vld [vmem:[#allocation7 + $0x428] sm:$0xff]  ;;  %v709_v16 = vmul.f32 %v3364_v1, %v193_v11 }
  0x75   :  { %1189 = vst [vmem:[#allocation8 + $0x320] sm:$0xff] %v677_v15  ;;  %v195_v15 = vld [vmem:[#allocation7 + $0x430] sm:$0xff]  ;;  %v710_v18 = vmul.f32 %v3364_v1, %v194_v13 }
  0x76   :  { %1190 = vst [vmem:[#allocation8 + $0x328] sm:$0xff] %v678_v17  ;;  %v196_v17 = vld [vmem:[#allocation7 + $0x438] sm:$0xff]  ;;  %v711_v20 = vmul.f32 %v3364_v1, %v195_v15 }
  0x77   :  { %1191 = vst [vmem:[#allocation8 + $0x330] sm:$0xff] %v679_v19  ;;  %v197_v19 = vld [vmem:[#allocation7 + $0x440] sm:$0xff]  ;;  %v712_v22 = vmul.f32 %v3364_v1, %v196_v17 }
  0x78   :  { %1192 = vst [vmem:[#allocation8 + $0x338] sm:$0xff] %v680_v21  ;;  %v198_v21 = vld [vmem:[#allocation7 + $0x448] sm:$0xff]  ;;  %v713_v24 = vmul.f32 %v3364_v1, %v197_v19 }
  0x79   :  { %1193 = vst [vmem:[#allocation8 + $0x340] sm:$0xff] %v681_v23  ;;  %v199_v23 = vld [vmem:[#allocation7 + $0x450] sm:$0xff]  ;;  %v714_v26 = vmul.f32 %v3364_v1, %v198_v21 }
  0x7a   :  { %1194 = vst [vmem:[#allocation8 + $0x348] sm:$0xff] %v682_v25  ;;  %v200_v25 = vld [vmem:[#allocation7 + $0x458] sm:$0xff]  ;;  %v715_v28 = vmul.f32 %v3364_v1, %v199_v23 }
  0x7b   :  { %1195 = vst [vmem:[#allocation8 + $0x350] sm:$0xff] %v683_v27  ;;  %v201_v27 = vld [vmem:[#allocation7 + $0x460] sm:$0xff]  ;;  %v716_v30 = vmul.f32 %v3364_v1, %v200_v25 }
  0x7c   :  { %1196 = vst [vmem:[#allocation8 + $0x358] sm:$0xff] %v684_v29  ;;  %v202_v29 = vld [vmem:[#allocation7 + $0x468] sm:$0xff]  ;;  %v717_v32 = vmul.f32 %v3364_v1, %v201_v27 }
  0x7d   :  { %1197 = vst [vmem:[#allocation8 + $0x360] sm:$0xff] %v685_v31  ;;  %v203_v31 = vld [vmem:[#allocation7 + $0x470] sm:$0xff]  ;;  %v718_v34 = vmul.f32 %v3364_v1, %v202_v29 }
  0x7e   :  { %1198 = vst [vmem:[#allocation8 + $0x368] sm:$0xff] %v686_v33  ;;  %v204_v33 = vld [vmem:[#allocation7 + $0x478] sm:$0xff]  ;;  %v719_v36 = vmul.f32 %v3364_v1, %v203_v31 }
  0x7f   :  { %1199 = vst [vmem:[#allocation8 + $0x370] sm:$0xff] %v687_v35  ;;  %v205_v35 = vld [vmem:[#allocation7 + $0x480] sm:$0xff]  ;;  %v720_v38 = vmul.f32 %v3364_v1, %v204_v33  ;;  %v3537_v31 = vld [vmem:[#allocation2] ss:$0 sm:$0xff]  ;;  %v235_v33 = vld [vmem:[#allocation7 + $0x570] sm:$0xff] }
  0x80   :  { %1200 = vst [vmem:[#allocation8 + $0x378] sm:$0xff] %v688_v37  ;;  %v206_v37 = vld [vmem:[#allocation7 + $0x488] sm:$0xff]  ;;  %v721_v40 = vmul.f32 %v3364_v1, %v205_v35  ;;  %v236_v35 = vld [vmem:[#allocation7 + $0x578] sm:$0xff] }
  0x81   :  { %1201 = vst [vmem:[#allocation8 + $0x380] sm:$0xff] %v689_v39  ;;  %v207_v39 = vld [vmem:[#allocation7 + $0x490] sm:$0xff]  ;;  %v722_v42 = vmul.f32 %v3364_v1, %v206_v37  ;;  %v237_v37 = vld [vmem:[#allocation7 + $0x580] sm:$0xff] }
  0x82   :  { %1202 = vst [vmem:[#allocation8 + $0x388] sm:$0xff] %v690_v41  ;;  %v208_v41 = vld [vmem:[#allocation7 + $0x498] sm:$0xff]  ;;  %v723_v44 = vmul.f32 %v3364_v1, %v207_v39  ;;  %v238_v39 = vld [vmem:[#allocation7 + $0x588] sm:$0xff] }
  0x83   :  { %1203 = vst [vmem:[#allocation8 + $0x390] sm:$0xff] %v691_v43  ;;  %v209_v43 = vld [vmem:[#allocation7 + $0x4a0] sm:$0xff]  ;;  %v724_v46 = vmul.f32 %v3364_v1, %v208_v41  ;;  %v753_v41 = vmul.f32 %v3537_v31, %v237_v37 }
  0x84   :  { %1204 = vst [vmem:[#allocation8 + $0x398] sm:$0xff] %v692_v45  ;;  %v210_v45 = vld [vmem:[#allocation7 + $0x4a8] sm:$0xff]  ;;  %v725_v48 = vmul.f32 %v3364_v1, %v209_v43  ;;  %v754_v43 = vmul.f32 %v3537_v31, %v238_v39 }
  0x85   :  { %1205 = vst [vmem:[#allocation8 + $0x3a0] sm:$0xff] %v693_v47  ;;  %v211_v47 = vld [vmem:[#allocation7 + $0x4b0] sm:$0xff]  ;;  %v726_v50 = vmul.f32 %v3364_v1, %v210_v45 }
  0x86   :  { %1206 = vst [vmem:[#allocation8 + $0x3a8] sm:$0xff] %v694_v49  ;;  %v212_v49 = vld [vmem:[#allocation7 + $0x4b8] sm:$0xff]  ;;  %v727_v52 = vmul.f32 %v3364_v1, %v211_v47 }
  0x87   :  { %1207 = vst [vmem:[#allocation8 + $0x3b0] sm:$0xff] %v695_v51  ;;  %v213_v51 = vld [vmem:[#allocation7 + $0x4c0] sm:$0xff]  ;;  %v728_v54 = vmul.f32 %v3364_v1, %v212_v49 }
  0x88   :  { %1208 = vst [vmem:[#allocation8 + $0x3b8] sm:$0xff] %v696_v53  ;;  %v214_v53 = vld [vmem:[#allocation7 + $0x4c8] sm:$0xff]  ;;  %v729_v56 = vmul.f32 %v3364_v1, %v213_v51 }
  0x89   :  { %1209 = vst [vmem:[#allocation8 + $0x3c0] sm:$0xff] %v697_v55  ;;  %v215_v55 = vld [vmem:[#allocation7 + $0x4d0] sm:$0xff]  ;;  %v730_v58 = vmul.f32 %v3364_v1, %v214_v53 }
  0x8a   :  { %1210 = vst [vmem:[#allocation8 + $0x3c8] sm:$0xff] %v698_v57  ;;  %v216_v57 = vld [vmem:[#allocation7 + $0x4d8] sm:$0xff]  ;;  %v731_v60 = vmul.f32 %v3364_v1, %v215_v55 }
  0x8b   :  { %1211 = vst [vmem:[#allocation8 + $0x3d0] sm:$0xff] %v699_v59  ;;  %v217_v59 = vld [vmem:[#allocation7 + $0x4e0] sm:$0xff]  ;;  %v732_v62 = vmul.f32 %v3364_v1, %v216_v57 }
  0x8c   :  { %1212 = vst [vmem:[#allocation8 + $0x3d8] sm:$0xff] %v700_v61  ;;  %v218_v61 = vld [vmem:[#allocation7 + $0x4e8] sm:$0xff]  ;;  %v733_v0 = vmul.f32 %v3364_v1, %v217_v59 }
  0x8d   :  { %1213 = vst [vmem:[#allocation8 + $0x3e0] sm:$0xff] %v701_v63  ;;  %v219_v63 = vld [vmem:[#allocation7 + $0x4f0] sm:$0xff]  ;;  %v734_v3 = vmul.f32 %v3364_v1, %v218_v61 }
  0x8e   :  { %1214 = vst [vmem:[#allocation8 + $0x3e8] sm:$0xff] %v702_v2  ;;  %v220_v2 = vld [vmem:[#allocation7 + $0x4f8] sm:$0xff]  ;;  %v735_v5 = vmul.f32 %v3364_v1, %v219_v63 }
  0x8f   :  { %1215 = vst [vmem:[#allocation8 + $0x3f0] sm:$0xff] %v703_v4  ;;  %v221_v4 = vld [vmem:[#allocation7 + $0x500] sm:$0xff]  ;;  %v736_v7 = vmul.f32 %v3364_v1, %v220_v2 }
  0x90   :  { %1216 = vst [vmem:[#allocation8 + $0x3f8] sm:$0xff] %v704_v6  ;;  %v222_v6 = vld [vmem:[#allocation7 + $0x508] sm:$0xff]  ;;  %v737_v9 = vmul.f32 %v3364_v1, %v221_v4 }
  0x91   :  { %1217 = vst [vmem:[#allocation8 + $0x400] sm:$0xff] %v705_v8  ;;  %v223_v8 = vld [vmem:[#allocation7 + $0x510] sm:$0xff]  ;;  %v738_v11 = vmul.f32 %v3364_v1, %v222_v6 }
  0x92   :  { %1218 = vst [vmem:[#allocation8 + $0x408] sm:$0xff] %v706_v10  ;;  %v224_v10 = vld [vmem:[#allocation7 + $0x518] sm:$0xff]  ;;  %v739_v13 = vmul.f32 %v3364_v1, %v223_v8 }
  0x93   :  { %1219 = vst [vmem:[#allocation8 + $0x410] sm:$0xff] %v707_v12  ;;  %v225_v12 = vld [vmem:[#allocation7 + $0x520] sm:$0xff]  ;;  %v740_v15 = vmul.f32 %v3364_v1, %v224_v10 }
  0x94   :  { %1220 = vst [vmem:[#allocation8 + $0x418] sm:$0xff] %v708_v14  ;;  %v226_v14 = vld [vmem:[#allocation7 + $0x528] sm:$0xff]  ;;  %v741_v17 = vmul.f32 %v3364_v1, %v225_v12 }
  0x95   :  { %1221 = vst [vmem:[#allocation8 + $0x420] sm:$0xff] %v709_v16  ;;  %v227_v16 = vld [vmem:[#allocation7 + $0x530] sm:$0xff]  ;;  %v742_v19 = vmul.f32 %v3364_v1, %v226_v14 }
  0x96   :  { %1222 = vst [vmem:[#allocation8 + $0x428] sm:$0xff] %v710_v18  ;;  %v228_v18 = vld [vmem:[#allocation7 + $0x538] sm:$0xff]  ;;  %v743_v21 = vmul.f32 %v3364_v1, %v227_v16 }
  0x97   :  { %1223 = vst [vmem:[#allocation8 + $0x430] sm:$0xff] %v711_v20  ;;  %v229_v20 = vld [vmem:[#allocation7 + $0x540] sm:$0xff]  ;;  %v744_v23 = vmul.f32 %v3364_v1, %v228_v18 }
  0x98   :  { %1224 = vst [vmem:[#allocation8 + $0x438] sm:$0xff] %v712_v22  ;;  %v230_v22 = vld [vmem:[#allocation7 + $0x548] sm:$0xff]  ;;  %v745_v25 = vmul.f32 %v3364_v1, %v229_v20 }
  0x99   :  { %1225 = vst [vmem:[#allocation8 + $0x440] sm:$0xff] %v713_v24  ;;  %v231_v24 = vld [vmem:[#allocation7 + $0x550] sm:$0xff]  ;;  %v746_v27 = vmul.f32 %v3364_v1, %v230_v22 }
  0x9a   :  { %1226 = vst [vmem:[#allocation8 + $0x448] sm:$0xff] %v714_v26  ;;  %v232_v26 = vld [vmem:[#allocation7 + $0x558] sm:$0xff]  ;;  %v747_v29 = vmul.f32 %v3364_v1, %v231_v24  ;;  %v752_v1 = vmul.f32 %v3537_v31, %v236_v35 }
  0x9b   :  { %1227 = vst [vmem:[#allocation8 + $0x450] sm:$0xff] %v715_v28  ;;  %v233_v28 = vld [vmem:[#allocation7 + $0x560] sm:$0xff] }
  0x9c   :  { %1228 = vst [vmem:[#allocation8 + $0x458] sm:$0xff] %v716_v30  ;;  %v234_v30 = vld [vmem:[#allocation7 + $0x568] sm:$0xff] }
  0x9d   :  { %1229 = vst [vmem:[#allocation8 + $0x460] sm:$0xff] %v717_v32  ;;  %v748_v32 = vmul.f32 %v3537_v31, %v232_v26 }
  0x9e   :  { %1230 = vst [vmem:[#allocation8 + $0x468] sm:$0xff] %v718_v34  ;;  %v749_v34 = vmul.f32 %v3537_v31, %v233_v28 }
  0x9f   :  { %1231 = vst [vmem:[#allocation8 + $0x470] sm:$0xff] %v719_v36  ;;  %v750_v36 = vmul.f32 %v3537_v31, %v234_v30 }
  0xa0   :  { %1232 = vst [vmem:[#allocation8 + $0x478] sm:$0xff] %v720_v38  ;;  %v751_v38 = vmul.f32 %v3537_v31, %v235_v33 }
  0xa1   :  { %1233 = vst [vmem:[#allocation8 + $0x480] sm:$0xff] %v721_v40  ;;  %v239_v40 = vld [vmem:[#allocation7 + $0x590] sm:$0xff] }
  0xa2   :  { %1234 = vst [vmem:[#allocation8 + $0x488] sm:$0xff] %v722_v42  ;;  %v240_v42 = vld [vmem:[#allocation7 + $0x598] sm:$0xff]  ;;  %v755_v45 = vmul.f32 %v3537_v31, %v239_v40 }
  0xa3   :  { %1235 = vst [vmem:[#allocation8 + $0x490] sm:$0xff] %v723_v44  ;;  %v241_v44 = vld [vmem:[#allocation7 + $0x5a0] sm:$0xff]  ;;  %v756_v47 = vmul.f32 %v3537_v31, %v240_v42 }
  0xa4   :  { %1236 = vst [vmem:[#allocation8 + $0x498] sm:$0xff] %v724_v46  ;;  %v242_v46 = vld [vmem:[#allocation7 + $0x5a8] sm:$0xff]  ;;  %v757_v49 = vmul.f32 %v3537_v31, %v241_v44 }
  0xa5   :  { %1237 = vst [vmem:[#allocation8 + $0x4a0] sm:$0xff] %v725_v48  ;;  %v243_v48 = vld [vmem:[#allocation7 + $0x5b0] sm:$0xff]  ;;  %v758_v51 = vmul.f32 %v3537_v31, %v242_v46 }
  0xa6   :  { %1238 = vst [vmem:[#allocation8 + $0x4a8] sm:$0xff] %v726_v50  ;;  %v244_v50 = vld [vmem:[#allocation7 + $0x5b8] sm:$0xff]  ;;  %v759_v53 = vmul.f32 %v3537_v31, %v243_v48 }
  0xa7   :  { %1239 = vst [vmem:[#allocation8 + $0x4b0] sm:$0xff] %v727_v52  ;;  %v245_v52 = vld [vmem:[#allocation7 + $0x5c0] sm:$0xff]  ;;  %v760_v55 = vmul.f32 %v3537_v31, %v244_v50 }
  0xa8   :  { %1240 = vst [vmem:[#allocation8 + $0x4b8] sm:$0xff] %v728_v54  ;;  %v246_v54 = vld [vmem:[#allocation7 + $0x5c8] sm:$0xff]  ;;  %v761_v57 = vmul.f32 %v3537_v31, %v245_v52 }
  0xa9   :  { %1241 = vst [vmem:[#allocation8 + $0x4c0] sm:$0xff] %v729_v56  ;;  %v247_v56 = vld [vmem:[#allocation7 + $0x5d0] sm:$0xff]  ;;  %v762_v59 = vmul.f32 %v3537_v31, %v246_v54 }
  0xaa   :  { %1242 = vst [vmem:[#allocation8 + $0x4c8] sm:$0xff] %v730_v58  ;;  %v248_v58 = vld [vmem:[#allocation7 + $0x5d8] sm:$0xff]  ;;  %v763_v61 = vmul.f32 %v3537_v31, %v247_v56 }
  0xab   :  { %1243 = vst [vmem:[#allocation8 + $0x4d0] sm:$0xff] %v731_v60  ;;  %v249_v60 = vld [vmem:[#allocation7 + $0x5e0] sm:$0xff]  ;;  %v764_v63 = vmul.f32 %v3537_v31, %v248_v58 }
  0xac   :  { %1244 = vst [vmem:[#allocation8 + $0x4d8] sm:$0xff] %v732_v62  ;;  %v250_v62 = vld [vmem:[#allocation7 + $0x5e8] sm:$0xff]  ;;  %v765_v2 = vmul.f32 %v3537_v31, %v249_v60 }
  0xad   :  { %1245 = vst [vmem:[#allocation8 + $0x4e0] sm:$0xff] %v733_v0  ;;  %v251_v0 = vld [vmem:[#allocation7 + $0x5f0] sm:$0xff]  ;;  %v766_v4 = vmul.f32 %v3537_v31, %v250_v62 }
  0xae   :  { %1246 = vst [vmem:[#allocation8 + $0x4e8] sm:$0xff] %v734_v3  ;;  %v252_v3 = vld [vmem:[#allocation7 + $0x5f8] sm:$0xff]  ;;  %v767_v6 = vmul.f32 %v3537_v31, %v251_v0 }
  0xaf   :  { %1247 = vst [vmem:[#allocation8 + $0x4f0] sm:$0xff] %v735_v5  ;;  %v253_v5 = vld [vmem:[#allocation7 + $0x600] sm:$0xff]  ;;  %v768_v8 = vmul.f32 %v3537_v31, %v252_v3 }
  0xb0   :  { %1248 = vst [vmem:[#allocation8 + $0x4f8] sm:$0xff] %v736_v7  ;;  %v254_v7 = vld [vmem:[#allocation7 + $0x608] sm:$0xff]  ;;  %v769_v10 = vmul.f32 %v3537_v31, %v253_v5 }
  0xb1   :  { %1249 = vst [vmem:[#allocation8 + $0x500] sm:$0xff] %v737_v9  ;;  %v255_v9 = vld [vmem:[#allocation7 + $0x610] sm:$0xff]  ;;  %v770_v12 = vmul.f32 %v3537_v31, %v254_v7 }
  0xb2   :  { %1250 = vst [vmem:[#allocation8 + $0x508] sm:$0xff] %v738_v11  ;;  %v256_v11 = vld [vmem:[#allocation7 + $0x618] sm:$0xff]  ;;  %v771_v14 = vmul.f32 %v3537_v31, %v255_v9 }
  0xb3   :  { %1251 = vst [vmem:[#allocation8 + $0x510] sm:$0xff] %v739_v13  ;;  %v257_v13 = vld [vmem:[#allocation7 + $0x620] sm:$0xff]  ;;  %v772_v16 = vmul.f32 %v3537_v31, %v256_v11 }
  0xb4   :  { %1252 = vst [vmem:[#allocation8 + $0x518] sm:$0xff] %v740_v15  ;;  %v258_v15 = vld [vmem:[#allocation7 + $0x628] sm:$0xff]  ;;  %v773_v18 = vmul.f32 %v3537_v31, %v257_v13 }
  0xb5   :  { %1253 = vst [vmem:[#allocation8 + $0x520] sm:$0xff] %v741_v17  ;;  %v259_v17 = vld [vmem:[#allocation7 + $0x630] sm:$0xff]  ;;  %v774_v20 = vmul.f32 %v3537_v31, %v258_v15 }
  0xb6   :  { %1254 = vst [vmem:[#allocation8 + $0x528] sm:$0xff] %v742_v19  ;;  %v260_v19 = vld [vmem:[#allocation7 + $0x638] sm:$0xff]  ;;  %v775_v22 = vmul.f32 %v3537_v31, %v259_v17 }
  0xb7   :  { %1255 = vst [vmem:[#allocation8 + $0x530] sm:$0xff] %v743_v21  ;;  %v261_v21 = vld [vmem:[#allocation7 + $0x640] sm:$0xff]  ;;  %v776_v24 = vmul.f32 %v3537_v31, %v260_v19 }
  0xb8   :  { %1256 = vst [vmem:[#allocation8 + $0x538] sm:$0xff] %v744_v23  ;;  %v262_v23 = vld [vmem:[#allocation7 + $0x648] sm:$0xff]  ;;  %v777_v26 = vmul.f32 %v3537_v31, %v261_v21 }
  0xb9   :  { %1257 = vst [vmem:[#allocation8 + $0x540] sm:$0xff] %v745_v25  ;;  %v263_v25 = vld [vmem:[#allocation7 + $0x650] sm:$0xff]  ;;  %v778_v28 = vmul.f32 %v3537_v31, %v262_v23 }
  0xba   :  { %1258 = vst [vmem:[#allocation8 + $0x548] sm:$0xff] %v746_v27  ;;  %v264_v27 = vld [vmem:[#allocation7 + $0x658] sm:$0xff]  ;;  %v779_v30 = vmul.f32 %v3537_v31, %v263_v25 }
  0xbb   :  { %1259 = vst [vmem:[#allocation8 + $0x550] sm:$0xff] %v747_v29  ;;  %v265_v29 = vld [vmem:[#allocation7 + $0x660] sm:$0xff]  ;;  %v780_v33 = vmul.f32 %v3537_v31, %v264_v27 }
  0xbc   :  { %1260 = vst [vmem:[#allocation8 + $0x558] sm:$0xff] %v748_v32  ;;  %v266_v32 = vld [vmem:[#allocation7 + $0x668] sm:$0xff]  ;;  %v781_v35 = vmul.f32 %v3537_v31, %v265_v29 }
  0xbd   :  { %1261 = vst [vmem:[#allocation8 + $0x560] sm:$0xff] %v749_v34  ;;  %v267_v34 = vld [vmem:[#allocation7 + $0x670] sm:$0xff]  ;;  %v782_v37 = vmul.f32 %v3537_v31, %v266_v32 }
  0xbe   :  { %1262 = vst [vmem:[#allocation8 + $0x568] sm:$0xff] %v750_v36  ;;  %v268_v36 = vld [vmem:[#allocation7 + $0x678] sm:$0xff]  ;;  %v783_v39 = vmul.f32 %v3537_v31, %v267_v34 }
  0xbf   :  { %1263 = vst [vmem:[#allocation8 + $0x570] sm:$0xff] %v751_v38  ;;  %v269_v38 = vld [vmem:[#allocation7 + $0x680] sm:$0xff]  ;;  %v784_v40 = vmul.f32 %v3537_v31, %v268_v36 }
  0xc0   :  { %1264 = vst [vmem:[#allocation8 + $0x578] sm:$0xff] %v752_v1  ;;  %v270_v1 = vld [vmem:[#allocation7 + $0x688] sm:$0xff]  ;;  %v785_v42 = vmul.f32 %v3537_v31, %v269_v38 }
  0xc1   :  { %1265 = vst [vmem:[#allocation8 + $0x580] sm:$0xff] %v753_v41  ;;  %v271_v41 = vld [vmem:[#allocation7 + $0x690] sm:$0xff]  ;;  %v786_v44 = vmul.f32 %v3537_v31, %v270_v1 }
  0xc2   :  { %1266 = vst [vmem:[#allocation8 + $0x588] sm:$0xff] %v754_v43  ;;  %v272_v43 = vld [vmem:[#allocation7 + $0x698] sm:$0xff]  ;;  %v787_v46 = vmul.f32 %v3537_v31, %v271_v41 }
  0xc3   :  { %1267 = vst [vmem:[#allocation8 + $0x590] sm:$0xff] %v755_v45  ;;  %v273_v45 = vld [vmem:[#allocation7 + $0x6a0] sm:$0xff]  ;;  %v788_v48 = vmul.f32 %v3537_v31, %v272_v43 }
  0xc4   :  { %1268 = vst [vmem:[#allocation8 + $0x598] sm:$0xff] %v756_v47  ;;  %v274_v47 = vld [vmem:[#allocation7 + $0x6a8] sm:$0xff]  ;;  %v789_v50 = vmul.f32 %v3537_v31, %v273_v45 }
  0xc5   :  { %1269 = vst [vmem:[#allocation8 + $0x5a0] sm:$0xff] %v757_v49  ;;  %v275_v49 = vld [vmem:[#allocation7 + $0x6b0] sm:$0xff]  ;;  %v790_v52 = vmul.f32 %v3537_v31, %v274_v47 }
  0xc6   :  { %1270 = vst [vmem:[#allocation8 + $0x5a8] sm:$0xff] %v758_v51  ;;  %v276_v51 = vld [vmem:[#allocation7 + $0x6b8] sm:$0xff]  ;;  %v791_v54 = vmul.f32 %v3537_v31, %v275_v49 }
  0xc7   :  { %1271 = vst [vmem:[#allocation8 + $0x5b0] sm:$0xff] %v759_v53  ;;  %v277_v53 = vld [vmem:[#allocation7 + $0x6c0] sm:$0xff]  ;;  %v792_v56 = vmul.f32 %v3537_v31, %v276_v51 }
  0xc8   :  { %1272 = vst [vmem:[#allocation8 + $0x5b8] sm:$0xff] %v760_v55  ;;  %v278_v55 = vld [vmem:[#allocation7 + $0x6c8] sm:$0xff]  ;;  %v793_v58 = vmul.f32 %v3537_v31, %v277_v53 }
  0xc9   :  { %1273 = vst [vmem:[#allocation8 + $0x5c0] sm:$0xff] %v761_v57  ;;  %v279_v57 = vld [vmem:[#allocation7 + $0x6d0] sm:$0xff]  ;;  %v794_v60 = vmul.f32 %v3537_v31, %v278_v55 }
  0xca   :  { %1274 = vst [vmem:[#allocation8 + $0x5c8] sm:$0xff] %v762_v59  ;;  %v280_v59 = vld [vmem:[#allocation7 + $0x6d8] sm:$0xff]  ;;  %v795_v62 = vmul.f32 %v3537_v31, %v279_v57 }
  0xcb   :  { %1275 = vst [vmem:[#allocation8 + $0x5d0] sm:$0xff] %v763_v61  ;;  %v281_v61 = vld [vmem:[#allocation7 + $0x6e0] sm:$0xff]  ;;  %v796_v0 = vmul.f32 %v3537_v31, %v280_v59 }
  0xcc   :  { %1276 = vst [vmem:[#allocation8 + $0x5d8] sm:$0xff] %v764_v63  ;;  %v282_v63 = vld [vmem:[#allocation7 + $0x6e8] sm:$0xff]  ;;  %v797_v3 = vmul.f32 %v3537_v31, %v281_v61 }
  0xcd   :  { %1277 = vst [vmem:[#allocation8 + $0x5e0] sm:$0xff] %v765_v2  ;;  %v283_v2 = vld [vmem:[#allocation7 + $0x6f0] sm:$0xff]  ;;  %v798_v5 = vmul.f32 %v3537_v31, %v282_v63 }
  0xce   :  { %1278 = vst [vmem:[#allocation8 + $0x5e8] sm:$0xff] %v766_v4  ;;  %v284_v4 = vld [vmem:[#allocation7 + $0x6f8] sm:$0xff]  ;;  %v799_v7 = vmul.f32 %v3537_v31, %v283_v2 }
  0xcf   :  { %1279 = vst [vmem:[#allocation8 + $0x5f0] sm:$0xff] %v767_v6  ;;  %v285_v6 = vld [vmem:[#allocation7 + $0x700] sm:$0xff]  ;;  %v800_v9 = vmul.f32 %v3537_v31, %v284_v4 }
  0xd0   :  { %1280 = vst [vmem:[#allocation8 + $0x5f8] sm:$0xff] %v768_v8  ;;  %v286_v8 = vld [vmem:[#allocation7 + $0x708] sm:$0xff]  ;;  %v801_v11 = vmul.f32 %v3537_v31, %v285_v6 }
  0xd1   :  { %1281 = vst [vmem:[#allocation8 + $0x600] sm:$0xff] %v769_v10  ;;  %v287_v10 = vld [vmem:[#allocation7 + $0x710] sm:$0xff]  ;;  %v802_v13 = vmul.f32 %v3537_v31, %v286_v8 }
  0xd2   :  { %1282 = vst [vmem:[#allocation8 + $0x608] sm:$0xff] %v770_v12  ;;  %v288_v12 = vld [vmem:[#allocation7 + $0x718] sm:$0xff]  ;;  %v803_v15 = vmul.f32 %v3537_v31, %v287_v10 }
  0xd3   :  { %1283 = vst [vmem:[#allocation8 + $0x610] sm:$0xff] %v771_v14  ;;  %v289_v14 = vld [vmem:[#allocation7 + $0x720] sm:$0xff]  ;;  %v804_v17 = vmul.f32 %v3537_v31, %v288_v12 }
  0xd4   :  { %1284 = vst [vmem:[#allocation8 + $0x618] sm:$0xff] %v772_v16  ;;  %v290_v16 = vld [vmem:[#allocation7 + $0x728] sm:$0xff]  ;;  %v805_v19 = vmul.f32 %v3537_v31, %v289_v14 }
  0xd5   :  { %1285 = vst [vmem:[#allocation8 + $0x620] sm:$0xff] %v773_v18  ;;  %v291_v18 = vld [vmem:[#allocation7 + $0x730] sm:$0xff]  ;;  %v806_v21 = vmul.f32 %v3537_v31, %v290_v16 }
  0xd6   :  { %1286 = vst [vmem:[#allocation8 + $0x628] sm:$0xff] %v774_v20  ;;  %v292_v20 = vld [vmem:[#allocation7 + $0x738] sm:$0xff]  ;;  %v807_v23 = vmul.f32 %v3537_v31, %v291_v18 }
  0xd7   :  { %1287 = vst [vmem:[#allocation8 + $0x630] sm:$0xff] %v775_v22  ;;  %v293_v22 = vld [vmem:[#allocation7 + $0x740] sm:$0xff]  ;;  %v808_v25 = vmul.f32 %v3537_v31, %v292_v20 }
  0xd8   :  { %1288 = vst [vmem:[#allocation8 + $0x638] sm:$0xff] %v776_v24  ;;  %v294_v24 = vld [vmem:[#allocation7 + $0x748] sm:$0xff]  ;;  %v809_v27 = vmul.f32 %v3537_v31, %v293_v22 }
  0xd9   :  { %1289 = vst [vmem:[#allocation8 + $0x640] sm:$0xff] %v777_v26  ;;  %v295_v26 = vld [vmem:[#allocation7 + $0x750] sm:$0xff]  ;;  %v810_v29 = vmul.f32 %v3537_v31, %v294_v24 }
  0xda   :  { %1290 = vst [vmem:[#allocation8 + $0x648] sm:$0xff] %v778_v28  ;;  %v296_v28 = vld [vmem:[#allocation7 + $0x758] sm:$0xff]  ;;  %v811_v32 = vmul.f32 %v3537_v31, %v295_v26 }
  0xdb   :  { %1291 = vst [vmem:[#allocation8 + $0x650] sm:$0xff] %v779_v30  ;;  %v297_v30 = vld [vmem:[#allocation7 + $0x760] sm:$0xff]  ;;  %v812_v34 = vmul.f32 %v3537_v31, %v296_v28 }
  0xdc   :  { %1292 = vst [vmem:[#allocation8 + $0x658] sm:$0xff] %v780_v33  ;;  %v298_v33 = vld [vmem:[#allocation7 + $0x768] sm:$0xff]  ;;  %v813_v36 = vmul.f32 %v3537_v31, %v297_v30 }
  0xdd   :  { %1293 = vst [vmem:[#allocation8 + $0x660] sm:$0xff] %v781_v35  ;;  %v299_v35 = vld [vmem:[#allocation7 + $0x770] sm:$0xff]  ;;  %v814_v38 = vmul.f32 %v3537_v31, %v298_v33 }
  0xde   :  { %1294 = vst [vmem:[#allocation8 + $0x668] sm:$0xff] %v782_v37  ;;  %v300_v37 = vld [vmem:[#allocation7 + $0x778] sm:$0xff]  ;;  %v815_v1 = vmul.f32 %v3537_v31, %v299_v35 }
  0xdf   :  { %1295 = vst [vmem:[#allocation8 + $0x670] sm:$0xff] %v783_v39  ;;  %v301_v39 = vld [vmem:[#allocation7 + $0x780] sm:$0xff]  ;;  %v816_v41 = vmul.f32 %v3537_v31, %v300_v37 }
  0xe0   :  { %1296 = vst [vmem:[#allocation8 + $0x678] sm:$0xff] %v784_v40  ;;  %v302_v40 = vld [vmem:[#allocation7 + $0x788] sm:$0xff]  ;;  %v817_v43 = vmul.f32 %v3537_v31, %v301_v39 }
  0xe1   :  { %1297 = vst [vmem:[#allocation8 + $0x680] sm:$0xff] %v785_v42  ;;  %v303_v42 = vld [vmem:[#allocation7 + $0x790] sm:$0xff]  ;;  %v818_v45 = vmul.f32 %v3537_v31, %v302_v40 }
  0xe2   :  { %1298 = vst [vmem:[#allocation8 + $0x688] sm:$0xff] %v786_v44  ;;  %v304_v44 = vld [vmem:[#allocation7 + $0x798] sm:$0xff]  ;;  %v819_v47 = vmul.f32 %v3537_v31, %v303_v42 }
  0xe3   :  { %1299 = vst [vmem:[#allocation8 + $0x690] sm:$0xff] %v787_v46  ;;  %v305_v46 = vld [vmem:[#allocation7 + $0x7a0] sm:$0xff]  ;;  %v820_v49 = vmul.f32 %v3537_v31, %v304_v44 }
  0xe4   :  { %1300 = vst [vmem:[#allocation8 + $0x698] sm:$0xff] %v788_v48  ;;  %v306_v48 = vld [vmem:[#allocation7 + $0x7a8] sm:$0xff]  ;;  %v821_v51 = vmul.f32 %v3537_v31, %v305_v46 }
  0xe5   :  { %1301 = vst [vmem:[#allocation8 + $0x6a0] sm:$0xff] %v789_v50  ;;  %v307_v50 = vld [vmem:[#allocation7 + $0x7b0] sm:$0xff]  ;;  %v822_v53 = vmul.f32 %v3537_v31, %v306_v48 }
  0xe6   :  { %1302 = vst [vmem:[#allocation8 + $0x6a8] sm:$0xff] %v790_v52  ;;  %v308_v52 = vld [vmem:[#allocation7 + $0x7b8] sm:$0xff]  ;;  %v823_v55 = vmul.f32 %v3537_v31, %v307_v50 }
  0xe7   :  { %1303 = vst [vmem:[#allocation8 + $0x6b0] sm:$0xff] %v791_v54  ;;  %v309_v54 = vld [vmem:[#allocation7 + $0x7c0] sm:$0xff]  ;;  %v824_v57 = vmul.f32 %v3537_v31, %v308_v52 }
  0xe8   :  { %1304 = vst [vmem:[#allocation8 + $0x6b8] sm:$0xff] %v792_v56  ;;  %v310_v56 = vld [vmem:[#allocation7 + $0x7c8] sm:$0xff]  ;;  %v825_v59 = vmul.f32 %v3537_v31, %v309_v54 }
  0xe9   :  { %1305 = vst [vmem:[#allocation8 + $0x6c0] sm:$0xff] %v793_v58  ;;  %v311_v58 = vld [vmem:[#allocation7 + $0x7d0] sm:$0xff]  ;;  %v826_v61 = vmul.f32 %v3537_v31, %v310_v56 }
  0xea   :  { %1306 = vst [vmem:[#allocation8 + $0x6c8] sm:$0xff] %v794_v60  ;;  %v312_v60 = vld [vmem:[#allocation7 + $0x7d8] sm:$0xff]  ;;  %v827_v63 = vmul.f32 %v3537_v31, %v311_v58 }
  0xeb   :  { %1307 = vst [vmem:[#allocation8 + $0x6d0] sm:$0xff] %v795_v62  ;;  %v313_v62 = vld [vmem:[#allocation7 + $0x7e0] sm:$0xff]  ;;  %v828_v2 = vmul.f32 %v3537_v31, %v312_v60 }
  0xec   :  { %1308 = vst [vmem:[#allocation8 + $0x6d8] sm:$0xff] %v796_v0  ;;  %v314_v0 = vld [vmem:[#allocation7 + $0x7e8] sm:$0xff]  ;;  %v829_v4 = vmul.f32 %v3537_v31, %v313_v62 }
  0xed   :  { %1309 = vst [vmem:[#allocation8 + $0x6e0] sm:$0xff] %v797_v3  ;;  %v315_v3 = vld [vmem:[#allocation7 + $0x7f0] sm:$0xff]  ;;  %v830_v6 = vmul.f32 %v3537_v31, %v314_v0 }
  0xee   :  { %1310 = vst [vmem:[#allocation8 + $0x6e8] sm:$0xff] %v798_v5  ;;  %v316_v5 = vld [vmem:[#allocation7 + $0x7f8] sm:$0xff]  ;;  %v831_v8 = vmul.f32 %v3537_v31, %v315_v3 }
  0xef   :  { %1311 = vst [vmem:[#allocation8 + $0x6f0] sm:$0xff] %v799_v7  ;;  %v317_v7 = vld [vmem:[#allocation7 + $0x800] sm:$0xff]  ;;  %v832_v10 = vmul.f32 %v3537_v31, %v316_v5 }
  0xf0   :  { %1312 = vst [vmem:[#allocation8 + $0x6f8] sm:$0xff] %v800_v9  ;;  %v318_v9 = vld [vmem:[#allocation7 + $0x808] sm:$0xff]  ;;  %v833_v12 = vmul.f32 %v3537_v31, %v317_v7 }
  0xf1   :  { %1313 = vst [vmem:[#allocation8 + $0x700] sm:$0xff] %v801_v11  ;;  %v319_v11 = vld [vmem:[#allocation7 + $0x810] sm:$0xff]  ;;  %v834_v14 = vmul.f32 %v3537_v31, %v318_v9 }
  0xf2   :  { %1314 = vst [vmem:[#allocation8 + $0x708] sm:$0xff] %v802_v13  ;;  %v320_v13 = vld [vmem:[#allocation7 + $0x818] sm:$0xff]  ;;  %v835_v16 = vmul.f32 %v3537_v31, %v319_v11 }
  0xf3   :  { %1315 = vst [vmem:[#allocation8 + $0x710] sm:$0xff] %v803_v15  ;;  %v321_v15 = vld [vmem:[#allocation7 + $0x820] sm:$0xff]  ;;  %v836_v18 = vmul.f32 %v3537_v31, %v320_v13 }
  0xf4   :  { %1316 = vst [vmem:[#allocation8 + $0x718] sm:$0xff] %v804_v17  ;;  %v322_v17 = vld [vmem:[#allocation7 + $0x828] sm:$0xff]  ;;  %v837_v20 = vmul.f32 %v3537_v31, %v321_v15 }
  0xf5   :  { %1317 = vst [vmem:[#allocation8 + $0x720] sm:$0xff] %v805_v19  ;;  %v323_v19 = vld [vmem:[#allocation7 + $0x830] sm:$0xff]  ;;  %v838_v22 = vmul.f32 %v3537_v31, %v322_v17 }
  0xf6   :  { %1318 = vst [vmem:[#allocation8 + $0x728] sm:$0xff] %v806_v21  ;;  %v324_v21 = vld [vmem:[#allocation7 + $0x838] sm:$0xff]  ;;  %v839_v24 = vmul.f32 %v3537_v31, %v323_v19 }
  0xf7   :  { %1319 = vst [vmem:[#allocation8 + $0x730] sm:$0xff] %v807_v23  ;;  %v325_v23 = vld [vmem:[#allocation7 + $0x840] sm:$0xff]  ;;  %v840_v26 = vmul.f32 %v3537_v31, %v324_v21 }
  0xf8   :  { %1320 = vst [vmem:[#allocation8 + $0x738] sm:$0xff] %v808_v25  ;;  %v326_v25 = vld [vmem:[#allocation7 + $0x848] sm:$0xff]  ;;  %v841_v28 = vmul.f32 %v3537_v31, %v325_v23 }
  0xf9   :  { %1321 = vst [vmem:[#allocation8 + $0x740] sm:$0xff] %v809_v27  ;;  %v327_v27 = vld [vmem:[#allocation7 + $0x850] sm:$0xff]  ;;  %v842_v30 = vmul.f32 %v3537_v31, %v326_v25 }
  0xfa   :  { %1322 = vst [vmem:[#allocation8 + $0x748] sm:$0xff] %v810_v29  ;;  %v328_v29 = vld [vmem:[#allocation7 + $0x858] sm:$0xff]  ;;  %v843_v33 = vmul.f32 %v3537_v31, %v327_v27 }
  0xfb   :  { %1323 = vst [vmem:[#allocation8 + $0x750] sm:$0xff] %v811_v32  ;;  %v329_v32 = vld [vmem:[#allocation7 + $0x860] sm:$0xff]  ;;  %v844_v35 = vmul.f32 %v3537_v31, %v328_v29 }
  0xfc   :  { %1324 = vst [vmem:[#allocation8 + $0x758] sm:$0xff] %v812_v34  ;;  %v330_v34 = vld [vmem:[#allocation7 + $0x868] sm:$0xff]  ;;  %v845_v37 = vmul.f32 %v3537_v31, %v329_v32 }
  0xfd   :  { %1325 = vst [vmem:[#allocation8 + $0x760] sm:$0xff] %v813_v36  ;;  %v331_v36 = vld [vmem:[#allocation7 + $0x870] sm:$0xff]  ;;  %v846_v39 = vmul.f32 %v3537_v31, %v330_v34 }
  0xfe   :  { %1326 = vst [vmem:[#allocation8 + $0x768] sm:$0xff] %v814_v38  ;;  %v332_v38 = vld [vmem:[#allocation7 + $0x878] sm:$0xff]  ;;  %v847_v40 = vmul.f32 %v3537_v31, %v331_v36 }
  0xff   :  { %1327 = vst [vmem:[#allocation8 + $0x770] sm:$0xff] %v815_v1  ;;  %v333_v1 = vld [vmem:[#allocation7 + $0x880] sm:$0xff]  ;;  %v848_v42 = vmul.f32 %v3537_v31, %v332_v38 }
 0x100   :  { %1328 = vst [vmem:[#allocation8 + $0x778] sm:$0xff] %v816_v41  ;;  %v334_v41 = vld [vmem:[#allocation7 + $0x888] sm:$0xff]  ;;  %v849_v44 = vmul.f32 %v3537_v31, %v333_v1 }
 0x101   :  { %1329 = vst [vmem:[#allocation8 + $0x780] sm:$0xff] %v817_v43  ;;  %v335_v43 = vld [vmem:[#allocation7 + $0x890] sm:$0xff]  ;;  %v850_v46 = vmul.f32 %v3537_v31, %v334_v41 }
 0x102   :  { %1330 = vst [vmem:[#allocation8 + $0x788] sm:$0xff] %v818_v45  ;;  %v336_v45 = vld [vmem:[#allocation7 + $0x898] sm:$0xff]  ;;  %v851_v48 = vmul.f32 %v3537_v31, %v335_v43 }
 0x103   :  { %1331 = vst [vmem:[#allocation8 + $0x790] sm:$0xff] %v819_v47  ;;  %v337_v47 = vld [vmem:[#allocation7 + $0x8a0] sm:$0xff]  ;;  %v852_v50 = vmul.f32 %v3537_v31, %v336_v45 }
 0x104   :  { %1332 = vst [vmem:[#allocation8 + $0x798] sm:$0xff] %v820_v49  ;;  %v338_v49 = vld [vmem:[#allocation7 + $0x8a8] sm:$0xff]  ;;  %v853_v52 = vmul.f32 %v3537_v31, %v337_v47 }
 0x105   :  { %1333 = vst [vmem:[#allocation8 + $0x7a0] sm:$0xff] %v821_v51  ;;  %v339_v51 = vld [vmem:[#allocation7 + $0x8b0] sm:$0xff]  ;;  %v854_v54 = vmul.f32 %v3537_v31, %v338_v49 }
 0x106   :  { %1334 = vst [vmem:[#allocation8 + $0x7a8] sm:$0xff] %v822_v53  ;;  %v340_v53 = vld [vmem:[#allocation7 + $0x8b8] sm:$0xff]  ;;  %v855_v56 = vmul.f32 %v3537_v31, %v339_v51 }
 0x107   :  { %1335 = vst [vmem:[#allocation8 + $0x7b0] sm:$0xff] %v823_v55  ;;  %v341_v55 = vld [vmem:[#allocation7 + $0x8c0] sm:$0xff]  ;;  %v856_v58 = vmul.f32 %v3537_v31, %v340_v53 }
 0x108   :  { %1336 = vst [vmem:[#allocation8 + $0x7b8] sm:$0xff] %v824_v57  ;;  %v342_v57 = vld [vmem:[#allocation7 + $0x8c8] sm:$0xff]  ;;  %v857_v60 = vmul.f32 %v3537_v31, %v341_v55 }
 0x109   :  { %1337 = vst [vmem:[#allocation8 + $0x7c0] sm:$0xff] %v825_v59  ;;  %v343_v59 = vld [vmem:[#allocation7 + $0x8d0] sm:$0xff]  ;;  %v858_v62 = vmul.f32 %v3537_v31, %v342_v57 }
 0x10a   :  { %1338 = vst [vmem:[#allocation8 + $0x7c8] sm:$0xff] %v826_v61  ;;  %v344_v61 = vld [vmem:[#allocation7 + $0x8d8] sm:$0xff]  ;;  %v859_v0 = vmul.f32 %v3537_v31, %v343_v59 }
 0x10b   :  { %1339 = vst [vmem:[#allocation8 + $0x7d0] sm:$0xff] %v827_v63  ;;  %v345_v63 = vld [vmem:[#allocation7 + $0x8e0] sm:$0xff]  ;;  %v860_v3 = vmul.f32 %v3537_v31, %v344_v61 }
 0x10c   :  { %1340 = vst [vmem:[#allocation8 + $0x7d8] sm:$0xff] %v828_v2  ;;  %v346_v2 = vld [vmem:[#allocation7 + $0x8e8] sm:$0xff]  ;;  %v861_v5 = vmul.f32 %v3537_v31, %v345_v63 }
 0x10d   :  { %1341 = vst [vmem:[#allocation8 + $0x7e0] sm:$0xff] %v829_v4  ;;  %v347_v4 = vld [vmem:[#allocation7 + $0x8f0] sm:$0xff]  ;;  %v862_v7 = vmul.f32 %v3537_v31, %v346_v2 }
 0x10e   :  { %1342 = vst [vmem:[#allocation8 + $0x7e8] sm:$0xff] %v830_v6  ;;  %v348_v6 = vld [vmem:[#allocation7 + $0x8f8] sm:$0xff]  ;;  %v863_v9 = vmul.f32 %v3537_v31, %v347_v4 }
 0x10f   :  { %1343 = vst [vmem:[#allocation8 + $0x7f0] sm:$0xff] %v831_v8  ;;  %v349_v8 = vld [vmem:[#allocation7 + $0x900] sm:$0xff]  ;;  %v864_v11 = vmul.f32 %v3537_v31, %v348_v6 }
 0x110   :  { %1344 = vst [vmem:[#allocation8 + $0x7f8] sm:$0xff] %v832_v10  ;;  %v350_v10 = vld [vmem:[#allocation7 + $0x908] sm:$0xff]  ;;  %v865_v13 = vmul.f32 %v3537_v31, %v349_v8 }
 0x111   :  { %1345 = vst [vmem:[#allocation8 + $0x800] sm:$0xff] %v833_v12  ;;  %v351_v12 = vld [vmem:[#allocation7 + $0x910] sm:$0xff]  ;;  %v866_v15 = vmul.f32 %v3537_v31, %v350_v10 }
 0x112   :  { %1346 = vst [vmem:[#allocation8 + $0x808] sm:$0xff] %v834_v14  ;;  %v352_v14 = vld [vmem:[#allocation7 + $0x918] sm:$0xff]  ;;  %v867_v17 = vmul.f32 %v3537_v31, %v351_v12 }
 0x113   :  { %1347 = vst [vmem:[#allocation8 + $0x810] sm:$0xff] %v835_v16  ;;  %v353_v16 = vld [vmem:[#allocation7 + $0x920] sm:$0xff]  ;;  %v868_v19 = vmul.f32 %v3537_v31, %v352_v14 }
 0x114   :  { %1348 = vst [vmem:[#allocation8 + $0x818] sm:$0xff] %v836_v18  ;;  %v354_v18 = vld [vmem:[#allocation7 + $0x928] sm:$0xff]  ;;  %v869_v21 = vmul.f32 %v3537_v31, %v353_v16 }
 0x115   :  { %1349 = vst [vmem:[#allocation8 + $0x820] sm:$0xff] %v837_v20  ;;  %v355_v20 = vld [vmem:[#allocation7 + $0x930] sm:$0xff]  ;;  %v870_v23 = vmul.f32 %v3537_v31, %v354_v18 }
 0x116   :  { %1350 = vst [vmem:[#allocation8 + $0x828] sm:$0xff] %v838_v22  ;;  %v356_v22 = vld [vmem:[#allocation7 + $0x938] sm:$0xff]  ;;  %v871_v25 = vmul.f32 %v3537_v31, %v355_v20 }
 0x117   :  { %1351 = vst [vmem:[#allocation8 + $0x830] sm:$0xff] %v839_v24  ;;  %v357_v24 = vld [vmem:[#allocation7 + $0x940] sm:$0xff]  ;;  %v872_v27 = vmul.f32 %v3537_v31, %v356_v22 }
 0x118   :  { %1352 = vst [vmem:[#allocation8 + $0x838] sm:$0xff] %v840_v26  ;;  %v358_v26 = vld [vmem:[#allocation7 + $0x948] sm:$0xff]  ;;  %v873_v29 = vmul.f32 %v3537_v31, %v357_v24 }
 0x119   :  { %1353 = vst [vmem:[#allocation8 + $0x840] sm:$0xff] %v841_v28  ;;  %v359_v28 = vld [vmem:[#allocation7 + $0x950] sm:$0xff]  ;;  %v874_v32 = vmul.f32 %v3537_v31, %v358_v26 }
 0x11a   :  { %1354 = vst [vmem:[#allocation8 + $0x848] sm:$0xff] %v842_v30  ;;  %v360_v30 = vld [vmem:[#allocation7 + $0x958] sm:$0xff]  ;;  %v875_v34 = vmul.f32 %v3537_v31, %v359_v28 }
 0x11b   :  { %1355 = vst [vmem:[#allocation8 + $0x850] sm:$0xff] %v843_v33  ;;  %v361_v33 = vld [vmem:[#allocation7 + $0x960] sm:$0xff]  ;;  %v876_v36 = vmul.f32 %v3537_v31, %v360_v30 }
 0x11c   :  { %1356 = vst [vmem:[#allocation8 + $0x858] sm:$0xff] %v844_v35  ;;  %v362_v35 = vld [vmem:[#allocation7 + $0x968] sm:$0xff]  ;;  %v877_v38 = vmul.f32 %v3537_v31, %v361_v33 }
 0x11d   :  { %1357 = vst [vmem:[#allocation8 + $0x860] sm:$0xff] %v845_v37  ;;  %v363_v37 = vld [vmem:[#allocation7 + $0x970] sm:$0xff]  ;;  %v878_v1 = vmul.f32 %v3537_v31, %v362_v35 }
 0x11e   :  { %1358 = vst [vmem:[#allocation8 + $0x868] sm:$0xff] %v846_v39  ;;  %v364_v39 = vld [vmem:[#allocation7 + $0x978] sm:$0xff]  ;;  %v879_v41 = vmul.f32 %v3537_v31, %v363_v37 }
 0x11f   :  { %1359 = vst [vmem:[#allocation8 + $0x870] sm:$0xff] %v847_v40  ;;  %v365_v40 = vld [vmem:[#allocation7 + $0x980] sm:$0xff]  ;;  %v880_v43 = vmul.f32 %v3537_v31, %v364_v39 }
 0x120   :  { %1360 = vst [vmem:[#allocation8 + $0x878] sm:$0xff] %v848_v42  ;;  %v366_v42 = vld [vmem:[#allocation7 + $0x988] sm:$0xff]  ;;  %v881_v45 = vmul.f32 %v3537_v31, %v365_v40 }
 0x121   :  { %1361 = vst [vmem:[#allocation8 + $0x880] sm:$0xff] %v849_v44  ;;  %v367_v44 = vld [vmem:[#allocation7 + $0x990] sm:$0xff]  ;;  %v882_v47 = vmul.f32 %v3537_v31, %v366_v42 }
 0x122   :  { %1362 = vst [vmem:[#allocation8 + $0x888] sm:$0xff] %v850_v46  ;;  %v368_v46 = vld [vmem:[#allocation7 + $0x998] sm:$0xff]  ;;  %v883_v49 = vmul.f32 %v3537_v31, %v367_v44 }
 0x123   :  { %1363 = vst [vmem:[#allocation8 + $0x890] sm:$0xff] %v851_v48  ;;  %v369_v48 = vld [vmem:[#allocation7 + $0x9a0] sm:$0xff]  ;;  %v884_v51 = vmul.f32 %v3537_v31, %v368_v46 }
 0x124   :  { %1364 = vst [vmem:[#allocation8 + $0x898] sm:$0xff] %v852_v50  ;;  %v370_v50 = vld [vmem:[#allocation7 + $0x9a8] sm:$0xff]  ;;  %v885_v53 = vmul.f32 %v3537_v31, %v369_v48 }
 0x125   :  { %1365 = vst [vmem:[#allocation8 + $0x8a0] sm:$0xff] %v853_v52  ;;  %v371_v52 = vld [vmem:[#allocation7 + $0x9b0] sm:$0xff]  ;;  %v886_v55 = vmul.f32 %v3537_v31, %v370_v50 }
 0x126   :  { %1366 = vst [vmem:[#allocation8 + $0x8a8] sm:$0xff] %v854_v54  ;;  %v372_v54 = vld [vmem:[#allocation7 + $0x9b8] sm:$0xff]  ;;  %v887_v57 = vmul.f32 %v3537_v31, %v371_v52 }
 0x127   :  { %1367 = vst [vmem:[#allocation8 + $0x8b0] sm:$0xff] %v855_v56  ;;  %v373_v56 = vld [vmem:[#allocation7 + $0x9c0] sm:$0xff]  ;;  %v888_v59 = vmul.f32 %v3537_v31, %v372_v54 }
 0x128   :  { %1368 = vst [vmem:[#allocation8 + $0x8b8] sm:$0xff] %v856_v58  ;;  %v374_v58 = vld [vmem:[#allocation7 + $0x9c8] sm:$0xff]  ;;  %v889_v61 = vmul.f32 %v3537_v31, %v373_v56 }
 0x129   :  { %1369 = vst [vmem:[#allocation8 + $0x8c0] sm:$0xff] %v857_v60  ;;  %v375_v60 = vld [vmem:[#allocation7 + $0x9d0] sm:$0xff]  ;;  %v890_v63 = vmul.f32 %v3537_v31, %v374_v58  ;;  %v3710_v58 = vld [vmem:[#allocation2] ss:$0 sm:$0xff] }
 0x12a   :  { %1370 = vst [vmem:[#allocation8 + $0x8c8] sm:$0xff] %v858_v62  ;;  %v376_v62 = vld [vmem:[#allocation7 + $0x9d8] sm:$0xff]  ;;  %v891_v2 = vmul.f32 %v3537_v31, %v375_v60  ;;  %v406_v60 = vld [vmem:[#allocation7 + $0xac8] sm:$0xff] }
 0x12b   :  { %1371 = vst [vmem:[#allocation8 + $0x8d0] sm:$0xff] %v859_v0  ;;  %v377_v0 = vld [vmem:[#allocation7 + $0x9e0] sm:$0xff]  ;;  %v892_v4 = vmul.f32 %v3537_v31, %v376_v62  ;;  %v407_v62 = vld [vmem:[#allocation7 + $0xad0] sm:$0xff] }
 0x12c   :  { %1372 = vst [vmem:[#allocation8 + $0x8d8] sm:$0xff] %v860_v3  ;;  %v378_v3 = vld [vmem:[#allocation7 + $0x9e8] sm:$0xff]  ;;  %v893_v6 = vmul.f32 %v3537_v31, %v377_v0  ;;  %v408_v0 = vld [vmem:[#allocation7 + $0xad8] sm:$0xff] }
 0x12d   :  { %1373 = vst [vmem:[#allocation8 + $0x8e0] sm:$0xff] %v861_v5  ;;  %v379_v5 = vld [vmem:[#allocation7 + $0x9f0] sm:$0xff]  ;;  %v894_v8 = vmul.f32 %v3537_v31, %v378_v3  ;;  %v409_v3 = vld [vmem:[#allocation7 + $0xae0] sm:$0xff] }
 0x12e   :  { %1374 = vst [vmem:[#allocation8 + $0x8e8] sm:$0xff] %v862_v7  ;;  %v380_v7 = vld [vmem:[#allocation7 + $0x9f8] sm:$0xff]  ;;  %v895_v10 = vmul.f32 %v3537_v31, %v379_v5  ;;  %v924_v5 = vmul.f32 %v3710_v58, %v408_v0 }
 0x12f   :  { %1375 = vst [vmem:[#allocation8 + $0x8f0] sm:$0xff] %v863_v9  ;;  %v381_v9 = vld [vmem:[#allocation7 + $0xa00] sm:$0xff]  ;;  %v896_v12 = vmul.f32 %v3537_v31, %v380_v7  ;;  %v925_v7 = vmul.f32 %v3710_v58, %v409_v3 }
 0x130   :  { %1376 = vst [vmem:[#allocation8 + $0x8f8] sm:$0xff] %v864_v11  ;;  %v382_v11 = vld [vmem:[#allocation7 + $0xa08] sm:$0xff]  ;;  %v897_v14 = vmul.f32 %v3537_v31, %v381_v9 }
 0x131   :  { %1377 = vst [vmem:[#allocation8 + $0x900] sm:$0xff] %v865_v13  ;;  %v383_v13 = vld [vmem:[#allocation7 + $0xa10] sm:$0xff]  ;;  %v898_v16 = vmul.f32 %v3537_v31, %v382_v11 }
 0x132   :  { %1378 = vst [vmem:[#allocation8 + $0x908] sm:$0xff] %v866_v15  ;;  %v384_v15 = vld [vmem:[#allocation7 + $0xa18] sm:$0xff]  ;;  %v899_v18 = vmul.f32 %v3537_v31, %v383_v13 }
 0x133   :  { %1379 = vst [vmem:[#allocation8 + $0x910] sm:$0xff] %v867_v17  ;;  %v385_v17 = vld [vmem:[#allocation7 + $0xa20] sm:$0xff]  ;;  %v900_v20 = vmul.f32 %v3537_v31, %v384_v15 }
 0x134   :  { %1380 = vst [vmem:[#allocation8 + $0x918] sm:$0xff] %v868_v19  ;;  %v386_v19 = vld [vmem:[#allocation7 + $0xa28] sm:$0xff]  ;;  %v901_v22 = vmul.f32 %v3537_v31, %v385_v17 }
 0x135   :  { %1381 = vst [vmem:[#allocation8 + $0x920] sm:$0xff] %v869_v21  ;;  %v387_v21 = vld [vmem:[#allocation7 + $0xa30] sm:$0xff]  ;;  %v902_v24 = vmul.f32 %v3537_v31, %v386_v19 }
 0x136   :  { %1382 = vst [vmem:[#allocation8 + $0x928] sm:$0xff] %v870_v23  ;;  %v388_v23 = vld [vmem:[#allocation7 + $0xa38] sm:$0xff]  ;;  %v903_v26 = vmul.f32 %v3537_v31, %v387_v21 }
 0x137   :  { %1383 = vst [vmem:[#allocation8 + $0x930] sm:$0xff] %v871_v25  ;;  %v389_v25 = vld [vmem:[#allocation7 + $0xa40] sm:$0xff]  ;;  %v904_v28 = vmul.f32 %v3537_v31, %v388_v23 }
 0x138   :  { %1384 = vst [vmem:[#allocation8 + $0x938] sm:$0xff] %v872_v27  ;;  %v390_v27 = vld [vmem:[#allocation7 + $0xa48] sm:$0xff]  ;;  %v905_v30 = vmul.f32 %v3537_v31, %v389_v25 }
 0x139   :  { %1385 = vst [vmem:[#allocation8 + $0x940] sm:$0xff] %v873_v29  ;;  %v391_v29 = vld [vmem:[#allocation7 + $0xa50] sm:$0xff]  ;;  %v906_v33 = vmul.f32 %v3537_v31, %v390_v27 }
 0x13a   :  { %1386 = vst [vmem:[#allocation8 + $0x948] sm:$0xff] %v874_v32  ;;  %v392_v32 = vld [vmem:[#allocation7 + $0xa58] sm:$0xff]  ;;  %v907_v35 = vmul.f32 %v3537_v31, %v391_v29 }
 0x13b   :  { %1387 = vst [vmem:[#allocation8 + $0x950] sm:$0xff] %v875_v34  ;;  %v393_v34 = vld [vmem:[#allocation7 + $0xa60] sm:$0xff]  ;;  %v908_v37 = vmul.f32 %v3537_v31, %v392_v32 }
 0x13c   :  { %1388 = vst [vmem:[#allocation8 + $0x958] sm:$0xff] %v876_v36  ;;  %v394_v36 = vld [vmem:[#allocation7 + $0xa68] sm:$0xff]  ;;  %v909_v39 = vmul.f32 %v3537_v31, %v393_v34 }
 0x13d   :  { %1389 = vst [vmem:[#allocation8 + $0x960] sm:$0xff] %v877_v38  ;;  %v395_v38 = vld [vmem:[#allocation7 + $0xa70] sm:$0xff]  ;;  %v910_v40 = vmul.f32 %v3537_v31, %v394_v36 }
 0x13e   :  { %1390 = vst [vmem:[#allocation8 + $0x968] sm:$0xff] %v878_v1  ;;  %v396_v1 = vld [vmem:[#allocation7 + $0xa78] sm:$0xff]  ;;  %v911_v42 = vmul.f32 %v3537_v31, %v395_v38 }
 0x13f   :  { %1391 = vst [vmem:[#allocation8 + $0x970] sm:$0xff] %v879_v41  ;;  %v397_v41 = vld [vmem:[#allocation7 + $0xa80] sm:$0xff]  ;;  %v912_v44 = vmul.f32 %v3537_v31, %v396_v1 }
 0x140   :  { %1392 = vst [vmem:[#allocation8 + $0x978] sm:$0xff] %v880_v43  ;;  %v398_v43 = vld [vmem:[#allocation7 + $0xa88] sm:$0xff]  ;;  %v913_v46 = vmul.f32 %v3537_v31, %v397_v41 }
 0x141   :  { %1393 = vst [vmem:[#allocation8 + $0x980] sm:$0xff] %v881_v45  ;;  %v399_v45 = vld [vmem:[#allocation7 + $0xa90] sm:$0xff]  ;;  %v914_v48 = vmul.f32 %v3537_v31, %v398_v43 }
 0x142   :  { %1394 = vst [vmem:[#allocation8 + $0x988] sm:$0xff] %v882_v47  ;;  %v400_v47 = vld [vmem:[#allocation7 + $0xa98] sm:$0xff]  ;;  %v915_v50 = vmul.f32 %v3537_v31, %v399_v45 }
 0x143   :  { %1395 = vst [vmem:[#allocation8 + $0x990] sm:$0xff] %v883_v49  ;;  %v401_v49 = vld [vmem:[#allocation7 + $0xaa0] sm:$0xff]  ;;  %v916_v52 = vmul.f32 %v3537_v31, %v400_v47 }
 0x144   :  { %1396 = vst [vmem:[#allocation8 + $0x998] sm:$0xff] %v884_v51  ;;  %v402_v51 = vld [vmem:[#allocation7 + $0xaa8] sm:$0xff]  ;;  %v917_v54 = vmul.f32 %v3537_v31, %v401_v49 }
 0x145   :  { %1397 = vst [vmem:[#allocation8 + $0x9a0] sm:$0xff] %v885_v53  ;;  %v403_v53 = vld [vmem:[#allocation7 + $0xab0] sm:$0xff]  ;;  %v918_v56 = vmul.f32 %v3537_v31, %v402_v51  ;;  %v923_v31 = vmul.f32 %v3710_v58, %v407_v62 }
 0x146   :  { %1398 = vst [vmem:[#allocation8 + $0x9a8] sm:$0xff] %v886_v55  ;;  %v404_v55 = vld [vmem:[#allocation7 + $0xab8] sm:$0xff] }
 0x147   :  { %1399 = vst [vmem:[#allocation8 + $0x9b0] sm:$0xff] %v887_v57  ;;  %v405_v57 = vld [vmem:[#allocation7 + $0xac0] sm:$0xff] }
 0x148   :  { %1400 = vst [vmem:[#allocation8 + $0x9b8] sm:$0xff] %v888_v59  ;;  %v919_v59 = vmul.f32 %v3710_v58, %v403_v53 }
 0x149   :  { %1401 = vst [vmem:[#allocation8 + $0x9c0] sm:$0xff] %v889_v61  ;;  %v920_v61 = vmul.f32 %v3710_v58, %v404_v55 }
 0x14a   :  { %1402 = vst [vmem:[#allocation8 + $0x9c8] sm:$0xff] %v890_v63  ;;  %v921_v63 = vmul.f32 %v3710_v58, %v405_v57 }
 0x14b   :  { %1403 = vst [vmem:[#allocation8 + $0x9d0] sm:$0xff] %v891_v2  ;;  %v922_v2 = vmul.f32 %v3710_v58, %v406_v60 }
 0x14c   :  { %1404 = vst [vmem:[#allocation8 + $0x9d8] sm:$0xff] %v892_v4  ;;  %v410_v4 = vld [vmem:[#allocation7 + $0xae8] sm:$0xff] }
 0x14d   :  { %1405 = vst [vmem:[#allocation8 + $0x9e0] sm:$0xff] %v893_v6  ;;  %v411_v6 = vld [vmem:[#allocation7 + $0xaf0] sm:$0xff]  ;;  %v926_v9 = vmul.f32 %v3710_v58, %v410_v4 }
 0x14e   :  { %1406 = vst [vmem:[#allocation8 + $0x9e8] sm:$0xff] %v894_v8  ;;  %v412_v8 = vld [vmem:[#allocation7 + $0xaf8] sm:$0xff]  ;;  %v927_v11 = vmul.f32 %v3710_v58, %v411_v6 }
 0x14f   :  { %1407 = vst [vmem:[#allocation8 + $0x9f0] sm:$0xff] %v895_v10  ;;  %v413_v10 = vld [vmem:[#allocation7 + $0xb00] sm:$0xff]  ;;  %v928_v13 = vmul.f32 %v3710_v58, %v412_v8 }
 0x150   :  { %1408 = vst [vmem:[#allocation8 + $0x9f8] sm:$0xff] %v896_v12  ;;  %v414_v12 = vld [vmem:[#allocation7 + $0xb08] sm:$0xff]  ;;  %v929_v15 = vmul.f32 %v3710_v58, %v413_v10 }
 0x151   :  { %1409 = vst [vmem:[#allocation8 + $0xa00] sm:$0xff] %v897_v14  ;;  %v415_v14 = vld [vmem:[#allocation7 + $0xb10] sm:$0xff]  ;;  %v930_v17 = vmul.f32 %v3710_v58, %v414_v12 }
 0x152   :  { %1410 = vst [vmem:[#allocation8 + $0xa08] sm:$0xff] %v898_v16  ;;  %v416_v16 = vld [vmem:[#allocation7 + $0xb18] sm:$0xff]  ;;  %v931_v19 = vmul.f32 %v3710_v58, %v415_v14 }
 0x153   :  { %1411 = vst [vmem:[#allocation8 + $0xa10] sm:$0xff] %v899_v18  ;;  %v417_v18 = vld [vmem:[#allocation7 + $0xb20] sm:$0xff]  ;;  %v932_v21 = vmul.f32 %v3710_v58, %v416_v16 }
 0x154   :  { %1412 = vst [vmem:[#allocation8 + $0xa18] sm:$0xff] %v900_v20  ;;  %v418_v20 = vld [vmem:[#allocation7 + $0xb28] sm:$0xff]  ;;  %v933_v23 = vmul.f32 %v3710_v58, %v417_v18 }
 0x155   :  { %1413 = vst [vmem:[#allocation8 + $0xa20] sm:$0xff] %v901_v22  ;;  %v419_v22 = vld [vmem:[#allocation7 + $0xb30] sm:$0xff]  ;;  %v934_v25 = vmul.f32 %v3710_v58, %v418_v20 }
 0x156   :  { %1414 = vst [vmem:[#allocation8 + $0xa28] sm:$0xff] %v902_v24  ;;  %v420_v24 = vld [vmem:[#allocation7 + $0xb38] sm:$0xff]  ;;  %v935_v27 = vmul.f32 %v3710_v58, %v419_v22 }
 0x157   :  { %1415 = vst [vmem:[#allocation8 + $0xa30] sm:$0xff] %v903_v26  ;;  %v421_v26 = vld [vmem:[#allocation7 + $0xb40] sm:$0xff]  ;;  %v936_v29 = vmul.f32 %v3710_v58, %v420_v24 }
 0x158   :  { %1416 = vst [vmem:[#allocation8 + $0xa38] sm:$0xff] %v904_v28  ;;  %v422_v28 = vld [vmem:[#allocation7 + $0xb48] sm:$0xff]  ;;  %v937_v32 = vmul.f32 %v3710_v58, %v421_v26 }
 0x159   :  { %1417 = vst [vmem:[#allocation8 + $0xa40] sm:$0xff] %v905_v30  ;;  %v423_v30 = vld [vmem:[#allocation7 + $0xb50] sm:$0xff]  ;;  %v938_v34 = vmul.f32 %v3710_v58, %v422_v28 }
 0x15a   :  { %1418 = vst [vmem:[#allocation8 + $0xa48] sm:$0xff] %v906_v33  ;;  %v424_v33 = vld [vmem:[#allocation7 + $0xb58] sm:$0xff]  ;;  %v939_v36 = vmul.f32 %v3710_v58, %v423_v30 }
 0x15b   :  { %1419 = vst [vmem:[#allocation8 + $0xa50] sm:$0xff] %v907_v35  ;;  %v425_v35 = vld [vmem:[#allocation7 + $0xb60] sm:$0xff]  ;;  %v940_v38 = vmul.f32 %v3710_v58, %v424_v33 }
 0x15c   :  { %1420 = vst [vmem:[#allocation8 + $0xa58] sm:$0xff] %v908_v37  ;;  %v426_v37 = vld [vmem:[#allocation7 + $0xb68] sm:$0xff]  ;;  %v941_v1 = vmul.f32 %v3710_v58, %v425_v35 }
 0x15d   :  { %1421 = vst [vmem:[#allocation8 + $0xa60] sm:$0xff] %v909_v39  ;;  %v427_v39 = vld [vmem:[#allocation7 + $0xb70] sm:$0xff]  ;;  %v942_v41 = vmul.f32 %v3710_v58, %v426_v37 }
 0x15e   :  { %1422 = vst [vmem:[#allocation8 + $0xa68] sm:$0xff] %v910_v40  ;;  %v428_v40 = vld [vmem:[#allocation7 + $0xb78] sm:$0xff]  ;;  %v943_v43 = vmul.f32 %v3710_v58, %v427_v39 }
 0x15f   :  { %1423 = vst [vmem:[#allocation8 + $0xa70] sm:$0xff] %v911_v42  ;;  %v429_v42 = vld [vmem:[#allocation7 + $0xb80] sm:$0xff]  ;;  %v944_v45 = vmul.f32 %v3710_v58, %v428_v40 }
 0x160   :  { %1424 = vst [vmem:[#allocation8 + $0xa78] sm:$0xff] %v912_v44  ;;  %v430_v44 = vld [vmem:[#allocation7 + $0xb88] sm:$0xff]  ;;  %v945_v47 = vmul.f32 %v3710_v58, %v429_v42 }
 0x161   :  { %1425 = vst [vmem:[#allocation8 + $0xa80] sm:$0xff] %v913_v46  ;;  %v431_v46 = vld [vmem:[#allocation7 + $0xb90] sm:$0xff]  ;;  %v946_v49 = vmul.f32 %v3710_v58, %v430_v44 }
 0x162   :  { %1426 = vst [vmem:[#allocation8 + $0xa88] sm:$0xff] %v914_v48  ;;  %v432_v48 = vld [vmem:[#allocation7 + $0xb98] sm:$0xff]  ;;  %v947_v51 = vmul.f32 %v3710_v58, %v431_v46 }
 0x163   :  { %1427 = vst [vmem:[#allocation8 + $0xa90] sm:$0xff] %v915_v50  ;;  %v433_v50 = vld [vmem:[#allocation7 + $0xba0] sm:$0xff]  ;;  %v948_v53 = vmul.f32 %v3710_v58, %v432_v48 }
 0x164   :  { %1428 = vst [vmem:[#allocation8 + $0xa98] sm:$0xff] %v916_v52  ;;  %v434_v52 = vld [vmem:[#allocation7 + $0xba8] sm:$0xff]  ;;  %v949_v55 = vmul.f32 %v3710_v58, %v433_v50 }
 0x165   :  { %1429 = vst [vmem:[#allocation8 + $0xaa0] sm:$0xff] %v917_v54  ;;  %v435_v54 = vld [vmem:[#allocation7 + $0xbb0] sm:$0xff]  ;;  %v950_v57 = vmul.f32 %v3710_v58, %v434_v52 }
 0x166   :  { %1430 = vst [vmem:[#allocation8 + $0xaa8] sm:$0xff] %v918_v56  ;;  %v436_v56 = vld [vmem:[#allocation7 + $0xbb8] sm:$0xff]  ;;  %v951_v60 = vmul.f32 %v3710_v58, %v435_v54 }
 0x167   :  { %1431 = vst [vmem:[#allocation8 + $0xab0] sm:$0xff] %v919_v59  ;;  %v437_v59 = vld [vmem:[#allocation7 + $0xbc0] sm:$0xff]  ;;  %v952_v62 = vmul.f32 %v3710_v58, %v436_v56 }
 0x168   :  { %1432 = vst [vmem:[#allocation8 + $0xab8] sm:$0xff] %v920_v61  ;;  %v438_v61 = vld [vmem:[#allocation7 + $0xbc8] sm:$0xff]  ;;  %v953_v0 = vmul.f32 %v3710_v58, %v437_v59 }
 0x169   :  { %1433 = vst [vmem:[#allocation8 + $0xac0] sm:$0xff] %v921_v63  ;;  %v439_v63 = vld [vmem:[#allocation7 + $0xbd0] sm:$0xff]  ;;  %v954_v3 = vmul.f32 %v3710_v58, %v438_v61 }
 0x16a   :  { %1434 = vst [vmem:[#allocation8 + $0xac8] sm:$0xff] %v922_v2  ;;  %v440_v2 = vld [vmem:[#allocation7 + $0xbd8] sm:$0xff]  ;;  %v955_v4 = vmul.f32 %v3710_v58, %v439_v63 }
 0x16b   :  { %1435 = vst [vmem:[#allocation8 + $0xad0] sm:$0xff] %v923_v31  ;;  %v441_v31 = vld [vmem:[#allocation7 + $0xbe0] sm:$0xff]  ;;  %v956_v6 = vmul.f32 %v3710_v58, %v440_v2 }
 0x16c   :  { %1436 = vst [vmem:[#allocation8 + $0xad8] sm:$0xff] %v924_v5  ;;  %v442_v5 = vld [vmem:[#allocation7 + $0xbe8] sm:$0xff]  ;;  %v957_v8 = vmul.f32 %v3710_v58, %v441_v31 }
 0x16d   :  { %1437 = vst [vmem:[#allocation8 + $0xae0] sm:$0xff] %v925_v7  ;;  %v443_v7 = vld [vmem:[#allocation7 + $0xbf0] sm:$0xff]  ;;  %v958_v10 = vmul.f32 %v3710_v58, %v442_v5 }
 0x16e   :  { %1438 = vst [vmem:[#allocation8 + $0xae8] sm:$0xff] %v926_v9  ;;  %v444_v9 = vld [vmem:[#allocation7 + $0xbf8] sm:$0xff]  ;;  %v959_v12 = vmul.f32 %v3710_v58, %v443_v7 }
 0x16f   :  { %1439 = vst [vmem:[#allocation8 + $0xaf0] sm:$0xff] %v927_v11  ;;  %v445_v11 = vld [vmem:[#allocation7 + $0xc00] sm:$0xff]  ;;  %v960_v14 = vmul.f32 %v3710_v58, %v444_v9 }
 0x170   :  { %1440 = vst [vmem:[#allocation8 + $0xaf8] sm:$0xff] %v928_v13  ;;  %v446_v13 = vld [vmem:[#allocation7 + $0xc08] sm:$0xff]  ;;  %v961_v16 = vmul.f32 %v3710_v58, %v445_v11 }
 0x171   :  { %1441 = vst [vmem:[#allocation8 + $0xb00] sm:$0xff] %v929_v15  ;;  %v447_v15 = vld [vmem:[#allocation7 + $0xc10] sm:$0xff]  ;;  %v962_v18 = vmul.f32 %v3710_v58, %v446_v13 }
 0x172   :  { %1442 = vst [vmem:[#allocation8 + $0xb08] sm:$0xff] %v930_v17  ;;  %v448_v17 = vld [vmem:[#allocation7 + $0xc18] sm:$0xff]  ;;  %v963_v20 = vmul.f32 %v3710_v58, %v447_v15 }
 0x173   :  { %1443 = vst [vmem:[#allocation8 + $0xb10] sm:$0xff] %v931_v19  ;;  %v449_v19 = vld [vmem:[#allocation7 + $0xc20] sm:$0xff]  ;;  %v964_v22 = vmul.f32 %v3710_v58, %v448_v17 }
 0x174   :  { %1444 = vst [vmem:[#allocation8 + $0xb18] sm:$0xff] %v932_v21  ;;  %v450_v21 = vld [vmem:[#allocation7 + $0xc28] sm:$0xff]  ;;  %v965_v24 = vmul.f32 %v3710_v58, %v449_v19 }
 0x175   :  { %1445 = vst [vmem:[#allocation8 + $0xb20] sm:$0xff] %v933_v23  ;;  %v451_v23 = vld [vmem:[#allocation7 + $0xc30] sm:$0xff]  ;;  %v966_v26 = vmul.f32 %v3710_v58, %v450_v21 }
 0x176   :  { %1446 = vst [vmem:[#allocation8 + $0xb28] sm:$0xff] %v934_v25  ;;  %v452_v25 = vld [vmem:[#allocation7 + $0xc38] sm:$0xff]  ;;  %v967_v28 = vmul.f32 %v3710_v58, %v451_v23 }
 0x177   :  { %1447 = vst [vmem:[#allocation8 + $0xb30] sm:$0xff] %v935_v27  ;;  %v453_v27 = vld [vmem:[#allocation7 + $0xc40] sm:$0xff]  ;;  %v968_v30 = vmul.f32 %v3710_v58, %v452_v25 }
 0x178   :  { %1448 = vst [vmem:[#allocation8 + $0xb38] sm:$0xff] %v936_v29  ;;  %v454_v29 = vld [vmem:[#allocation7 + $0xc48] sm:$0xff]  ;;  %v969_v33 = vmul.f32 %v3710_v58, %v453_v27 }
 0x179   :  { %1449 = vst [vmem:[#allocation8 + $0xb40] sm:$0xff] %v937_v32  ;;  %v455_v32 = vld [vmem:[#allocation7 + $0xc50] sm:$0xff]  ;;  %v970_v35 = vmul.f32 %v3710_v58, %v454_v29 }
 0x17a   :  { %1450 = vst [vmem:[#allocation8 + $0xb48] sm:$0xff] %v938_v34  ;;  %v456_v34 = vld [vmem:[#allocation7 + $0xc58] sm:$0xff]  ;;  %v971_v37 = vmul.f32 %v3710_v58, %v455_v32 }
 0x17b   :  { %1451 = vst [vmem:[#allocation8 + $0xb50] sm:$0xff] %v939_v36  ;;  %v457_v36 = vld [vmem:[#allocation7 + $0xc60] sm:$0xff]  ;;  %v972_v39 = vmul.f32 %v3710_v58, %v456_v34 }
 0x17c   :  { %1452 = vst [vmem:[#allocation8 + $0xb58] sm:$0xff] %v940_v38  ;;  %v458_v38 = vld [vmem:[#allocation7 + $0xc68] sm:$0xff]  ;;  %v973_v40 = vmul.f32 %v3710_v58, %v457_v36 }
 0x17d   :  { %1453 = vst [vmem:[#allocation8 + $0xb60] sm:$0xff] %v941_v1  ;;  %v459_v1 = vld [vmem:[#allocation7 + $0xc70] sm:$0xff]  ;;  %v974_v42 = vmul.f32 %v3710_v58, %v458_v38 }
 0x17e   :  { %1454 = vst [vmem:[#allocation8 + $0xb68] sm:$0xff] %v942_v41  ;;  %v460_v41 = vld [vmem:[#allocation7 + $0xc78] sm:$0xff]  ;;  %v975_v44 = vmul.f32 %v3710_v58, %v459_v1 }
 0x17f   :  { %1455 = vst [vmem:[#allocation8 + $0xb70] sm:$0xff] %v943_v43  ;;  %v461_v43 = vld [vmem:[#allocation7 + $0xc80] sm:$0xff]  ;;  %v976_v46 = vmul.f32 %v3710_v58, %v460_v41 }
 0x180   :  { %1456 = vst [vmem:[#allocation8 + $0xb78] sm:$0xff] %v944_v45  ;;  %v462_v45 = vld [vmem:[#allocation7 + $0xc88] sm:$0xff]  ;;  %v977_v48 = vmul.f32 %v3710_v58, %v461_v43 }
 0x181   :  { %1457 = vst [vmem:[#allocation8 + $0xb80] sm:$0xff] %v945_v47  ;;  %v463_v47 = vld [vmem:[#allocation7 + $0xc90] sm:$0xff]  ;;  %v978_v50 = vmul.f32 %v3710_v58, %v462_v45 }
 0x182   :  { %1458 = vst [vmem:[#allocation8 + $0xb88] sm:$0xff] %v946_v49  ;;  %v464_v49 = vld [vmem:[#allocation7 + $0xc98] sm:$0xff]  ;;  %v979_v52 = vmul.f32 %v3710_v58, %v463_v47 }
 0x183   :  { %1459 = vst [vmem:[#allocation8 + $0xb90] sm:$0xff] %v947_v51  ;;  %v465_v51 = vld [vmem:[#allocation7 + $0xca0] sm:$0xff]  ;;  %v980_v54 = vmul.f32 %v3710_v58, %v464_v49 }
 0x184   :  { %1460 = vst [vmem:[#allocation8 + $0xb98] sm:$0xff] %v948_v53  ;;  %v466_v53 = vld [vmem:[#allocation7 + $0xca8] sm:$0xff]  ;;  %v981_v56 = vmul.f32 %v3710_v58, %v465_v51 }
 0x185   :  { %1461 = vst [vmem:[#allocation8 + $0xba0] sm:$0xff] %v949_v55  ;;  %v467_v55 = vld [vmem:[#allocation7 + $0xcb0] sm:$0xff]  ;;  %v982_v59 = vmul.f32 %v3710_v58, %v466_v53 }
 0x186   :  { %1462 = vst [vmem:[#allocation8 + $0xba8] sm:$0xff] %v950_v57  ;;  %v468_v57 = vld [vmem:[#allocation7 + $0xcb8] sm:$0xff]  ;;  %v983_v61 = vmul.f32 %v3710_v58, %v467_v55 }
 0x187   :  { %1463 = vst [vmem:[#allocation8 + $0xbb0] sm:$0xff] %v951_v60  ;;  %v469_v60 = vld [vmem:[#allocation7 + $0xcc0] sm:$0xff]  ;;  %v984_v63 = vmul.f32 %v3710_v58, %v468_v57 }
 0x188   :  { %1464 = vst [vmem:[#allocation8 + $0xbb8] sm:$0xff] %v952_v62  ;;  %v470_v62 = vld [vmem:[#allocation7 + $0xcc8] sm:$0xff]  ;;  %v985_v2 = vmul.f32 %v3710_v58, %v469_v60 }
 0x189   :  { %1465 = vst [vmem:[#allocation8 + $0xbc0] sm:$0xff] %v953_v0  ;;  %v471_v0 = vld [vmem:[#allocation7 + $0xcd0] sm:$0xff]  ;;  %v986_v31 = vmul.f32 %v3710_v58, %v470_v62 }
 0x18a   :  { %1466 = vst [vmem:[#allocation8 + $0xbc8] sm:$0xff] %v954_v3  ;;  %v472_v3 = vld [vmem:[#allocation7 + $0xcd8] sm:$0xff]  ;;  %v987_v5 = vmul.f32 %v3710_v58, %v471_v0 }
 0x18b   :  { %1467 = vst [vmem:[#allocation8 + $0xbd0] sm:$0xff] %v955_v4  ;;  %v473_v4 = vld [vmem:[#allocation7 + $0xce0] sm:$0xff]  ;;  %v988_v7 = vmul.f32 %v3710_v58, %v472_v3 }
 0x18c   :  { %1468 = vst [vmem:[#allocation8 + $0xbd8] sm:$0xff] %v956_v6  ;;  %v474_v6 = vld [vmem:[#allocation7 + $0xce8] sm:$0xff]  ;;  %v989_v9 = vmul.f32 %v3710_v58, %v473_v4 }
 0x18d   :  { %1469 = vst [vmem:[#allocation8 + $0xbe0] sm:$0xff] %v957_v8  ;;  %v475_v8 = vld [vmem:[#allocation7 + $0xcf0] sm:$0xff]  ;;  %v990_v11 = vmul.f32 %v3710_v58, %v474_v6 }
 0x18e   :  { %1470 = vst [vmem:[#allocation8 + $0xbe8] sm:$0xff] %v958_v10  ;;  %v476_v10 = vld [vmem:[#allocation7 + $0xcf8] sm:$0xff]  ;;  %v991_v13 = vmul.f32 %v3710_v58, %v475_v8 }
 0x18f   :  { %1471 = vst [vmem:[#allocation8 + $0xbf0] sm:$0xff] %v959_v12  ;;  %v477_v12 = vld [vmem:[#allocation7 + $0xd00] sm:$0xff]  ;;  %v992_v15 = vmul.f32 %v3710_v58, %v476_v10 }
 0x190   :  { %1472 = vst [vmem:[#allocation8 + $0xbf8] sm:$0xff] %v960_v14  ;;  %v478_v14 = vld [vmem:[#allocation7 + $0xd08] sm:$0xff]  ;;  %v993_v17 = vmul.f32 %v3710_v58, %v477_v12 }
 0x191   :  { %1473 = vst [vmem:[#allocation8 + $0xc00] sm:$0xff] %v961_v16  ;;  %v479_v16 = vld [vmem:[#allocation7 + $0xd10] sm:$0xff]  ;;  %v994_v19 = vmul.f32 %v3710_v58, %v478_v14 }
 0x192   :  { %1474 = vst [vmem:[#allocation8 + $0xc08] sm:$0xff] %v962_v18  ;;  %v480_v18 = vld [vmem:[#allocation7 + $0xd18] sm:$0xff]  ;;  %v995_v21 = vmul.f32 %v3710_v58, %v479_v16 }
 0x193   :  { %1475 = vst [vmem:[#allocation8 + $0xc10] sm:$0xff] %v963_v20  ;;  %v481_v20 = vld [vmem:[#allocation7 + $0xd20] sm:$0xff]  ;;  %v996_v23 = vmul.f32 %v3710_v58, %v480_v18 }
 0x194   :  { %1476 = vst [vmem:[#allocation8 + $0xc18] sm:$0xff] %v964_v22  ;;  %v482_v22 = vld [vmem:[#allocation7 + $0xd28] sm:$0xff]  ;;  %v997_v25 = vmul.f32 %v3710_v58, %v481_v20 }
 0x195   :  { %1477 = vst [vmem:[#allocation8 + $0xc20] sm:$0xff] %v965_v24  ;;  %v483_v24 = vld [vmem:[#allocation7 + $0xd30] sm:$0xff]  ;;  %v998_v27 = vmul.f32 %v3710_v58, %v482_v22 }
 0x196   :  { %1478 = vst [vmem:[#allocation8 + $0xc28] sm:$0xff] %v966_v26  ;;  %v484_v26 = vld [vmem:[#allocation7 + $0xd38] sm:$0xff]  ;;  %v999_v29 = vmul.f32 %v3710_v58, %v483_v24 }
 0x197   :  { %1479 = vst [vmem:[#allocation8 + $0xc30] sm:$0xff] %v967_v28  ;;  %v485_v28 = vld [vmem:[#allocation7 + $0xd40] sm:$0xff]  ;;  %v1000_v32 = vmul.f32 %v3710_v58, %v484_v26 }
 0x198   :  { %1480 = vst [vmem:[#allocation8 + $0xc38] sm:$0xff] %v968_v30  ;;  %v486_v30 = vld [vmem:[#allocation7 + $0xd48] sm:$0xff]  ;;  %v1001_v34 = vmul.f32 %v3710_v58, %v485_v28 }
 0x199   :  { %1481 = vst [vmem:[#allocation8 + $0xc40] sm:$0xff] %v969_v33  ;;  %v487_v33 = vld [vmem:[#allocation7 + $0xd50] sm:$0xff]  ;;  %v1002_v36 = vmul.f32 %v3710_v58, %v486_v30 }
 0x19a   :  { %1482 = vst [vmem:[#allocation8 + $0xc48] sm:$0xff] %v970_v35  ;;  %v488_v35 = vld [vmem:[#allocation7 + $0xd58] sm:$0xff]  ;;  %v1003_v38 = vmul.f32 %v3710_v58, %v487_v33 }
 0x19b   :  { %1483 = vst [vmem:[#allocation8 + $0xc50] sm:$0xff] %v971_v37  ;;  %v489_v37 = vld [vmem:[#allocation7 + $0xd60] sm:$0xff]  ;;  %v1004_v1 = vmul.f32 %v3710_v58, %v488_v35 }
 0x19c   :  { %1484 = vst [vmem:[#allocation8 + $0xc58] sm:$0xff] %v972_v39  ;;  %v490_v39 = vld [vmem:[#allocation7 + $0xd68] sm:$0xff]  ;;  %v1005_v41 = vmul.f32 %v3710_v58, %v489_v37 }
 0x19d   :  { %1485 = vst [vmem:[#allocation8 + $0xc60] sm:$0xff] %v973_v40  ;;  %v491_v40 = vld [vmem:[#allocation7 + $0xd70] sm:$0xff]  ;;  %v1006_v43 = vmul.f32 %v3710_v58, %v490_v39 }
 0x19e   :  { %1486 = vst [vmem:[#allocation8 + $0xc68] sm:$0xff] %v974_v42  ;;  %v492_v42 = vld [vmem:[#allocation7 + $0xd78] sm:$0xff]  ;;  %v1007_v45 = vmul.f32 %v3710_v58, %v491_v40 }
 0x19f   :  { %1487 = vst [vmem:[#allocation8 + $0xc70] sm:$0xff] %v975_v44  ;;  %v493_v44 = vld [vmem:[#allocation7 + $0xd80] sm:$0xff]  ;;  %v1008_v47 = vmul.f32 %v3710_v58, %v492_v42 }
 0x1a0   :  { %1488 = vst [vmem:[#allocation8 + $0xc78] sm:$0xff] %v976_v46  ;;  %v494_v46 = vld [vmem:[#allocation7 + $0xd88] sm:$0xff]  ;;  %v1009_v49 = vmul.f32 %v3710_v58, %v493_v44 }
 0x1a1   :  { %1489 = vst [vmem:[#allocation8 + $0xc80] sm:$0xff] %v977_v48  ;;  %v495_v48 = vld [vmem:[#allocation7 + $0xd90] sm:$0xff]  ;;  %v1010_v51 = vmul.f32 %v3710_v58, %v494_v46 }
 0x1a2   :  { %1490 = vst [vmem:[#allocation8 + $0xc88] sm:$0xff] %v978_v50  ;;  %v496_v50 = vld [vmem:[#allocation7 + $0xd98] sm:$0xff]  ;;  %v1011_v53 = vmul.f32 %v3710_v58, %v495_v48 }
 0x1a3   :  { %1491 = vst [vmem:[#allocation8 + $0xc90] sm:$0xff] %v979_v52  ;;  %v497_v52 = vld [vmem:[#allocation7 + $0xda0] sm:$0xff]  ;;  %v1012_v55 = vmul.f32 %v3710_v58, %v496_v50 }
 0x1a4   :  { %1492 = vst [vmem:[#allocation8 + $0xc98] sm:$0xff] %v980_v54  ;;  %v498_v54 = vld [vmem:[#allocation7 + $0xda8] sm:$0xff]  ;;  %v1013_v57 = vmul.f32 %v3710_v58, %v497_v52 }
 0x1a5   :  { %1493 = vst [vmem:[#allocation8 + $0xca0] sm:$0xff] %v981_v56  ;;  %v499_v56 = vld [vmem:[#allocation7 + $0xdb0] sm:$0xff]  ;;  %v1014_v60 = vmul.f32 %v3710_v58, %v498_v54 }
 0x1a6   :  { %1494 = vst [vmem:[#allocation8 + $0xca8] sm:$0xff] %v982_v59  ;;  %v500_v59 = vld [vmem:[#allocation7 + $0xdb8] sm:$0xff]  ;;  %v1015_v62 = vmul.f32 %v3710_v58, %v499_v56 }
 0x1a7   :  { %1495 = vst [vmem:[#allocation8 + $0xcb0] sm:$0xff] %v983_v61  ;;  %v501_v61 = vld [vmem:[#allocation7 + $0xdc0] sm:$0xff]  ;;  %v1016_v0 = vmul.f32 %v3710_v58, %v500_v59 }
 0x1a8   :  { %1496 = vst [vmem:[#allocation8 + $0xcb8] sm:$0xff] %v984_v63  ;;  %v502_v63 = vld [vmem:[#allocation7 + $0xdc8] sm:$0xff]  ;;  %v1017_v3 = vmul.f32 %v3710_v58, %v501_v61 }
 0x1a9   :  { %1497 = vst [vmem:[#allocation8 + $0xcc0] sm:$0xff] %v985_v2  ;;  %v503_v2 = vld [vmem:[#allocation7 + $0xdd0] sm:$0xff]  ;;  %v1018_v4 = vmul.f32 %v3710_v58, %v502_v63 }
 0x1aa   :  { %1498 = vst [vmem:[#allocation8 + $0xcc8] sm:$0xff] %v986_v31  ;;  %v504_v31 = vld [vmem:[#allocation7 + $0xdd8] sm:$0xff]  ;;  %v1019_v6 = vmul.f32 %v3710_v58, %v503_v2 }
 0x1ab   :  { %1499 = vst [vmem:[#allocation8 + $0xcd0] sm:$0xff] %v987_v5  ;;  %v505_v5 = vld [vmem:[#allocation7 + $0xde0] sm:$0xff]  ;;  %v1020_v8 = vmul.f32 %v3710_v58, %v504_v31 }
 0x1ac   :  { %1500 = vst [vmem:[#allocation8 + $0xcd8] sm:$0xff] %v988_v7  ;;  %v506_v7 = vld [vmem:[#allocation7 + $0xde8] sm:$0xff]  ;;  %v1021_v10 = vmul.f32 %v3710_v58, %v505_v5 }
 0x1ad   :  { %1501 = vst [vmem:[#allocation8 + $0xce0] sm:$0xff] %v989_v9  ;;  %v507_v9 = vld [vmem:[#allocation7 + $0xdf0] sm:$0xff]  ;;  %v1022_v12 = vmul.f32 %v3710_v58, %v506_v7 }
 0x1ae   :  { %1502 = vst [vmem:[#allocation8 + $0xce8] sm:$0xff] %v990_v11  ;;  %v508_v11 = vld [vmem:[#allocation7 + $0xdf8] sm:$0xff]  ;;  %v1023_v14 = vmul.f32 %v3710_v58, %v507_v9 }
 0x1af   :  { %1503 = vst [vmem:[#allocation8 + $0xcf0] sm:$0xff] %v991_v13  ;;  %v509_v13 = vld [vmem:[#allocation7 + $0xe00] sm:$0xff]  ;;  %v1024_v16 = vmul.f32 %v3710_v58, %v508_v11 }
 0x1b0   :  { %1504 = vst [vmem:[#allocation8 + $0xcf8] sm:$0xff] %v992_v15  ;;  %v510_v15 = vld [vmem:[#allocation7 + $0xe08] sm:$0xff]  ;;  %v1025_v18 = vmul.f32 %v3710_v58, %v509_v13 }
 0x1b1   :  { %1505 = vst [vmem:[#allocation8 + $0xd00] sm:$0xff] %v993_v17  ;;  %v511_v17 = vld [vmem:[#allocation7 + $0xe10] sm:$0xff]  ;;  %v1026_v20 = vmul.f32 %v3710_v58, %v510_v15 }
 0x1b2   :  { %1506 = vst [vmem:[#allocation8 + $0xd08] sm:$0xff] %v994_v19  ;;  %v512_v19 = vld [vmem:[#allocation7 + $0xe18] sm:$0xff]  ;;  %v1027_v22 = vmul.f32 %v3710_v58, %v511_v17 }
 0x1b3   :  { %1507 = vst [vmem:[#allocation8 + $0xd10] sm:$0xff] %v995_v21  ;;  %v513_v21 = vld [vmem:[#allocation7 + $0xe20] sm:$0xff]  ;;  %v1028_v24 = vmul.f32 %v3710_v58, %v512_v19 }
 0x1b4   :  { %1508 = vst [vmem:[#allocation8 + $0xd18] sm:$0xff] %v996_v23  ;;  %v514_v23 = vld [vmem:[#allocation7 + $0xe28] sm:$0xff]  ;;  %v1029_v26 = vmul.f32 %v3710_v58, %v513_v21 }
 0x1b5   :  { %1509 = vst [vmem:[#allocation8 + $0xd20] sm:$0xff] %v997_v25  ;;  %v515_v25 = vld [vmem:[#allocation7 + $0xe30] sm:$0xff]  ;;  %v1030_v28 = vmul.f32 %v3710_v58, %v514_v23 }
 0x1b6   :  { %1510 = vst [vmem:[#allocation8 + $0xd28] sm:$0xff] %v998_v27  ;;  %v516_v27 = vld [vmem:[#allocation7 + $0xe38] sm:$0xff]  ;;  %v1031_v30 = vmul.f32 %v3710_v58, %v515_v25 }
 0x1b7   :  { %1511 = vst [vmem:[#allocation8 + $0xd30] sm:$0xff] %v999_v29  ;;  %v517_v29 = vld [vmem:[#allocation7 + $0xe40] sm:$0xff]  ;;  %v1032_v33 = vmul.f32 %v3710_v58, %v516_v27 }
 0x1b8   :  { %1512 = vst [vmem:[#allocation8 + $0xd38] sm:$0xff] %v1000_v32  ;;  %v518_v32 = vld [vmem:[#allocation7 + $0xe48] sm:$0xff]  ;;  %v1033_v35 = vmul.f32 %v3710_v58, %v517_v29 }
 0x1b9   :  { %1513 = vst [vmem:[#allocation8 + $0xd40] sm:$0xff] %v1001_v34  ;;  %v519_v34 = vld [vmem:[#allocation7 + $0xe50] sm:$0xff]  ;;  %v1034_v37 = vmul.f32 %v3710_v58, %v518_v32 }
 0x1ba   :  { %1514 = vst [vmem:[#allocation8 + $0xd48] sm:$0xff] %v1002_v36  ;;  %v520_v36 = vld [vmem:[#allocation7 + $0xe58] sm:$0xff]  ;;  %v1035_v39 = vmul.f32 %v3710_v58, %v519_v34 }
 0x1bb   :  { %1515 = vst [vmem:[#allocation8 + $0xd50] sm:$0xff] %v1003_v38  ;;  %v521_v38 = vld [vmem:[#allocation7 + $0xe60] sm:$0xff]  ;;  %v1036_v40 = vmul.f32 %v3710_v58, %v520_v36 }
 0x1bc   :  { %1516 = vst [vmem:[#allocation8 + $0xd58] sm:$0xff] %v1004_v1  ;;  %v522_v1 = vld [vmem:[#allocation7 + $0xe68] sm:$0xff]  ;;  %v1037_v42 = vmul.f32 %v3710_v58, %v521_v38 }
 0x1bd   :  { %1517 = vst [vmem:[#allocation8 + $0xd60] sm:$0xff] %v1005_v41  ;;  %v523_v41 = vld [vmem:[#allocation7 + $0xe70] sm:$0xff]  ;;  %v1038_v44 = vmul.f32 %v3710_v58, %v522_v1 }
 0x1be   :  { %1518 = vst [vmem:[#allocation8 + $0xd68] sm:$0xff] %v1006_v43  ;;  %v524_v43 = vld [vmem:[#allocation7 + $0xe78] sm:$0xff]  ;;  %v1039_v46 = vmul.f32 %v3710_v58, %v523_v41 }
 0x1bf   :  { %1519 = vst [vmem:[#allocation8 + $0xd70] sm:$0xff] %v1007_v45  ;;  %v525_v45 = vld [vmem:[#allocation7 + $0xe80] sm:$0xff]  ;;  %v1040_v48 = vmul.f32 %v3710_v58, %v524_v43 }
 0x1c0   :  { %1520 = vst [vmem:[#allocation8 + $0xd78] sm:$0xff] %v1008_v47  ;;  %v526_v47 = vld [vmem:[#allocation7 + $0xe88] sm:$0xff]  ;;  %v1041_v50 = vmul.f32 %v3710_v58, %v525_v45 }
 0x1c1   :  { %1521 = vst [vmem:[#allocation8 + $0xd80] sm:$0xff] %v1009_v49  ;;  %v527_v49 = vld [vmem:[#allocation7 + $0xe90] sm:$0xff]  ;;  %v1042_v52 = vmul.f32 %v3710_v58, %v526_v47 }
 0x1c2   :  { %1522 = vst [vmem:[#allocation8 + $0xd88] sm:$0xff] %v1010_v51  ;;  %v528_v51 = vld [vmem:[#allocation7 + $0xe98] sm:$0xff]  ;;  %v1043_v54 = vmul.f32 %v3710_v58, %v527_v49 }
 0x1c3   :  { %1523 = vst [vmem:[#allocation8 + $0xd90] sm:$0xff] %v1011_v53  ;;  %v529_v53 = vld [vmem:[#allocation7 + $0xea0] sm:$0xff]  ;;  %v1044_v56 = vmul.f32 %v3710_v58, %v528_v51 }
 0x1c4   :  { %1524 = vst [vmem:[#allocation8 + $0xd98] sm:$0xff] %v1012_v55  ;;  %v530_v55 = vld [vmem:[#allocation7 + $0xea8] sm:$0xff]  ;;  %v1045_v59 = vmul.f32 %v3710_v58, %v529_v53 }
 0x1c5   :  { %1525 = vst [vmem:[#allocation8 + $0xda0] sm:$0xff] %v1013_v57  ;;  %v531_v57 = vld [vmem:[#allocation7 + $0xeb0] sm:$0xff]  ;;  %v1046_v61 = vmul.f32 %v3710_v58, %v530_v55 }
 0x1c6   :  { %1526 = vst [vmem:[#allocation8 + $0xda8] sm:$0xff] %v1014_v60  ;;  %v532_v60 = vld [vmem:[#allocation7 + $0xeb8] sm:$0xff]  ;;  %v1047_v63 = vmul.f32 %v3710_v58, %v531_v57 }
 0x1c7   :  { %1527 = vst [vmem:[#allocation8 + $0xdb0] sm:$0xff] %v1015_v62  ;;  %v533_v62 = vld [vmem:[#allocation7 + $0xec0] sm:$0xff]  ;;  %v1048_v2 = vmul.f32 %v3710_v58, %v532_v60 }
 0x1c8   :  { %1528 = vst [vmem:[#allocation8 + $0xdb8] sm:$0xff] %v1016_v0  ;;  %v534_v0 = vld [vmem:[#allocation7 + $0xec8] sm:$0xff]  ;;  %v1049_v31 = vmul.f32 %v3710_v58, %v533_v62 }
 0x1c9   :  { %1529 = vst [vmem:[#allocation8 + $0xdc0] sm:$0xff] %v1017_v3  ;;  %v535_v3 = vld [vmem:[#allocation7 + $0xed0] sm:$0xff]  ;;  %v1050_v5 = vmul.f32 %v3710_v58, %v534_v0 }
 0x1ca   :  { %1530 = vst [vmem:[#allocation8 + $0xdc8] sm:$0xff] %v1018_v4  ;;  %v536_v4 = vld [vmem:[#allocation7 + $0xed8] sm:$0xff]  ;;  %v1051_v7 = vmul.f32 %v3710_v58, %v535_v3 }
 0x1cb   :  { %1531 = vst [vmem:[#allocation8 + $0xdd0] sm:$0xff] %v1019_v6  ;;  %v537_v6 = vld [vmem:[#allocation7 + $0xee0] sm:$0xff]  ;;  %v1052_v9 = vmul.f32 %v3710_v58, %v536_v4 }
 0x1cc   :  { %1532 = vst [vmem:[#allocation8 + $0xdd8] sm:$0xff] %v1020_v8  ;;  %v538_v8 = vld [vmem:[#allocation7 + $0xee8] sm:$0xff]  ;;  %v1053_v11 = vmul.f32 %v3710_v58, %v537_v6 }
 0x1cd   :  { %1533 = vst [vmem:[#allocation8 + $0xde0] sm:$0xff] %v1021_v10  ;;  %v539_v10 = vld [vmem:[#allocation7 + $0xef0] sm:$0xff]  ;;  %v1054_v13 = vmul.f32 %v3710_v58, %v538_v8 }
 0x1ce   :  { %1534 = vst [vmem:[#allocation8 + $0xde8] sm:$0xff] %v1022_v12  ;;  %v540_v12 = vld [vmem:[#allocation7 + $0xef8] sm:$0xff]  ;;  %v1055_v15 = vmul.f32 %v3710_v58, %v539_v10 }
 0x1cf   :  { %1535 = vst [vmem:[#allocation8 + $0xdf0] sm:$0xff] %v1023_v14  ;;  %v541_v14 = vld [vmem:[#allocation7 + $0xf00] sm:$0xff]  ;;  %v1056_v17 = vmul.f32 %v3710_v58, %v540_v12 }
 0x1d0   :  { %1536 = vst [vmem:[#allocation8 + $0xdf8] sm:$0xff] %v1024_v16  ;;  %v542_v16 = vld [vmem:[#allocation7 + $0xf08] sm:$0xff]  ;;  %v1057_v19 = vmul.f32 %v3710_v58, %v541_v14  ;;  %v3879_v14 = vld [vmem:[#allocation5] ss:$0 sm:$0xff] }
 0x1d1   :  { %1537 = vst [vmem:[#allocation8 + $0xe00] sm:$0xff] %v1025_v18  ;;  %v543_v18 = vld [vmem:[#allocation7 + $0xf10] sm:$0xff]  ;;  %v1058_v21 = vmul.f32 %v3710_v58, %v542_v16 }
 0x1d2   :  { %1538 = vst [vmem:[#allocation8 + $0xe08] sm:$0xff] %v1026_v20  ;;  %v544_v20 = vld [vmem:[#allocation7 + $0xf18] sm:$0xff]  ;;  %v1059_v23 = vmul.f32 %v3710_v58, %v543_v18  ;;  %v2678_v18 = vld [vmem:[#allocation7] sm:$0xff] }
 0x1d3   :  { %1539 = vst [vmem:[#allocation8 + $0xe10] sm:$0xff] %v1027_v22  ;;  %v545_v22 = vld [vmem:[#allocation7 + $0xf20] sm:$0xff]  ;;  %v1060_v25 = vmul.f32 %v3710_v58, %v544_v20  ;;  %v2679_v20 = vld [vmem:[#allocation7 + $0x8] sm:$0xff] }
 0x1d4   :  { %1540 = vst [vmem:[#allocation8 + $0xe18] sm:$0xff] %v1028_v24  ;;  %v546_v24 = vld [vmem:[#allocation7 + $0xf28] sm:$0xff]  ;;  %v1061_v27 = vmul.f32 %v3710_v58, %v545_v22  ;;  %v2680_v22 = vld [vmem:[#allocation7 + $0x10] sm:$0xff] }
 0x1d5   :  { %1541 = vst [vmem:[#allocation8 + $0xe20] sm:$0xff] %v1029_v26  ;;  %v547_v26 = vld [vmem:[#allocation7 + $0xf30] sm:$0xff]  ;;  %v1062_v29 = vmul.f32 %v3710_v58, %v546_v24  ;;  %v2681_v24 = vld [vmem:[#allocation7 + $0x18] sm:$0xff] }
 0x1d6   :  { %1542 = vst [vmem:[#allocation8 + $0xe28] sm:$0xff] %v1030_v28  ;;  %v548_v28 = vld [vmem:[#allocation7 + $0xf38] sm:$0xff]  ;;  %v1063_v32 = vmul.f32 %v3710_v58, %v547_v26  ;;  %v2682_v26 = vld [vmem:[#allocation7 + $0x20] sm:$0xff] }
 0x1d7   :  { %1543 = vst [vmem:[#allocation8 + $0xe30] sm:$0xff] %v1031_v30  ;;  %v549_v30 = vld [vmem:[#allocation7 + $0xf40] sm:$0xff]  ;;  %v1064_v34 = vmul.f32 %v3710_v58, %v548_v28 }
 0x1d8   :  { %1544 = vst [vmem:[#allocation8 + $0xe38] sm:$0xff] %v1032_v33  ;;  %v550_v33 = vld [vmem:[#allocation7 + $0xf48] sm:$0xff]  ;;  %v1065_v36 = vmul.f32 %v3710_v58, %v549_v30 }
 0x1d9   :  { %1545 = vst [vmem:[#allocation8 + $0xe40] sm:$0xff] %v1033_v35  ;;  %v551_v35 = vld [vmem:[#allocation7 + $0xf50] sm:$0xff]  ;;  %v1066_v38 = vmul.f32 %v3710_v58, %v550_v33 }
 0x1da   :  { %1546 = vst [vmem:[#allocation8 + $0xe48] sm:$0xff] %v1034_v37  ;;  %v552_v37 = vld [vmem:[#allocation7 + $0xf58] sm:$0xff]  ;;  %v1067_v1 = vmul.f32 %v3710_v58, %v551_v35 }
 0x1db   :  { %1547 = vst [vmem:[#allocation8 + $0xe50] sm:$0xff] %v1035_v39  ;;  %v553_v39 = vld [vmem:[#allocation7 + $0xf60] sm:$0xff]  ;;  %v1068_v41 = vmul.f32 %v3710_v58, %v552_v37 }
 0x1dc   :  { %1548 = vst [vmem:[#allocation8 + $0xe58] sm:$0xff] %v1036_v40  ;;  %v554_v40 = vld [vmem:[#allocation7 + $0xf68] sm:$0xff]  ;;  %v1069_v43 = vmul.f32 %v3710_v58, %v553_v39 }
 0x1dd   :  { %1549 = vst [vmem:[#allocation8 + $0xe60] sm:$0xff] %v1037_v42  ;;  %v555_v42 = vld [vmem:[#allocation7 + $0xf70] sm:$0xff]  ;;  %v1070_v45 = vmul.f32 %v3710_v58, %v554_v40 }
 0x1de   :  { %1550 = vst [vmem:[#allocation8 + $0xe68] sm:$0xff] %v1038_v44  ;;  %v556_v44 = vld [vmem:[#allocation7 + $0xf78] sm:$0xff]  ;;  %v1071_v47 = vmul.f32 %v3710_v58, %v555_v42 }
 0x1df   :  { %1551 = vst [vmem:[#allocation8 + $0xe70] sm:$0xff] %v1039_v46  ;;  %v557_v46 = vld [vmem:[#allocation7 + $0xf80] sm:$0xff]  ;;  %v1072_v49 = vmul.f32 %v3710_v58, %v556_v44 }
 0x1e0   :  { %1552 = vst [vmem:[#allocation8 + $0xe78] sm:$0xff] %v1040_v48  ;;  %v558_v48 = vld [vmem:[#allocation7 + $0xf88] sm:$0xff]  ;;  %v1073_v51 = vmul.f32 %v3710_v58, %v557_v46 }
 0x1e1   :  { %1553 = vst [vmem:[#allocation8 + $0xe80] sm:$0xff] %v1041_v50  ;;  %v559_v50 = vld [vmem:[#allocation7 + $0xf90] sm:$0xff]  ;;  %v1074_v53 = vmul.f32 %v3710_v58, %v558_v48 }
 0x1e2   :  { %1554 = vst [vmem:[#allocation8 + $0xe88] sm:$0xff] %v1042_v52  ;;  %v560_v52 = vld [vmem:[#allocation7 + $0xf98] sm:$0xff]  ;;  %v1075_v55 = vmul.f32 %v3710_v58, %v559_v50 }
 0x1e3   :  { %1555 = vst [vmem:[#allocation8 + $0xe90] sm:$0xff] %v1043_v54  ;;  %v561_v54 = vld [vmem:[#allocation7 + $0xfa0] sm:$0xff]  ;;  %v1076_v57 = vmul.f32 %v3710_v58, %v560_v52 }
 0x1e4   :  { %1556 = vst [vmem:[#allocation8 + $0xe98] sm:$0xff] %v1044_v56  ;;  %v562_v56 = vld [vmem:[#allocation7 + $0xfa8] sm:$0xff]  ;;  %v1077_v60 = vmul.f32 %v3710_v58, %v561_v54 }
 0x1e5   :  { %1557 = vst [vmem:[#allocation8 + $0xea0] sm:$0xff] %v1045_v59  ;;  %v563_v59 = vld [vmem:[#allocation7 + $0xfb0] sm:$0xff]  ;;  %v1078_v62 = vmul.f32 %v3710_v58, %v562_v56 }
 0x1e6   :  { %1558 = vst [vmem:[#allocation8 + $0xea8] sm:$0xff] %v1046_v61  ;;  %v564_v61 = vld [vmem:[#allocation7 + $0xfb8] sm:$0xff]  ;;  %v1079_v0 = vmul.f32 %v3710_v58, %v563_v59 }
 0x1e7   :  { %1559 = vst [vmem:[#allocation8 + $0xeb0] sm:$0xff] %v1047_v63  ;;  %v565_v63 = vld [vmem:[#allocation7 + $0xfc0] sm:$0xff]  ;;  %v1080_v3 = vmul.f32 %v3710_v58, %v564_v61 }
 0x1e8   :  { %1560 = vst [vmem:[#allocation8 + $0xeb8] sm:$0xff] %v1048_v2  ;;  %v566_v2 = vld [vmem:[#allocation7 + $0xfc8] sm:$0xff]  ;;  %v1081_v4 = vmul.f32 %v3710_v58, %v565_v63 }
 0x1e9   :  { %1561 = vst [vmem:[#allocation8 + $0xec0] sm:$0xff] %v1049_v31  ;;  %v567_v31 = vld [vmem:[#allocation7 + $0xfd0] sm:$0xff]  ;;  %v1082_v6 = vmul.f32 %v3710_v58, %v566_v2 }
 0x1ea   :  { %1562 = vst [vmem:[#allocation8 + $0xec8] sm:$0xff] %v1050_v5  ;;  %v568_v5 = vld [vmem:[#allocation7 + $0xfd8] sm:$0xff]  ;;  %v1083_v8 = vmul.f32 %v3710_v58, %v567_v31 }
 0x1eb   :  { %1563 = vst [vmem:[#allocation8 + $0xed0] sm:$0xff] %v1051_v7  ;;  %v569_v7 = vld [vmem:[#allocation7 + $0xfe0] sm:$0xff]  ;;  %v1084_v10 = vmul.f32 %v3710_v58, %v568_v5 }
 0x1ec   :  { %1564 = vst [vmem:[#allocation8 + $0xed8] sm:$0xff] %v1052_v9  ;;  %v570_v9 = vld [vmem:[#allocation7 + $0xfe8] sm:$0xff]  ;;  %v1085_v12 = vmul.f32 %v3710_v58, %v569_v7 }
 0x1ed   :  { %1565 = vst [vmem:[#allocation8 + $0xee0] sm:$0xff] %v1053_v11  ;;  %v571_v11 = vld [vmem:[#allocation7 + $0xff0] sm:$0xff] }
 0x1ee   :  { %1566 = vst [vmem:[#allocation8 + $0xee8] sm:$0xff] %v1054_v13  ;;  %v572_v13 = vld [vmem:[#allocation7 + $0xff8] sm:$0xff]  ;;  %v1087_v16 = vmul.f32 %v3710_v58, %v571_v11 }
 0x1ef   :  { %1567 = vst [vmem:[#allocation8 + $0xef0] sm:$0xff] %v1055_v15  ;;  %v1086_v15 = vmul.f32 %v3710_v58, %v570_v9 }
 0x1f0   :  { %1568 = vst [vmem:[#allocation8 + $0xef8] sm:$0xff] %v1056_v17  ;;  %v1088_v17 = vmul.f32 %v3710_v58, %v572_v13  ;;  %v1609_v58 = vmul.f32 %v2682_v26, %v3879_v14 }
 0x1f1   :  { %1569 = vst [vmem:[#allocation8 + $0xf00] sm:$0xff] %v1057_v19  ;;  %v1605_v19 = vmul.f32 %v2678_v18, %v3879_v14 }
 0x1f2   :  { %1570 = vst [vmem:[#allocation8 + $0xf08] sm:$0xff] %v1058_v21  ;;  %v1606_v21 = vmul.f32 %v2679_v20, %v3879_v14 }
 0x1f3   :  { %1571 = vst [vmem:[#allocation8 + $0xf10] sm:$0xff] %v1059_v23  ;;  %v1607_v23 = vmul.f32 %v2680_v22, %v3879_v14 }
 0x1f4   :  { %1572 = vst [vmem:[#allocation8 + $0xf18] sm:$0xff] %v1060_v25  ;;  %v1608_v25 = vmul.f32 %v2681_v24, %v3879_v14 }
 0x1f5   :  { %1573 = vst [vmem:[#allocation8 + $0xf20] sm:$0xff] %v1061_v27  ;;  %v2683_v27 = vld [vmem:[#allocation7 + $0x28] sm:$0xff] }
 0x1f6   :  { %1574 = vst [vmem:[#allocation8 + $0xf28] sm:$0xff] %v1062_v29  ;;  %v1610_v28 = vmul.f32 %v2683_v27, %v3879_v14  ;;  %v2684_v29 = vld [vmem:[#allocation7 + $0x30] sm:$0xff] }
 0x1f7   :  { %1575 = vst [vmem:[#allocation8 + $0xf30] sm:$0xff] %v1063_v32  ;;  %v1611_v30 = vmul.f32 %v2684_v29, %v3879_v14  ;;  %v2685_v32 = vld [vmem:[#allocation7 + $0x38] sm:$0xff] }
 0x1f8   :  { %1576 = vst [vmem:[#allocation8 + $0xf38] sm:$0xff] %v1064_v34  ;;  %v1612_v33 = vmul.f32 %v2685_v32, %v3879_v14  ;;  %v2686_v34 = vld [vmem:[#allocation7 + $0x40] sm:$0xff] }
 0x1f9   :  { %1577 = vst [vmem:[#allocation8 + $0xf40] sm:$0xff] %v1065_v36  ;;  %v1613_v35 = vmul.f32 %v2686_v34, %v3879_v14  ;;  %v2687_v36 = vld [vmem:[#allocation7 + $0x48] sm:$0xff] }
 0x1fa   :  { %1578 = vst [vmem:[#allocation8 + $0xf48] sm:$0xff] %v1066_v38  ;;  %v1614_v37 = vmul.f32 %v2687_v36, %v3879_v14  ;;  %v2688_v38 = vld [vmem:[#allocation7 + $0x50] sm:$0xff] }
 0x1fb   :  { %1579 = vst [vmem:[#allocation8 + $0xf50] sm:$0xff] %v1067_v1  ;;  %v1615_v39 = vmul.f32 %v2688_v38, %v3879_v14  ;;  %v2689_v1 = vld [vmem:[#allocation7 + $0x58] sm:$0xff] }
 0x1fc   :  { %1580 = vst [vmem:[#allocation8 + $0xf58] sm:$0xff] %v1068_v41  ;;  %v1616_v40 = vmul.f32 %v2689_v1, %v3879_v14  ;;  %v2690_v41 = vld [vmem:[#allocation7 + $0x60] sm:$0xff] }
 0x1fd   :  { %1581 = vst [vmem:[#allocation8 + $0xf60] sm:$0xff] %v1069_v43  ;;  %v1617_v42 = vmul.f32 %v2690_v41, %v3879_v14  ;;  %v2691_v43 = vld [vmem:[#allocation7 + $0x68] sm:$0xff] }
 0x1fe   :  { %1582 = vst [vmem:[#allocation8 + $0xf68] sm:$0xff] %v1070_v45  ;;  %v1618_v44 = vmul.f32 %v2691_v43, %v3879_v14  ;;  %v2692_v45 = vld [vmem:[#allocation7 + $0x70] sm:$0xff] }
 0x1ff   :  { %1583 = vst [vmem:[#allocation8 + $0xf70] sm:$0xff] %v1071_v47  ;;  %v1619_v46 = vmul.f32 %v2692_v45, %v3879_v14  ;;  %v2693_v47 = vld [vmem:[#allocation7 + $0x78] sm:$0xff] }
 0x200   :  { %1584 = vst [vmem:[#allocation8 + $0xf78] sm:$0xff] %v1072_v49  ;;  %v1620_v48 = vmul.f32 %v2693_v47, %v3879_v14  ;;  %v2694_v49 = vld [vmem:[#allocation7 + $0x80] sm:$0xff] }
 0x201   :  { %1585 = vst [vmem:[#allocation8 + $0xf80] sm:$0xff] %v1073_v51  ;;  %v1621_v50 = vmul.f32 %v2694_v49, %v3879_v14  ;;  %v2695_v51 = vld [vmem:[#allocation7 + $0x88] sm:$0xff] }
 0x202   :  { %1586 = vst [vmem:[#allocation8 + $0xf88] sm:$0xff] %v1074_v53  ;;  %v1622_v52 = vmul.f32 %v2695_v51, %v3879_v14  ;;  %v2696_v53 = vld [vmem:[#allocation7 + $0x90] sm:$0xff] }
 0x203   :  { %1587 = vst [vmem:[#allocation8 + $0xf90] sm:$0xff] %v1075_v55  ;;  %v1623_v54 = vmul.f32 %v2696_v53, %v3879_v14  ;;  %v2697_v55 = vld [vmem:[#allocation7 + $0x98] sm:$0xff] }
 0x204   :  { %1588 = vst [vmem:[#allocation8 + $0xf98] sm:$0xff] %v1076_v57  ;;  %v1624_v56 = vmul.f32 %v2697_v55, %v3879_v14  ;;  %v2698_v57 = vld [vmem:[#allocation7 + $0xa0] sm:$0xff] }
 0x205   :  { %1589 = vst [vmem:[#allocation8 + $0xfa0] sm:$0xff] %v1077_v60  ;;  %v1625_v59 = vmul.f32 %v2698_v57, %v3879_v14  ;;  %v2699_v60 = vld [vmem:[#allocation7 + $0xa8] sm:$0xff] }
 0x206   :  { %1590 = vst [vmem:[#allocation8 + $0xfa8] sm:$0xff] %v1078_v62  ;;  %v1626_v61 = vmul.f32 %v2699_v60, %v3879_v14  ;;  %v2700_v62 = vld [vmem:[#allocation7 + $0xb0] sm:$0xff] }
 0x207   :  { %1591 = vst [vmem:[#allocation8 + $0xfb0] sm:$0xff] %v1079_v0  ;;  %v1627_v63 = vmul.f32 %v2700_v62, %v3879_v14  ;;  %v2701_v0 = vld [vmem:[#allocation7 + $0xb8] sm:$0xff] }
 0x208   :  { %1592 = vst [vmem:[#allocation8 + $0xfb8] sm:$0xff] %v1080_v3  ;;  %v1628_v2 = vmul.f32 %v2701_v0, %v3879_v14  ;;  %v2702_v3 = vld [vmem:[#allocation7 + $0xc0] sm:$0xff] }
 0x209   :  { %1593 = vst [vmem:[#allocation8 + $0xfc0] sm:$0xff] %v1081_v4  ;;  %v1629_v31 = vmul.f32 %v2702_v3, %v3879_v14  ;;  %v2703_v4 = vld [vmem:[#allocation7 + $0xc8] sm:$0xff] }
 0x20a   :  { %1594 = vst [vmem:[#allocation8 + $0xfc8] sm:$0xff] %v1082_v6  ;;  %v1630_v5 = vmul.f32 %v2703_v4, %v3879_v14  ;;  %v2704_v6 = vld [vmem:[#allocation7 + $0xd0] sm:$0xff] }
 0x20b   :  { %1595 = vst [vmem:[#allocation8 + $0xfd0] sm:$0xff] %v1083_v8  ;;  %v1631_v7 = vmul.f32 %v2704_v6, %v3879_v14  ;;  %v2705_v8 = vld [vmem:[#allocation7 + $0xd8] sm:$0xff] }
 0x20c   :  { %1596 = vst [vmem:[#allocation8 + $0xfd8] sm:$0xff] %v1084_v10  ;;  %v1632_v9 = vmul.f32 %v2705_v8, %v3879_v14  ;;  %v2706_v10 = vld [vmem:[#allocation7 + $0xe0] sm:$0xff] }
 0x20d   :  { %1597 = vst [vmem:[#allocation8 + $0xfe0] sm:$0xff] %v1085_v12  ;;  %v1633_v11 = vmul.f32 %v2706_v10, %v3879_v14  ;;  %v2707_v12 = vld [vmem:[#allocation7 + $0xe8] sm:$0xff] }
 0x20e   :  { %1598 = vst [vmem:[#allocation8 + $0xfe8] sm:$0xff] %v1086_v15  ;;  %v1634_v13 = vmul.f32 %v2707_v12, %v3879_v14  ;;  %v2708_v15 = vld [vmem:[#allocation7 + $0xf0] sm:$0xff] }
 0x20f   :  { %1599 = vst [vmem:[#allocation8 + $0xff0] sm:$0xff] %v1087_v16  ;;  %v1635_v16 = vmul.f32 %v2708_v15, %v3879_v14 }
 0x210   :  { %1600 = vst [vmem:[#allocation8 + $0xff8] sm:$0xff] %v1088_v17  ;;  %v2709_v17 = vld [vmem:[#allocation7 + $0xf8] sm:$0xff] }
 0x211   :  { %2117 = vst [vmem:[#allocation9] sm:$0xff] %v1605_v19  ;;  %v1636_v18 = vmul.f32 %v2709_v17, %v3879_v14  ;;  %v2710_v19 = vld [vmem:[#allocation7 + $0x100] sm:$0xff]  ;;  %2641 = dma.vmem_to_hbm [thread:$0]  %s2634_s2, 65536, %s2636_s7, [#allocation4], %s3323_s29, %s3323_s29, %s3324_s30  }
 0x212   :  { %2118 = vst [vmem:[#allocation9 + $0x8] sm:$0xff] %v1606_v21  ;;  %v1637_v20 = vmul.f32 %v2710_v19, %v3879_v14  ;;  %v2711_v21 = vld [vmem:[#allocation7 + $0x108] sm:$0xff] }
 0x213   :  { %2119 = vst [vmem:[#allocation9 + $0x10] sm:$0xff] %v1607_v23  ;;  %v1638_v22 = vmul.f32 %v2711_v21, %v3879_v14  ;;  %v2712_v23 = vld [vmem:[#allocation7 + $0x110] sm:$0xff] }
 0x214   :  { %2120 = vst [vmem:[#allocation9 + $0x18] sm:$0xff] %v1608_v25  ;;  %v1639_v24 = vmul.f32 %v2712_v23, %v3879_v14  ;;  %v2713_v25 = vld [vmem:[#allocation7 + $0x118] sm:$0xff] }
 0x215   :  { %2121 = vst [vmem:[#allocation9 + $0x20] sm:$0xff] %v1609_v58  ;;  %v1640_v26 = vmul.f32 %v2713_v25, %v3879_v14  ;;  %v2714_v58 = vld [vmem:[#allocation7 + $0x120] sm:$0xff] }
 0x216   :  { %2122 = vst [vmem:[#allocation9 + $0x28] sm:$0xff] %v1610_v28  ;;  %v1641_v27 = vmul.f32 %v2714_v58, %v3879_v14  ;;  %v2715_v28 = vld [vmem:[#allocation7 + $0x128] sm:$0xff] }
 0x217   :  { %2123 = vst [vmem:[#allocation9 + $0x30] sm:$0xff] %v1611_v30  ;;  %v1642_v29 = vmul.f32 %v2715_v28, %v3879_v14  ;;  %v2716_v30 = vld [vmem:[#allocation7 + $0x130] sm:$0xff] }
 0x218   :  { %2124 = vst [vmem:[#allocation9 + $0x38] sm:$0xff] %v1612_v33  ;;  %v1643_v32 = vmul.f32 %v2716_v30, %v3879_v14  ;;  %v2717_v33 = vld [vmem:[#allocation7 + $0x138] sm:$0xff] }
 0x219   :  { %2125 = vst [vmem:[#allocation9 + $0x40] sm:$0xff] %v1613_v35  ;;  %v1644_v34 = vmul.f32 %v2717_v33, %v3879_v14  ;;  %v2718_v35 = vld [vmem:[#allocation7 + $0x140] sm:$0xff] }
 0x21a   :  { %2126 = vst [vmem:[#allocation9 + $0x48] sm:$0xff] %v1614_v37  ;;  %v1645_v36 = vmul.f32 %v2718_v35, %v3879_v14  ;;  %v2719_v37 = vld [vmem:[#allocation7 + $0x148] sm:$0xff] }
 0x21b   :  { %2127 = vst [vmem:[#allocation9 + $0x50] sm:$0xff] %v1615_v39  ;;  %v1646_v38 = vmul.f32 %v2719_v37, %v3879_v14  ;;  %v2720_v39 = vld [vmem:[#allocation7 + $0x150] sm:$0xff] }
 0x21c   :  { %2128 = vst [vmem:[#allocation9 + $0x58] sm:$0xff] %v1616_v40  ;;  %v1647_v1 = vmul.f32 %v2720_v39, %v3879_v14  ;;  %v2721_v40 = vld [vmem:[#allocation7 + $0x158] sm:$0xff] }
 0x21d   :  { %2129 = vst [vmem:[#allocation9 + $0x60] sm:$0xff] %v1617_v42  ;;  %v1648_v41 = vmul.f32 %v2721_v40, %v3879_v14  ;;  %v2722_v42 = vld [vmem:[#allocation7 + $0x160] sm:$0xff] }
 0x21e   :  { %2130 = vst [vmem:[#allocation9 + $0x68] sm:$0xff] %v1618_v44  ;;  %v1649_v43 = vmul.f32 %v2722_v42, %v3879_v14  ;;  %v2723_v44 = vld [vmem:[#allocation7 + $0x168] sm:$0xff] }
 0x21f   :  { %2131 = vst [vmem:[#allocation9 + $0x70] sm:$0xff] %v1619_v46  ;;  %v1650_v45 = vmul.f32 %v2723_v44, %v3879_v14  ;;  %v2724_v46 = vld [vmem:[#allocation7 + $0x170] sm:$0xff] }
 0x220   :  { %2132 = vst [vmem:[#allocation9 + $0x78] sm:$0xff] %v1620_v48  ;;  %v1651_v47 = vmul.f32 %v2724_v46, %v3879_v14  ;;  %v2725_v48 = vld [vmem:[#allocation7 + $0x178] sm:$0xff] }
 0x221   :  { %2133 = vst [vmem:[#allocation9 + $0x80] sm:$0xff] %v1621_v50  ;;  %v1652_v49 = vmul.f32 %v2725_v48, %v3879_v14  ;;  %v2726_v50 = vld [vmem:[#allocation7 + $0x180] sm:$0xff] }
 0x222   :  { %2134 = vst [vmem:[#allocation9 + $0x88] sm:$0xff] %v1622_v52  ;;  %v1653_v51 = vmul.f32 %v2726_v50, %v3879_v14  ;;  %v2727_v52 = vld [vmem:[#allocation7 + $0x188] sm:$0xff] }
 0x223   :  { %2135 = vst [vmem:[#allocation9 + $0x90] sm:$0xff] %v1623_v54  ;;  %v1654_v53 = vmul.f32 %v2727_v52, %v3879_v14  ;;  %v2728_v54 = vld [vmem:[#allocation7 + $0x190] sm:$0xff] }
 0x224   :  { %2136 = vst [vmem:[#allocation9 + $0x98] sm:$0xff] %v1624_v56  ;;  %v1655_v55 = vmul.f32 %v2728_v54, %v3879_v14  ;;  %v2729_v56 = vld [vmem:[#allocation7 + $0x198] sm:$0xff] }
 0x225   :  { %2137 = vst [vmem:[#allocation9 + $0xa0] sm:$0xff] %v1625_v59  ;;  %v1656_v57 = vmul.f32 %v2729_v56, %v3879_v14  ;;  %v2730_v59 = vld [vmem:[#allocation7 + $0x1a0] sm:$0xff] }
 0x226   :  { %2138 = vst [vmem:[#allocation9 + $0xa8] sm:$0xff] %v1626_v61  ;;  %v1657_v60 = vmul.f32 %v2730_v59, %v3879_v14  ;;  %v2731_v61 = vld [vmem:[#allocation7 + $0x1a8] sm:$0xff] }
 0x227   :  { %2139 = vst [vmem:[#allocation9 + $0xb0] sm:$0xff] %v1627_v63  ;;  %v1658_v62 = vmul.f32 %v2731_v61, %v3879_v14  ;;  %v2732_v63 = vld [vmem:[#allocation7 + $0x1b0] sm:$0xff] }
 0x228   :  { %2140 = vst [vmem:[#allocation9 + $0xb8] sm:$0xff] %v1628_v2  ;;  %v1659_v0 = vmul.f32 %v2732_v63, %v3879_v14  ;;  %v2733_v2 = vld [vmem:[#allocation7 + $0x1b8] sm:$0xff] }
 0x229   :  { %2141 = vst [vmem:[#allocation9 + $0xc0] sm:$0xff] %v1629_v31  ;;  %v1660_v3 = vmul.f32 %v2733_v2, %v3879_v14  ;;  %v2734_v31 = vld [vmem:[#allocation7 + $0x1c0] sm:$0xff] }
 0x22a   :  { %2142 = vst [vmem:[#allocation9 + $0xc8] sm:$0xff] %v1630_v5  ;;  %v1661_v4 = vmul.f32 %v2734_v31, %v3879_v14  ;;  %v2735_v5 = vld [vmem:[#allocation7 + $0x1c8] sm:$0xff] }
 0x22b   :  { %2143 = vst [vmem:[#allocation9 + $0xd0] sm:$0xff] %v1631_v7  ;;  %v1662_v6 = vmul.f32 %v2735_v5, %v3879_v14  ;;  %v2736_v7 = vld [vmem:[#allocation7 + $0x1d0] sm:$0xff] }
 0x22c   :  { %2144 = vst [vmem:[#allocation9 + $0xd8] sm:$0xff] %v1632_v9  ;;  %v1663_v8 = vmul.f32 %v2736_v7, %v3879_v14  ;;  %v2737_v9 = vld [vmem:[#allocation7 + $0x1d8] sm:$0xff] }
 0x22d   :  { %2145 = vst [vmem:[#allocation9 + $0xe0] sm:$0xff] %v1633_v11  ;;  %v1664_v10 = vmul.f32 %v2737_v9, %v3879_v14  ;;  %v2738_v11 = vld [vmem:[#allocation7 + $0x1e0] sm:$0xff] }
 0x22e   :  { %2146 = vst [vmem:[#allocation9 + $0xe8] sm:$0xff] %v1634_v13  ;;  %v1665_v12 = vmul.f32 %v2738_v11, %v3879_v14  ;;  %v2739_v13 = vld [vmem:[#allocation7 + $0x1e8] sm:$0xff] }
 0x22f   :  { %2147 = vst [vmem:[#allocation9 + $0xf0] sm:$0xff] %v1635_v16  ;;  %v1666_v15 = vmul.f32 %v2739_v13, %v3879_v14  ;;  %v2740_v16 = vld [vmem:[#allocation7 + $0x1f0] sm:$0xff] }
 0x230   :  { %2148 = vst [vmem:[#allocation9 + $0xf8] sm:$0xff] %v1636_v18  ;;  %v1667_v17 = vmul.f32 %v2740_v16, %v3879_v14  ;;  %v2741_v18 = vld [vmem:[#allocation7 + $0x1f8] sm:$0xff] }
 0x231   :  { %2149 = vst [vmem:[#allocation9 + $0x100] sm:$0xff] %v1637_v20  ;;  %v1668_v19 = vmul.f32 %v2741_v18, %v3879_v14  ;;  %v2742_v20 = vld [vmem:[#allocation7 + $0x200] sm:$0xff] }
 0x232   :  { %2150 = vst [vmem:[#allocation9 + $0x108] sm:$0xff] %v1638_v22  ;;  %v1669_v21 = vmul.f32 %v2742_v20, %v3879_v14  ;;  %v2743_v22 = vld [vmem:[#allocation7 + $0x208] sm:$0xff] }
 0x233   :  { %2151 = vst [vmem:[#allocation9 + $0x110] sm:$0xff] %v1639_v24  ;;  %v1670_v23 = vmul.f32 %v2743_v22, %v3879_v14  ;;  %v2744_v24 = vld [vmem:[#allocation7 + $0x210] sm:$0xff] }
 0x234   :  { %2152 = vst [vmem:[#allocation9 + $0x118] sm:$0xff] %v1640_v26  ;;  %v1671_v25 = vmul.f32 %v2744_v24, %v3879_v14  ;;  %v2745_v26 = vld [vmem:[#allocation7 + $0x218] sm:$0xff] }
 0x235   :  { %2153 = vst [vmem:[#allocation9 + $0x120] sm:$0xff] %v1641_v27  ;;  %v1672_v58 = vmul.f32 %v2745_v26, %v3879_v14  ;;  %v2746_v27 = vld [vmem:[#allocation7 + $0x220] sm:$0xff] }
 0x236   :  { %2154 = vst [vmem:[#allocation9 + $0x128] sm:$0xff] %v1642_v29  ;;  %v1673_v28 = vmul.f32 %v2746_v27, %v3879_v14  ;;  %v2747_v29 = vld [vmem:[#allocation7 + $0x228] sm:$0xff] }
 0x237   :  { %2155 = vst [vmem:[#allocation9 + $0x130] sm:$0xff] %v1643_v32  ;;  %v1674_v30 = vmul.f32 %v2747_v29, %v3879_v14  ;;  %v2748_v32 = vld [vmem:[#allocation7 + $0x230] sm:$0xff] }
 0x238   :  { %2156 = vst [vmem:[#allocation9 + $0x138] sm:$0xff] %v1644_v34  ;;  %v1675_v33 = vmul.f32 %v2748_v32, %v3879_v14  ;;  %v2749_v34 = vld [vmem:[#allocation7 + $0x238] sm:$0xff] }
 0x239   :  { %2157 = vst [vmem:[#allocation9 + $0x140] sm:$0xff] %v1645_v36  ;;  %v1676_v35 = vmul.f32 %v2749_v34, %v3879_v14  ;;  %v2750_v36 = vld [vmem:[#allocation7 + $0x240] sm:$0xff] }
 0x23a   :  { %2158 = vst [vmem:[#allocation9 + $0x148] sm:$0xff] %v1646_v38  ;;  %v1677_v37 = vmul.f32 %v2750_v36, %v3879_v14  ;;  %v2751_v38 = vld [vmem:[#allocation7 + $0x248] sm:$0xff] }
 0x23b   :  { %2159 = vst [vmem:[#allocation9 + $0x150] sm:$0xff] %v1647_v1  ;;  %v1678_v39 = vmul.f32 %v2751_v38, %v3879_v14  ;;  %v2752_v1 = vld [vmem:[#allocation7 + $0x250] sm:$0xff] }
 0x23c   :  { %2160 = vst [vmem:[#allocation9 + $0x158] sm:$0xff] %v1648_v41  ;;  %v1679_v40 = vmul.f32 %v2752_v1, %v3879_v14  ;;  %v2753_v41 = vld [vmem:[#allocation7 + $0x258] sm:$0xff] }
 0x23d   :  { %2161 = vst [vmem:[#allocation9 + $0x160] sm:$0xff] %v1649_v43  ;;  %v1680_v42 = vmul.f32 %v2753_v41, %v3879_v14  ;;  %v2754_v43 = vld [vmem:[#allocation7 + $0x260] sm:$0xff] }
 0x23e   :  { %2162 = vst [vmem:[#allocation9 + $0x168] sm:$0xff] %v1650_v45  ;;  %v1681_v44 = vmul.f32 %v2754_v43, %v3879_v14  ;;  %v2755_v45 = vld [vmem:[#allocation7 + $0x268] sm:$0xff] }
 0x23f   :  { %2163 = vst [vmem:[#allocation9 + $0x170] sm:$0xff] %v1651_v47  ;;  %v1682_v46 = vmul.f32 %v2755_v45, %v3879_v14  ;;  %v2756_v47 = vld [vmem:[#allocation7 + $0x270] sm:$0xff] }
 0x240   :  { %2164 = vst [vmem:[#allocation9 + $0x178] sm:$0xff] %v1652_v49  ;;  %v1683_v48 = vmul.f32 %v2756_v47, %v3879_v14  ;;  %v2757_v49 = vld [vmem:[#allocation7 + $0x278] sm:$0xff] }
 0x241   :  { %2165 = vst [vmem:[#allocation9 + $0x180] sm:$0xff] %v1653_v51  ;;  %v1684_v50 = vmul.f32 %v2757_v49, %v3879_v14  ;;  %v2758_v51 = vld [vmem:[#allocation7 + $0x280] sm:$0xff] }
 0x242   :  { %2166 = vst [vmem:[#allocation9 + $0x188] sm:$0xff] %v1654_v53  ;;  %v1685_v52 = vmul.f32 %v2758_v51, %v3879_v14  ;;  %v2759_v53 = vld [vmem:[#allocation7 + $0x288] sm:$0xff] }
 0x243   :  { %2167 = vst [vmem:[#allocation9 + $0x190] sm:$0xff] %v1655_v55  ;;  %v1686_v54 = vmul.f32 %v2759_v53, %v3879_v14  ;;  %v2760_v55 = vld [vmem:[#allocation7 + $0x290] sm:$0xff] }
 0x244   :  { %2168 = vst [vmem:[#allocation9 + $0x198] sm:$0xff] %v1656_v57  ;;  %v1687_v56 = vmul.f32 %v2760_v55, %v3879_v14  ;;  %v2761_v57 = vld [vmem:[#allocation7 + $0x298] sm:$0xff] }
 0x245   :  { %2169 = vst [vmem:[#allocation9 + $0x1a0] sm:$0xff] %v1657_v60  ;;  %v1688_v59 = vmul.f32 %v2761_v57, %v3879_v14  ;;  %v2762_v60 = vld [vmem:[#allocation7 + $0x2a0] sm:$0xff] }
 0x246   :  { %2170 = vst [vmem:[#allocation9 + $0x1a8] sm:$0xff] %v1658_v62  ;;  %v1689_v61 = vmul.f32 %v2762_v60, %v3879_v14  ;;  %v2763_v62 = vld [vmem:[#allocation7 + $0x2a8] sm:$0xff] }
 0x247   :  { %2171 = vst [vmem:[#allocation9 + $0x1b0] sm:$0xff] %v1659_v0  ;;  %v1690_v63 = vmul.f32 %v2763_v62, %v3879_v14  ;;  %v2764_v0 = vld [vmem:[#allocation7 + $0x2b0] sm:$0xff] }
 0x248   :  { %2172 = vst [vmem:[#allocation9 + $0x1b8] sm:$0xff] %v1660_v3  ;;  %v1691_v2 = vmul.f32 %v2764_v0, %v3879_v14  ;;  %v2765_v3 = vld [vmem:[#allocation7 + $0x2b8] sm:$0xff] }
 0x249   :  { %2173 = vst [vmem:[#allocation9 + $0x1c0] sm:$0xff] %v1661_v4  ;;  %v1692_v31 = vmul.f32 %v2765_v3, %v3879_v14  ;;  %v2766_v4 = vld [vmem:[#allocation7 + $0x2c0] sm:$0xff] }
 0x24a   :  { %2174 = vst [vmem:[#allocation9 + $0x1c8] sm:$0xff] %v1662_v6  ;;  %v1693_v5 = vmul.f32 %v2766_v4, %v3879_v14  ;;  %v2767_v6 = vld [vmem:[#allocation7 + $0x2c8] sm:$0xff] }
 0x24b   :  { %2175 = vst [vmem:[#allocation9 + $0x1d0] sm:$0xff] %v1663_v8  ;;  %v1694_v7 = vmul.f32 %v2767_v6, %v3879_v14  ;;  %v2768_v8 = vld [vmem:[#allocation7 + $0x2d0] sm:$0xff] }
 0x24c   :  { %2176 = vst [vmem:[#allocation9 + $0x1d8] sm:$0xff] %v1664_v10  ;;  %v1695_v9 = vmul.f32 %v2768_v8, %v3879_v14  ;;  %v2769_v10 = vld [vmem:[#allocation7 + $0x2d8] sm:$0xff] }
 0x24d   :  { %2177 = vst [vmem:[#allocation9 + $0x1e0] sm:$0xff] %v1665_v12  ;;  %v1696_v11 = vmul.f32 %v2769_v10, %v3879_v14  ;;  %v2770_v12 = vld [vmem:[#allocation7 + $0x2e0] sm:$0xff] }
 0x24e   :  { %2178 = vst [vmem:[#allocation9 + $0x1e8] sm:$0xff] %v1666_v15  ;;  %v1697_v13 = vmul.f32 %v2770_v12, %v3879_v14  ;;  %v2771_v15 = vld [vmem:[#allocation7 + $0x2e8] sm:$0xff] }
 0x24f   :  { %2179 = vst [vmem:[#allocation9 + $0x1f0] sm:$0xff] %v1667_v17  ;;  %v1698_v16 = vmul.f32 %v2771_v15, %v3879_v14  ;;  %v2772_v17 = vld [vmem:[#allocation7 + $0x2f0] sm:$0xff] }
 0x250   :  { %2180 = vst [vmem:[#allocation9 + $0x1f8] sm:$0xff] %v1668_v19  ;;  %v1699_v18 = vmul.f32 %v2772_v17, %v3879_v14  ;;  %v2773_v19 = vld [vmem:[#allocation7 + $0x2f8] sm:$0xff] }
 0x251   :  { %2181 = vst [vmem:[#allocation9 + $0x200] sm:$0xff] %v1669_v21  ;;  %v1700_v20 = vmul.f32 %v2773_v19, %v3879_v14  ;;  %v2774_v21 = vld [vmem:[#allocation7 + $0x300] sm:$0xff] }
 0x252   :  { %2182 = vst [vmem:[#allocation9 + $0x208] sm:$0xff] %v1670_v23  ;;  %v1701_v22 = vmul.f32 %v2774_v21, %v3879_v14  ;;  %v2775_v23 = vld [vmem:[#allocation7 + $0x308] sm:$0xff] }
 0x253   :  { %2183 = vst [vmem:[#allocation9 + $0x210] sm:$0xff] %v1671_v25  ;;  %v1702_v24 = vmul.f32 %v2775_v23, %v3879_v14  ;;  %v2776_v25 = vld [vmem:[#allocation7 + $0x310] sm:$0xff] }
 0x254   :  { %2184 = vst [vmem:[#allocation9 + $0x218] sm:$0xff] %v1672_v58  ;;  %v1703_v26 = vmul.f32 %v2776_v25, %v3879_v14  ;;  %v2777_v58 = vld [vmem:[#allocation7 + $0x318] sm:$0xff] }
 0x255   :  { %2185 = vst [vmem:[#allocation9 + $0x220] sm:$0xff] %v1673_v28  ;;  %v1704_v27 = vmul.f32 %v2777_v58, %v3879_v14  ;;  %v2778_v28 = vld [vmem:[#allocation7 + $0x320] sm:$0xff] }
 0x256   :  { %2186 = vst [vmem:[#allocation9 + $0x228] sm:$0xff] %v1674_v30  ;;  %v1705_v29 = vmul.f32 %v2778_v28, %v3879_v14  ;;  %v2779_v30 = vld [vmem:[#allocation7 + $0x328] sm:$0xff] }
 0x257   :  { %2187 = vst [vmem:[#allocation9 + $0x230] sm:$0xff] %v1675_v33  ;;  %v1706_v32 = vmul.f32 %v2779_v30, %v3879_v14  ;;  %v2780_v33 = vld [vmem:[#allocation7 + $0x330] sm:$0xff] }
 0x258   :  { %2188 = vst [vmem:[#allocation9 + $0x238] sm:$0xff] %v1676_v35  ;;  %v1707_v34 = vmul.f32 %v2780_v33, %v3879_v14  ;;  %v2781_v35 = vld [vmem:[#allocation7 + $0x338] sm:$0xff] }
 0x259   :  { %2189 = vst [vmem:[#allocation9 + $0x240] sm:$0xff] %v1677_v37  ;;  %v1708_v36 = vmul.f32 %v2781_v35, %v3879_v14  ;;  %v2782_v37 = vld [vmem:[#allocation7 + $0x340] sm:$0xff] }
 0x25a   :  { %2190 = vst [vmem:[#allocation9 + $0x248] sm:$0xff] %v1678_v39  ;;  %v1709_v38 = vmul.f32 %v2782_v37, %v3879_v14  ;;  %v2783_v39 = vld [vmem:[#allocation7 + $0x348] sm:$0xff] }
 0x25b   :  { %2191 = vst [vmem:[#allocation9 + $0x250] sm:$0xff] %v1679_v40  ;;  %v1710_v1 = vmul.f32 %v2783_v39, %v3879_v14  ;;  %v2784_v40 = vld [vmem:[#allocation7 + $0x350] sm:$0xff] }
 0x25c   :  { %2192 = vst [vmem:[#allocation9 + $0x258] sm:$0xff] %v1680_v42  ;;  %v1711_v41 = vmul.f32 %v2784_v40, %v3879_v14  ;;  %v2785_v42 = vld [vmem:[#allocation7 + $0x358] sm:$0xff] }
 0x25d   :  { %2193 = vst [vmem:[#allocation9 + $0x260] sm:$0xff] %v1681_v44  ;;  %v1712_v43 = vmul.f32 %v2785_v42, %v3879_v14  ;;  %v2786_v44 = vld [vmem:[#allocation7 + $0x360] sm:$0xff] }
 0x25e   :  { %2194 = vst [vmem:[#allocation9 + $0x268] sm:$0xff] %v1682_v46  ;;  %v1713_v45 = vmul.f32 %v2786_v44, %v3879_v14  ;;  %v2787_v46 = vld [vmem:[#allocation7 + $0x368] sm:$0xff] }
 0x25f   :  { %2195 = vst [vmem:[#allocation9 + $0x270] sm:$0xff] %v1683_v48  ;;  %v1714_v47 = vmul.f32 %v2787_v46, %v3879_v14  ;;  %v2788_v48 = vld [vmem:[#allocation7 + $0x370] sm:$0xff] }
 0x260   :  { %2196 = vst [vmem:[#allocation9 + $0x278] sm:$0xff] %v1684_v50  ;;  %v1715_v49 = vmul.f32 %v2788_v48, %v3879_v14  ;;  %v2789_v50 = vld [vmem:[#allocation7 + $0x378] sm:$0xff] }
 0x261   :  { %2197 = vst [vmem:[#allocation9 + $0x280] sm:$0xff] %v1685_v52  ;;  %v1716_v51 = vmul.f32 %v2789_v50, %v3879_v14  ;;  %v2790_v52 = vld [vmem:[#allocation7 + $0x380] sm:$0xff] }
 0x262   :  { %2198 = vst [vmem:[#allocation9 + $0x288] sm:$0xff] %v1686_v54  ;;  %v1717_v53 = vmul.f32 %v2790_v52, %v3879_v14  ;;  %v2791_v54 = vld [vmem:[#allocation7 + $0x388] sm:$0xff] }
 0x263   :  { %2199 = vst [vmem:[#allocation9 + $0x290] sm:$0xff] %v1687_v56  ;;  %v1718_v55 = vmul.f32 %v2791_v54, %v3879_v14  ;;  %v2792_v56 = vld [vmem:[#allocation7 + $0x390] sm:$0xff] }
 0x264   :  { %2200 = vst [vmem:[#allocation9 + $0x298] sm:$0xff] %v1688_v59  ;;  %v1719_v57 = vmul.f32 %v2792_v56, %v3879_v14  ;;  %v2793_v59 = vld [vmem:[#allocation7 + $0x398] sm:$0xff] }
 0x265   :  { %2201 = vst [vmem:[#allocation9 + $0x2a0] sm:$0xff] %v1689_v61  ;;  %v1720_v60 = vmul.f32 %v2793_v59, %v3879_v14  ;;  %v2794_v61 = vld [vmem:[#allocation7 + $0x3a0] sm:$0xff] }
 0x266   :  { %2202 = vst [vmem:[#allocation9 + $0x2a8] sm:$0xff] %v1690_v63  ;;  %v1721_v62 = vmul.f32 %v2794_v61, %v3879_v14  ;;  %v2795_v63 = vld [vmem:[#allocation7 + $0x3a8] sm:$0xff] }
 0x267   :  { %2203 = vst [vmem:[#allocation9 + $0x2b0] sm:$0xff] %v1691_v2  ;;  %v1722_v0 = vmul.f32 %v2795_v63, %v3879_v14  ;;  %v2796_v2 = vld [vmem:[#allocation7 + $0x3b0] sm:$0xff] }
 0x268   :  { %2204 = vst [vmem:[#allocation9 + $0x2b8] sm:$0xff] %v1692_v31  ;;  %v1723_v3 = vmul.f32 %v2796_v2, %v3879_v14  ;;  %v2797_v31 = vld [vmem:[#allocation7 + $0x3b8] sm:$0xff] }
 0x269   :  { %2205 = vst [vmem:[#allocation9 + $0x2c0] sm:$0xff] %v1693_v5  ;;  %v1724_v4 = vmul.f32 %v2797_v31, %v3879_v14  ;;  %v2798_v5 = vld [vmem:[#allocation7 + $0x3c0] sm:$0xff] }
 0x26a   :  { %2206 = vst [vmem:[#allocation9 + $0x2c8] sm:$0xff] %v1694_v7  ;;  %v1725_v6 = vmul.f32 %v2798_v5, %v3879_v14  ;;  %v2799_v7 = vld [vmem:[#allocation7 + $0x3c8] sm:$0xff] }
 0x26b   :  { %2207 = vst [vmem:[#allocation9 + $0x2d0] sm:$0xff] %v1695_v9  ;;  %v1726_v8 = vmul.f32 %v2799_v7, %v3879_v14  ;;  %v2800_v9 = vld [vmem:[#allocation7 + $0x3d0] sm:$0xff] }
 0x26c   :  { %2208 = vst [vmem:[#allocation9 + $0x2d8] sm:$0xff] %v1696_v11  ;;  %v1727_v10 = vmul.f32 %v2800_v9, %v3879_v14  ;;  %v2801_v11 = vld [vmem:[#allocation7 + $0x3d8] sm:$0xff] }
 0x26d   :  { %2209 = vst [vmem:[#allocation9 + $0x2e0] sm:$0xff] %v1697_v13  ;;  %v1728_v12 = vmul.f32 %v2801_v11, %v3879_v14  ;;  %v2802_v13 = vld [vmem:[#allocation7 + $0x3e0] sm:$0xff] }
 0x26e   :  { %2210 = vst [vmem:[#allocation9 + $0x2e8] sm:$0xff] %v1698_v16  ;;  %v1729_v15 = vmul.f32 %v2802_v13, %v3879_v14  ;;  %v2803_v16 = vld [vmem:[#allocation7 + $0x3e8] sm:$0xff] }
 0x26f   :  { %2211 = vst [vmem:[#allocation9 + $0x2f0] sm:$0xff] %v1699_v18  ;;  %v1730_v17 = vmul.f32 %v2803_v16, %v3879_v14  ;;  %v2804_v18 = vld [vmem:[#allocation7 + $0x3f0] sm:$0xff] }
 0x270   :  { %2212 = vst [vmem:[#allocation9 + $0x2f8] sm:$0xff] %v1700_v20  ;;  %v1731_v19 = vmul.f32 %v2804_v18, %v3879_v14  ;;  %v2805_v20 = vld [vmem:[#allocation7 + $0x3f8] sm:$0xff] }
 0x271   :  { %2213 = vst [vmem:[#allocation9 + $0x300] sm:$0xff] %v1701_v22  ;;  %v1732_v21 = vmul.f32 %v2805_v20, %v3879_v14  ;;  %v2806_v22 = vld [vmem:[#allocation7 + $0x400] sm:$0xff] }
 0x272   :  { %2214 = vst [vmem:[#allocation9 + $0x308] sm:$0xff] %v1702_v24  ;;  %v1733_v23 = vmul.f32 %v2806_v22, %v3879_v14  ;;  %v2807_v24 = vld [vmem:[#allocation7 + $0x408] sm:$0xff] }
 0x273   :  { %2215 = vst [vmem:[#allocation9 + $0x310] sm:$0xff] %v1703_v26  ;;  %v1734_v25 = vmul.f32 %v2807_v24, %v3879_v14  ;;  %v2808_v26 = vld [vmem:[#allocation7 + $0x410] sm:$0xff] }
 0x274   :  { %2216 = vst [vmem:[#allocation9 + $0x318] sm:$0xff] %v1704_v27  ;;  %v1735_v58 = vmul.f32 %v2808_v26, %v3879_v14  ;;  %v2809_v27 = vld [vmem:[#allocation7 + $0x418] sm:$0xff] }
 0x275   :  { %2217 = vst [vmem:[#allocation9 + $0x320] sm:$0xff] %v1705_v29  ;;  %v1736_v28 = vmul.f32 %v2809_v27, %v3879_v14  ;;  %v2810_v29 = vld [vmem:[#allocation7 + $0x420] sm:$0xff] }
 0x276   :  { %2218 = vst [vmem:[#allocation9 + $0x328] sm:$0xff] %v1706_v32  ;;  %v1737_v30 = vmul.f32 %v2810_v29, %v3879_v14  ;;  %v2811_v32 = vld [vmem:[#allocation7 + $0x428] sm:$0xff] }
 0x277   :  { %2219 = vst [vmem:[#allocation9 + $0x330] sm:$0xff] %v1707_v34  ;;  %v1738_v33 = vmul.f32 %v2811_v32, %v3879_v14  ;;  %v2812_v34 = vld [vmem:[#allocation7 + $0x430] sm:$0xff] }
 0x278   :  { %2220 = vst [vmem:[#allocation9 + $0x338] sm:$0xff] %v1708_v36  ;;  %v1739_v35 = vmul.f32 %v2812_v34, %v3879_v14  ;;  %v2813_v36 = vld [vmem:[#allocation7 + $0x438] sm:$0xff] }
 0x279   :  { %2221 = vst [vmem:[#allocation9 + $0x340] sm:$0xff] %v1709_v38  ;;  %v1740_v37 = vmul.f32 %v2813_v36, %v3879_v14  ;;  %v2814_v38 = vld [vmem:[#allocation7 + $0x440] sm:$0xff] }
 0x27a   :  { %2222 = vst [vmem:[#allocation9 + $0x348] sm:$0xff] %v1710_v1  ;;  %v1741_v39 = vmul.f32 %v2814_v38, %v3879_v14  ;;  %v2815_v1 = vld [vmem:[#allocation7 + $0x448] sm:$0xff] }
 0x27b   :  { %2223 = vst [vmem:[#allocation9 + $0x350] sm:$0xff] %v1711_v41  ;;  %v1742_v40 = vmul.f32 %v2815_v1, %v3879_v14  ;;  %v2816_v41 = vld [vmem:[#allocation7 + $0x450] sm:$0xff] }
 0x27c   :  { %2224 = vst [vmem:[#allocation9 + $0x358] sm:$0xff] %v1712_v43  ;;  %v1743_v42 = vmul.f32 %v2816_v41, %v3879_v14  ;;  %v2817_v43 = vld [vmem:[#allocation7 + $0x458] sm:$0xff] }
 0x27d   :  { %2225 = vst [vmem:[#allocation9 + $0x360] sm:$0xff] %v1713_v45  ;;  %v1744_v44 = vmul.f32 %v2817_v43, %v3879_v14  ;;  %v2818_v45 = vld [vmem:[#allocation7 + $0x460] sm:$0xff] }
 0x27e   :  { %2226 = vst [vmem:[#allocation9 + $0x368] sm:$0xff] %v1714_v47  ;;  %v1745_v46 = vmul.f32 %v2818_v45, %v3879_v14  ;;  %v2819_v47 = vld [vmem:[#allocation7 + $0x468] sm:$0xff] }
 0x27f   :  { %2227 = vst [vmem:[#allocation9 + $0x370] sm:$0xff] %v1715_v49  ;;  %v1746_v48 = vmul.f32 %v2819_v47, %v3879_v14  ;;  %v2820_v49 = vld [vmem:[#allocation7 + $0x470] sm:$0xff] }
 0x280   :  { %2228 = vst [vmem:[#allocation9 + $0x378] sm:$0xff] %v1716_v51  ;;  %v1747_v50 = vmul.f32 %v2820_v49, %v3879_v14  ;;  %v2821_v51 = vld [vmem:[#allocation7 + $0x478] sm:$0xff] }
 0x281   :  { %2229 = vst [vmem:[#allocation9 + $0x380] sm:$0xff] %v1717_v53  ;;  %v1748_v52 = vmul.f32 %v2821_v51, %v3879_v14  ;;  %v2822_v53 = vld [vmem:[#allocation7 + $0x480] sm:$0xff] }
 0x282   :  { %2230 = vst [vmem:[#allocation9 + $0x388] sm:$0xff] %v1718_v55  ;;  %v1749_v54 = vmul.f32 %v2822_v53, %v3879_v14  ;;  %v2823_v55 = vld [vmem:[#allocation7 + $0x488] sm:$0xff] }
 0x283   :  { %2231 = vst [vmem:[#allocation9 + $0x390] sm:$0xff] %v1719_v57  ;;  %v1750_v56 = vmul.f32 %v2823_v55, %v3879_v14  ;;  %v2824_v57 = vld [vmem:[#allocation7 + $0x490] sm:$0xff] }
 0x284   :  { %2232 = vst [vmem:[#allocation9 + $0x398] sm:$0xff] %v1720_v60  ;;  %v1751_v59 = vmul.f32 %v2824_v57, %v3879_v14  ;;  %v2825_v60 = vld [vmem:[#allocation7 + $0x498] sm:$0xff] }
 0x285   :  { %2233 = vst [vmem:[#allocation9 + $0x3a0] sm:$0xff] %v1721_v62  ;;  %v1752_v61 = vmul.f32 %v2825_v60, %v3879_v14  ;;  %v2826_v62 = vld [vmem:[#allocation7 + $0x4a0] sm:$0xff] }
 0x286   :  { %2234 = vst [vmem:[#allocation9 + $0x3a8] sm:$0xff] %v1722_v0  ;;  %v1753_v63 = vmul.f32 %v2826_v62, %v3879_v14  ;;  %v2827_v0 = vld [vmem:[#allocation7 + $0x4a8] sm:$0xff] }
 0x287   :  { %2235 = vst [vmem:[#allocation9 + $0x3b0] sm:$0xff] %v1723_v3  ;;  %v1754_v2 = vmul.f32 %v2827_v0, %v3879_v14  ;;  %v2828_v3 = vld [vmem:[#allocation7 + $0x4b0] sm:$0xff] }
 0x288   :  { %2236 = vst [vmem:[#allocation9 + $0x3b8] sm:$0xff] %v1724_v4  ;;  %v1755_v31 = vmul.f32 %v2828_v3, %v3879_v14  ;;  %v2829_v4 = vld [vmem:[#allocation7 + $0x4b8] sm:$0xff] }
 0x289   :  { %2237 = vst [vmem:[#allocation9 + $0x3c0] sm:$0xff] %v1725_v6  ;;  %v1756_v5 = vmul.f32 %v2829_v4, %v3879_v14  ;;  %v2830_v6 = vld [vmem:[#allocation7 + $0x4c0] sm:$0xff] }
 0x28a   :  { %2238 = vst [vmem:[#allocation9 + $0x3c8] sm:$0xff] %v1726_v8  ;;  %v1757_v7 = vmul.f32 %v2830_v6, %v3879_v14  ;;  %v2831_v8 = vld [vmem:[#allocation7 + $0x4c8] sm:$0xff] }
 0x28b   :  { %2239 = vst [vmem:[#allocation9 + $0x3d0] sm:$0xff] %v1727_v10  ;;  %v1758_v9 = vmul.f32 %v2831_v8, %v3879_v14  ;;  %v2832_v10 = vld [vmem:[#allocation7 + $0x4d0] sm:$0xff] }
 0x28c   :  { %2240 = vst [vmem:[#allocation9 + $0x3d8] sm:$0xff] %v1728_v12  ;;  %v1759_v11 = vmul.f32 %v2832_v10, %v3879_v14  ;;  %v2833_v12 = vld [vmem:[#allocation7 + $0x4d8] sm:$0xff] }
 0x28d   :  { %2241 = vst [vmem:[#allocation9 + $0x3e0] sm:$0xff] %v1729_v15  ;;  %v1760_v13 = vmul.f32 %v2833_v12, %v3879_v14  ;;  %v2834_v15 = vld [vmem:[#allocation7 + $0x4e0] sm:$0xff] }
 0x28e   :  { %2242 = vst [vmem:[#allocation9 + $0x3e8] sm:$0xff] %v1730_v17  ;;  %v1761_v16 = vmul.f32 %v2834_v15, %v3879_v14  ;;  %v2835_v17 = vld [vmem:[#allocation7 + $0x4e8] sm:$0xff] }
 0x28f   :  { %2243 = vst [vmem:[#allocation9 + $0x3f0] sm:$0xff] %v1731_v19  ;;  %v1762_v18 = vmul.f32 %v2835_v17, %v3879_v14  ;;  %v2836_v19 = vld [vmem:[#allocation7 + $0x4f0] sm:$0xff] }
 0x290   :  { %2244 = vst [vmem:[#allocation9 + $0x3f8] sm:$0xff] %v1732_v21  ;;  %v1763_v20 = vmul.f32 %v2836_v19, %v3879_v14  ;;  %v2837_v21 = vld [vmem:[#allocation7 + $0x4f8] sm:$0xff] }
 0x291   :  { %2245 = vst [vmem:[#allocation9 + $0x400] sm:$0xff] %v1733_v23  ;;  %v1764_v22 = vmul.f32 %v2837_v21, %v3879_v14  ;;  %v2838_v23 = vld [vmem:[#allocation7 + $0x500] sm:$0xff] }
 0x292   :  { %2246 = vst [vmem:[#allocation9 + $0x408] sm:$0xff] %v1734_v25  ;;  %v1765_v24 = vmul.f32 %v2838_v23, %v3879_v14  ;;  %v2839_v25 = vld [vmem:[#allocation7 + $0x508] sm:$0xff] }
 0x293   :  { %2247 = vst [vmem:[#allocation9 + $0x410] sm:$0xff] %v1735_v58  ;;  %v1766_v26 = vmul.f32 %v2839_v25, %v3879_v14  ;;  %v2840_v58 = vld [vmem:[#allocation7 + $0x510] sm:$0xff] }
 0x294   :  { %2248 = vst [vmem:[#allocation9 + $0x418] sm:$0xff] %v1736_v28  ;;  %v1767_v27 = vmul.f32 %v2840_v58, %v3879_v14  ;;  %v2841_v28 = vld [vmem:[#allocation7 + $0x518] sm:$0xff] }
 0x295   :  { %2249 = vst [vmem:[#allocation9 + $0x420] sm:$0xff] %v1737_v30  ;;  %v1768_v29 = vmul.f32 %v2841_v28, %v3879_v14  ;;  %v2842_v30 = vld [vmem:[#allocation7 + $0x520] sm:$0xff] }
 0x296   :  { %2250 = vst [vmem:[#allocation9 + $0x428] sm:$0xff] %v1738_v33  ;;  %v1769_v32 = vmul.f32 %v2842_v30, %v3879_v14  ;;  %v2843_v33 = vld [vmem:[#allocation7 + $0x528] sm:$0xff] }
 0x297   :  { %2251 = vst [vmem:[#allocation9 + $0x430] sm:$0xff] %v1739_v35  ;;  %v1770_v34 = vmul.f32 %v2843_v33, %v3879_v14  ;;  %v2844_v35 = vld [vmem:[#allocation7 + $0x530] sm:$0xff] }
 0x298   :  { %2252 = vst [vmem:[#allocation9 + $0x438] sm:$0xff] %v1740_v37  ;;  %v1771_v36 = vmul.f32 %v2844_v35, %v3879_v14  ;;  %v2845_v37 = vld [vmem:[#allocation7 + $0x538] sm:$0xff] }
 0x299   :  { %2253 = vst [vmem:[#allocation9 + $0x440] sm:$0xff] %v1741_v39  ;;  %v1772_v38 = vmul.f32 %v2845_v37, %v3879_v14  ;;  %v2846_v39 = vld [vmem:[#allocation7 + $0x540] sm:$0xff] }
 0x29a   :  { %2254 = vst [vmem:[#allocation9 + $0x448] sm:$0xff] %v1742_v40  ;;  %v1773_v1 = vmul.f32 %v2846_v39, %v3879_v14  ;;  %v2847_v40 = vld [vmem:[#allocation7 + $0x548] sm:$0xff] }
 0x29b   :  { %2255 = vst [vmem:[#allocation9 + $0x450] sm:$0xff] %v1743_v42  ;;  %v1774_v41 = vmul.f32 %v2847_v40, %v3879_v14  ;;  %v2848_v42 = vld [vmem:[#allocation7 + $0x550] sm:$0xff] }
 0x29c   :  { %2256 = vst [vmem:[#allocation9 + $0x458] sm:$0xff] %v1744_v44  ;;  %v1775_v43 = vmul.f32 %v2848_v42, %v3879_v14  ;;  %v2849_v44 = vld [vmem:[#allocation7 + $0x558] sm:$0xff] }
 0x29d   :  { %2257 = vst [vmem:[#allocation9 + $0x460] sm:$0xff] %v1745_v46  ;;  %v1776_v45 = vmul.f32 %v2849_v44, %v3879_v14  ;;  %v2850_v46 = vld [vmem:[#allocation7 + $0x560] sm:$0xff] }
 0x29e   :  { %2258 = vst [vmem:[#allocation9 + $0x468] sm:$0xff] %v1746_v48  ;;  %v1777_v47 = vmul.f32 %v2850_v46, %v3879_v14  ;;  %v2851_v48 = vld [vmem:[#allocation7 + $0x568] sm:$0xff] }
 0x29f   :  { %2259 = vst [vmem:[#allocation9 + $0x470] sm:$0xff] %v1747_v50  ;;  %v1778_v49 = vmul.f32 %v2851_v48, %v3879_v14  ;;  %v2852_v50 = vld [vmem:[#allocation7 + $0x570] sm:$0xff] }
 0x2a0   :  { %2260 = vst [vmem:[#allocation9 + $0x478] sm:$0xff] %v1748_v52  ;;  %v1779_v51 = vmul.f32 %v2852_v50, %v3879_v14  ;;  %v2853_v52 = vld [vmem:[#allocation7 + $0x578] sm:$0xff] }
 0x2a1   :  { %2261 = vst [vmem:[#allocation9 + $0x480] sm:$0xff] %v1749_v54  ;;  %v1780_v53 = vmul.f32 %v2853_v52, %v3879_v14  ;;  %v2854_v54 = vld [vmem:[#allocation7 + $0x580] sm:$0xff] }
 0x2a2   :  { %2262 = vst [vmem:[#allocation9 + $0x488] sm:$0xff] %v1750_v56  ;;  %v1781_v55 = vmul.f32 %v2854_v54, %v3879_v14  ;;  %v2855_v56 = vld [vmem:[#allocation7 + $0x588] sm:$0xff] }
 0x2a3   :  { %2263 = vst [vmem:[#allocation9 + $0x490] sm:$0xff] %v1751_v59  ;;  %v1782_v57 = vmul.f32 %v2855_v56, %v3879_v14  ;;  %v2856_v59 = vld [vmem:[#allocation7 + $0x590] sm:$0xff] }
 0x2a4   :  { %2264 = vst [vmem:[#allocation9 + $0x498] sm:$0xff] %v1752_v61  ;;  %v1783_v60 = vmul.f32 %v2856_v59, %v3879_v14  ;;  %v2857_v61 = vld [vmem:[#allocation7 + $0x598] sm:$0xff] }
 0x2a5   :  { %2265 = vst [vmem:[#allocation9 + $0x4a0] sm:$0xff] %v1753_v63  ;;  %v1784_v62 = vmul.f32 %v2857_v61, %v3879_v14  ;;  %v2858_v63 = vld [vmem:[#allocation7 + $0x5a0] sm:$0xff] }
 0x2a6   :  { %2266 = vst [vmem:[#allocation9 + $0x4a8] sm:$0xff] %v1754_v2  ;;  %v1785_v0 = vmul.f32 %v2858_v63, %v3879_v14  ;;  %v2859_v2 = vld [vmem:[#allocation7 + $0x5a8] sm:$0xff] }
 0x2a7   :  { %2267 = vst [vmem:[#allocation9 + $0x4b0] sm:$0xff] %v1755_v31  ;;  %v1786_v3 = vmul.f32 %v2859_v2, %v3879_v14  ;;  %v2860_v31 = vld [vmem:[#allocation7 + $0x5b0] sm:$0xff] }
 0x2a8   :  { %2268 = vst [vmem:[#allocation9 + $0x4b8] sm:$0xff] %v1756_v5  ;;  %v1787_v4 = vmul.f32 %v2860_v31, %v3879_v14  ;;  %v2861_v5 = vld [vmem:[#allocation7 + $0x5b8] sm:$0xff] }
 0x2a9   :  { %2269 = vst [vmem:[#allocation9 + $0x4c0] sm:$0xff] %v1757_v7  ;;  %v1788_v6 = vmul.f32 %v2861_v5, %v3879_v14  ;;  %v2862_v7 = vld [vmem:[#allocation7 + $0x5c0] sm:$0xff] }
 0x2aa   :  { %2270 = vst [vmem:[#allocation9 + $0x4c8] sm:$0xff] %v1758_v9  ;;  %v1789_v8 = vmul.f32 %v2862_v7, %v3879_v14  ;;  %v2863_v9 = vld [vmem:[#allocation7 + $0x5c8] sm:$0xff] }
 0x2ab   :  { %2271 = vst [vmem:[#allocation9 + $0x4d0] sm:$0xff] %v1759_v11  ;;  %v1790_v10 = vmul.f32 %v2863_v9, %v3879_v14  ;;  %v2864_v11 = vld [vmem:[#allocation7 + $0x5d0] sm:$0xff] }
 0x2ac   :  { %2272 = vst [vmem:[#allocation9 + $0x4d8] sm:$0xff] %v1760_v13  ;;  %v1791_v12 = vmul.f32 %v2864_v11, %v3879_v14  ;;  %v2865_v13 = vld [vmem:[#allocation7 + $0x5d8] sm:$0xff] }
 0x2ad   :  { %2273 = vst [vmem:[#allocation9 + $0x4e0] sm:$0xff] %v1761_v16  ;;  %v1792_v15 = vmul.f32 %v2865_v13, %v3879_v14  ;;  %v2866_v16 = vld [vmem:[#allocation7 + $0x5e0] sm:$0xff] }
 0x2ae   :  { %2274 = vst [vmem:[#allocation9 + $0x4e8] sm:$0xff] %v1762_v18  ;;  %v1793_v17 = vmul.f32 %v2866_v16, %v3879_v14  ;;  %v2867_v18 = vld [vmem:[#allocation7 + $0x5e8] sm:$0xff] }
 0x2af   :  { %2275 = vst [vmem:[#allocation9 + $0x4f0] sm:$0xff] %v1763_v20  ;;  %v1794_v19 = vmul.f32 %v2867_v18, %v3879_v14  ;;  %v2868_v20 = vld [vmem:[#allocation7 + $0x5f0] sm:$0xff] }
 0x2b0   :  { %2276 = vst [vmem:[#allocation9 + $0x4f8] sm:$0xff] %v1764_v22  ;;  %v1795_v21 = vmul.f32 %v2868_v20, %v3879_v14  ;;  %v2869_v22 = vld [vmem:[#allocation7 + $0x5f8] sm:$0xff] }
 0x2b1   :  { %2277 = vst [vmem:[#allocation9 + $0x500] sm:$0xff] %v1765_v24  ;;  %v1796_v23 = vmul.f32 %v2869_v22, %v3879_v14  ;;  %v2870_v24 = vld [vmem:[#allocation7 + $0x600] sm:$0xff] }
 0x2b2   :  { %2278 = vst [vmem:[#allocation9 + $0x508] sm:$0xff] %v1766_v26  ;;  %v1797_v25 = vmul.f32 %v2870_v24, %v3879_v14  ;;  %v2871_v26 = vld [vmem:[#allocation7 + $0x608] sm:$0xff] }
 0x2b3   :  { %2279 = vst [vmem:[#allocation9 + $0x510] sm:$0xff] %v1767_v27  ;;  %v1798_v58 = vmul.f32 %v2871_v26, %v3879_v14  ;;  %v2872_v27 = vld [vmem:[#allocation7 + $0x610] sm:$0xff] }
 0x2b4   :  { %2280 = vst [vmem:[#allocation9 + $0x518] sm:$0xff] %v1768_v29  ;;  %v1799_v28 = vmul.f32 %v2872_v27, %v3879_v14  ;;  %v2873_v29 = vld [vmem:[#allocation7 + $0x618] sm:$0xff] }
 0x2b5   :  { %2281 = vst [vmem:[#allocation9 + $0x520] sm:$0xff] %v1769_v32  ;;  %v1800_v30 = vmul.f32 %v2873_v29, %v3879_v14  ;;  %v2874_v32 = vld [vmem:[#allocation7 + $0x620] sm:$0xff] }
 0x2b6   :  { %2282 = vst [vmem:[#allocation9 + $0x528] sm:$0xff] %v1770_v34  ;;  %v1801_v33 = vmul.f32 %v2874_v32, %v3879_v14  ;;  %v2875_v34 = vld [vmem:[#allocation7 + $0x628] sm:$0xff] }
 0x2b7   :  { %2283 = vst [vmem:[#allocation9 + $0x530] sm:$0xff] %v1771_v36  ;;  %v1802_v35 = vmul.f32 %v2875_v34, %v3879_v14  ;;  %v2876_v36 = vld [vmem:[#allocation7 + $0x630] sm:$0xff] }
 0x2b8   :  { %2284 = vst [vmem:[#allocation9 + $0x538] sm:$0xff] %v1772_v38  ;;  %v1803_v37 = vmul.f32 %v2876_v36, %v3879_v14  ;;  %v2877_v38 = vld [vmem:[#allocation7 + $0x638] sm:$0xff] }
 0x2b9   :  { %2285 = vst [vmem:[#allocation9 + $0x540] sm:$0xff] %v1773_v1  ;;  %v1804_v39 = vmul.f32 %v2877_v38, %v3879_v14  ;;  %v2878_v1 = vld [vmem:[#allocation7 + $0x640] sm:$0xff] }
 0x2ba   :  { %2286 = vst [vmem:[#allocation9 + $0x548] sm:$0xff] %v1774_v41  ;;  %v1805_v40 = vmul.f32 %v2878_v1, %v3879_v14  ;;  %v2879_v41 = vld [vmem:[#allocation7 + $0x648] sm:$0xff] }
 0x2bb   :  { %2287 = vst [vmem:[#allocation9 + $0x550] sm:$0xff] %v1775_v43  ;;  %v1806_v42 = vmul.f32 %v2879_v41, %v3879_v14  ;;  %v2880_v43 = vld [vmem:[#allocation7 + $0x650] sm:$0xff] }
 0x2bc   :  { %2288 = vst [vmem:[#allocation9 + $0x558] sm:$0xff] %v1776_v45  ;;  %v1807_v44 = vmul.f32 %v2880_v43, %v3879_v14  ;;  %v2881_v45 = vld [vmem:[#allocation7 + $0x658] sm:$0xff] }
 0x2bd   :  { %2289 = vst [vmem:[#allocation9 + $0x560] sm:$0xff] %v1777_v47  ;;  %v1808_v46 = vmul.f32 %v2881_v45, %v3879_v14  ;;  %v2882_v47 = vld [vmem:[#allocation7 + $0x660] sm:$0xff] }
 0x2be   :  { %2290 = vst [vmem:[#allocation9 + $0x568] sm:$0xff] %v1778_v49  ;;  %v1809_v48 = vmul.f32 %v2882_v47, %v3879_v14  ;;  %v2883_v49 = vld [vmem:[#allocation7 + $0x668] sm:$0xff] }
 0x2bf   :  { %2291 = vst [vmem:[#allocation9 + $0x570] sm:$0xff] %v1779_v51  ;;  %v1810_v50 = vmul.f32 %v2883_v49, %v3879_v14  ;;  %v2884_v51 = vld [vmem:[#allocation7 + $0x670] sm:$0xff] }
 0x2c0   :  { %2292 = vst [vmem:[#allocation9 + $0x578] sm:$0xff] %v1780_v53  ;;  %v1811_v52 = vmul.f32 %v2884_v51, %v3879_v14  ;;  %v2885_v53 = vld [vmem:[#allocation7 + $0x678] sm:$0xff] }
 0x2c1   :  { %2293 = vst [vmem:[#allocation9 + $0x580] sm:$0xff] %v1781_v55  ;;  %v1812_v54 = vmul.f32 %v2885_v53, %v3879_v14  ;;  %v2886_v55 = vld [vmem:[#allocation7 + $0x680] sm:$0xff] }
 0x2c2   :  { %2294 = vst [vmem:[#allocation9 + $0x588] sm:$0xff] %v1782_v57  ;;  %v1813_v56 = vmul.f32 %v2886_v55, %v3879_v14  ;;  %v2887_v57 = vld [vmem:[#allocation7 + $0x688] sm:$0xff] }
 0x2c3   :  { %2295 = vst [vmem:[#allocation9 + $0x590] sm:$0xff] %v1783_v60  ;;  %v1814_v59 = vmul.f32 %v2887_v57, %v3879_v14  ;;  %v2888_v60 = vld [vmem:[#allocation7 + $0x690] sm:$0xff] }
 0x2c4   :  { %2296 = vst [vmem:[#allocation9 + $0x598] sm:$0xff] %v1784_v62  ;;  %v1815_v61 = vmul.f32 %v2888_v60, %v3879_v14  ;;  %v2889_v62 = vld [vmem:[#allocation7 + $0x698] sm:$0xff] }
 0x2c5   :  { %2297 = vst [vmem:[#allocation9 + $0x5a0] sm:$0xff] %v1785_v0  ;;  %v1816_v63 = vmul.f32 %v2889_v62, %v3879_v14  ;;  %v2890_v0 = vld [vmem:[#allocation7 + $0x6a0] sm:$0xff] }
 0x2c6   :  { %2298 = vst [vmem:[#allocation9 + $0x5a8] sm:$0xff] %v1786_v3  ;;  %v1817_v2 = vmul.f32 %v2890_v0, %v3879_v14  ;;  %v2891_v3 = vld [vmem:[#allocation7 + $0x6a8] sm:$0xff] }
 0x2c7   :  { %2299 = vst [vmem:[#allocation9 + $0x5b0] sm:$0xff] %v1787_v4  ;;  %v1818_v31 = vmul.f32 %v2891_v3, %v3879_v14  ;;  %v2892_v4 = vld [vmem:[#allocation7 + $0x6b0] sm:$0xff] }
 0x2c8   :  { %2300 = vst [vmem:[#allocation9 + $0x5b8] sm:$0xff] %v1788_v6  ;;  %v1819_v5 = vmul.f32 %v2892_v4, %v3879_v14  ;;  %v2893_v6 = vld [vmem:[#allocation7 + $0x6b8] sm:$0xff] }
 0x2c9   :  { %2301 = vst [vmem:[#allocation9 + $0x5c0] sm:$0xff] %v1789_v8  ;;  %v1820_v7 = vmul.f32 %v2893_v6, %v3879_v14  ;;  %v2894_v8 = vld [vmem:[#allocation7 + $0x6c0] sm:$0xff] }
 0x2ca   :  { %2302 = vst [vmem:[#allocation9 + $0x5c8] sm:$0xff] %v1790_v10  ;;  %v1821_v9 = vmul.f32 %v2894_v8, %v3879_v14  ;;  %v2895_v10 = vld [vmem:[#allocation7 + $0x6c8] sm:$0xff] }
 0x2cb   :  { %2303 = vst [vmem:[#allocation9 + $0x5d0] sm:$0xff] %v1791_v12  ;;  %v1822_v11 = vmul.f32 %v2895_v10, %v3879_v14  ;;  %v2896_v12 = vld [vmem:[#allocation7 + $0x6d0] sm:$0xff] }
 0x2cc   :  { %2304 = vst [vmem:[#allocation9 + $0x5d8] sm:$0xff] %v1792_v15  ;;  %v1823_v13 = vmul.f32 %v2896_v12, %v3879_v14  ;;  %v2897_v15 = vld [vmem:[#allocation7 + $0x6d8] sm:$0xff] }
 0x2cd   :  { %2305 = vst [vmem:[#allocation9 + $0x5e0] sm:$0xff] %v1793_v17  ;;  %v1824_v16 = vmul.f32 %v2897_v15, %v3879_v14  ;;  %v2898_v17 = vld [vmem:[#allocation7 + $0x6e0] sm:$0xff] }
 0x2ce   :  { %2306 = vst [vmem:[#allocation9 + $0x5e8] sm:$0xff] %v1794_v19  ;;  %v1825_v18 = vmul.f32 %v2898_v17, %v3879_v14  ;;  %v2899_v19 = vld [vmem:[#allocation7 + $0x6e8] sm:$0xff] }
 0x2cf   :  { %2307 = vst [vmem:[#allocation9 + $0x5f0] sm:$0xff] %v1795_v21  ;;  %v1826_v20 = vmul.f32 %v2899_v19, %v3879_v14  ;;  %v2900_v21 = vld [vmem:[#allocation7 + $0x6f0] sm:$0xff]  ;;  %v4136_v19 = vld [vmem:[#allocation5] ss:$0 sm:$0xff] }
 0x2d0   :  { %2308 = vst [vmem:[#allocation9 + $0x5f8] sm:$0xff] %v1796_v23  ;;  %v1827_v22 = vmul.f32 %v2900_v21, %v3879_v14  ;;  %v2901_v23 = vld [vmem:[#allocation7 + $0x6f8] sm:$0xff]  ;;  %v2932_v21 = vld [vmem:[#allocation7 + $0x7e8] sm:$0xff] }
 0x2d1   :  { %2309 = vst [vmem:[#allocation9 + $0x600] sm:$0xff] %v1797_v25  ;;  %v1828_v24 = vmul.f32 %v2901_v23, %v3879_v14  ;;  %v2902_v25 = vld [vmem:[#allocation7 + $0x700] sm:$0xff]  ;;  %v2933_v23 = vld [vmem:[#allocation7 + $0x7f0] sm:$0xff] }
 0x2d2   :  { %2310 = vst [vmem:[#allocation9 + $0x608] sm:$0xff] %v1798_v58  ;;  %v1829_v26 = vmul.f32 %v2902_v25, %v3879_v14  ;;  %v2903_v58 = vld [vmem:[#allocation7 + $0x708] sm:$0xff]  ;;  %v2934_v25 = vld [vmem:[#allocation7 + $0x7f8] sm:$0xff] }
 0x2d3   :  { %2311 = vst [vmem:[#allocation9 + $0x610] sm:$0xff] %v1799_v28  ;;  %v1830_v27 = vmul.f32 %v2903_v58, %v3879_v14  ;;  %v2904_v28 = vld [vmem:[#allocation7 + $0x710] sm:$0xff] }
 0x2d4   :  { %2312 = vst [vmem:[#allocation9 + $0x618] sm:$0xff] %v1800_v30  ;;  %v1831_v29 = vmul.f32 %v2904_v28, %v3879_v14  ;;  %v2905_v30 = vld [vmem:[#allocation7 + $0x718] sm:$0xff] }
 0x2d5   :  { %2313 = vst [vmem:[#allocation9 + $0x620] sm:$0xff] %v1801_v33  ;;  %v1832_v32 = vmul.f32 %v2905_v30, %v3879_v14  ;;  %v2906_v33 = vld [vmem:[#allocation7 + $0x720] sm:$0xff] }
 0x2d6   :  { %2314 = vst [vmem:[#allocation9 + $0x628] sm:$0xff] %v1802_v35  ;;  %v1833_v34 = vmul.f32 %v2906_v33, %v3879_v14  ;;  %v2907_v35 = vld [vmem:[#allocation7 + $0x728] sm:$0xff] }
 0x2d7   :  { %2315 = vst [vmem:[#allocation9 + $0x630] sm:$0xff] %v1803_v37  ;;  %v1834_v36 = vmul.f32 %v2907_v35, %v3879_v14  ;;  %v2908_v37 = vld [vmem:[#allocation7 + $0x730] sm:$0xff] }
 0x2d8   :  { %2316 = vst [vmem:[#allocation9 + $0x638] sm:$0xff] %v1804_v39  ;;  %v1835_v38 = vmul.f32 %v2908_v37, %v3879_v14  ;;  %v2909_v39 = vld [vmem:[#allocation7 + $0x738] sm:$0xff] }
 0x2d9   :  { %2317 = vst [vmem:[#allocation9 + $0x640] sm:$0xff] %v1805_v40  ;;  %v1836_v1 = vmul.f32 %v2909_v39, %v3879_v14  ;;  %v2910_v40 = vld [vmem:[#allocation7 + $0x740] sm:$0xff] }
 0x2da   :  { %2318 = vst [vmem:[#allocation9 + $0x648] sm:$0xff] %v1806_v42  ;;  %v1837_v41 = vmul.f32 %v2910_v40, %v3879_v14  ;;  %v2911_v42 = vld [vmem:[#allocation7 + $0x748] sm:$0xff] }
 0x2db   :  { %2319 = vst [vmem:[#allocation9 + $0x650] sm:$0xff] %v1807_v44  ;;  %v1838_v43 = vmul.f32 %v2911_v42, %v3879_v14  ;;  %v2912_v44 = vld [vmem:[#allocation7 + $0x750] sm:$0xff] }
 0x2dc   :  { %2320 = vst [vmem:[#allocation9 + $0x658] sm:$0xff] %v1808_v46  ;;  %v1839_v45 = vmul.f32 %v2912_v44, %v3879_v14  ;;  %v2913_v46 = vld [vmem:[#allocation7 + $0x758] sm:$0xff] }
 0x2dd   :  { %2321 = vst [vmem:[#allocation9 + $0x660] sm:$0xff] %v1809_v48  ;;  %v1840_v47 = vmul.f32 %v2913_v46, %v3879_v14  ;;  %v2914_v48 = vld [vmem:[#allocation7 + $0x760] sm:$0xff] }
 0x2de   :  { %2322 = vst [vmem:[#allocation9 + $0x668] sm:$0xff] %v1810_v50  ;;  %v1841_v49 = vmul.f32 %v2914_v48, %v3879_v14  ;;  %v2915_v50 = vld [vmem:[#allocation7 + $0x768] sm:$0xff] }
 0x2df   :  { %2323 = vst [vmem:[#allocation9 + $0x670] sm:$0xff] %v1811_v52  ;;  %v1842_v51 = vmul.f32 %v2915_v50, %v3879_v14  ;;  %v2916_v52 = vld [vmem:[#allocation7 + $0x770] sm:$0xff] }
 0x2e0   :  { %2324 = vst [vmem:[#allocation9 + $0x678] sm:$0xff] %v1812_v54  ;;  %v1843_v53 = vmul.f32 %v2916_v52, %v3879_v14  ;;  %v2917_v54 = vld [vmem:[#allocation7 + $0x778] sm:$0xff] }
 0x2e1   :  { %2325 = vst [vmem:[#allocation9 + $0x680] sm:$0xff] %v1813_v56  ;;  %v1844_v55 = vmul.f32 %v2917_v54, %v3879_v14  ;;  %v2918_v56 = vld [vmem:[#allocation7 + $0x780] sm:$0xff] }
 0x2e2   :  { %2326 = vst [vmem:[#allocation9 + $0x688] sm:$0xff] %v1814_v59  ;;  %v1845_v57 = vmul.f32 %v2918_v56, %v3879_v14  ;;  %v2919_v59 = vld [vmem:[#allocation7 + $0x788] sm:$0xff] }
 0x2e3   :  { %2327 = vst [vmem:[#allocation9 + $0x690] sm:$0xff] %v1815_v61  ;;  %v1846_v60 = vmul.f32 %v2919_v59, %v3879_v14  ;;  %v2920_v61 = vld [vmem:[#allocation7 + $0x790] sm:$0xff] }
 0x2e4   :  { %2328 = vst [vmem:[#allocation9 + $0x698] sm:$0xff] %v1816_v63  ;;  %v1847_v62 = vmul.f32 %v2920_v61, %v3879_v14  ;;  %v2921_v63 = vld [vmem:[#allocation7 + $0x798] sm:$0xff] }
 0x2e5   :  { %2329 = vst [vmem:[#allocation9 + $0x6a0] sm:$0xff] %v1817_v2  ;;  %v1848_v0 = vmul.f32 %v2921_v63, %v3879_v14  ;;  %v2922_v2 = vld [vmem:[#allocation7 + $0x7a0] sm:$0xff] }
 0x2e6   :  { %2330 = vst [vmem:[#allocation9 + $0x6a8] sm:$0xff] %v1818_v31  ;;  %v1849_v3 = vmul.f32 %v2922_v2, %v3879_v14  ;;  %v2923_v31 = vld [vmem:[#allocation7 + $0x7a8] sm:$0xff] }
 0x2e7   :  { %2331 = vst [vmem:[#allocation9 + $0x6b0] sm:$0xff] %v1819_v5  ;;  %v1850_v4 = vmul.f32 %v2923_v31, %v3879_v14  ;;  %v2924_v5 = vld [vmem:[#allocation7 + $0x7b0] sm:$0xff] }
 0x2e8   :  { %2332 = vst [vmem:[#allocation9 + $0x6b8] sm:$0xff] %v1820_v7  ;;  %v1851_v6 = vmul.f32 %v2924_v5, %v3879_v14  ;;  %v2925_v7 = vld [vmem:[#allocation7 + $0x7b8] sm:$0xff] }
 0x2e9   :  { %2333 = vst [vmem:[#allocation9 + $0x6c0] sm:$0xff] %v1821_v9  ;;  %v1852_v8 = vmul.f32 %v2925_v7, %v3879_v14  ;;  %v2926_v9 = vld [vmem:[#allocation7 + $0x7c0] sm:$0xff] }
 0x2ea   :  { %2334 = vst [vmem:[#allocation9 + $0x6c8] sm:$0xff] %v1822_v11  ;;  %v1853_v10 = vmul.f32 %v2926_v9, %v3879_v14  ;;  %v2927_v11 = vld [vmem:[#allocation7 + $0x7c8] sm:$0xff] }
 0x2eb   :  { %2335 = vst [vmem:[#allocation9 + $0x6d0] sm:$0xff] %v1823_v13  ;;  %v1854_v12 = vmul.f32 %v2927_v11, %v3879_v14  ;;  %v2928_v13 = vld [vmem:[#allocation7 + $0x7d0] sm:$0xff] }
 0x2ec   :  { %2336 = vst [vmem:[#allocation9 + $0x6d8] sm:$0xff] %v1824_v16  ;;  %v1855_v15 = vmul.f32 %v2928_v13, %v3879_v14  ;;  %v2929_v16 = vld [vmem:[#allocation7 + $0x7d8] sm:$0xff] }
 0x2ed   :  { %2337 = vst [vmem:[#allocation9 + $0x6e0] sm:$0xff] %v1825_v18  ;;  %v1856_v17 = vmul.f32 %v2929_v16, %v3879_v14  ;;  %v2930_v18 = vld [vmem:[#allocation7 + $0x7e0] sm:$0xff] }
 0x2ee   :  { %2338 = vst [vmem:[#allocation9 + $0x6e8] sm:$0xff] %v1826_v20  ;;  %v1857_v20 = vmul.f32 %v4136_v19, %v2930_v18  ;;  %v2935_v14 = vld [vmem:[#allocation7 + $0x800] sm:$0xff] }
 0x2ef   :  { %2339 = vst [vmem:[#allocation9 + $0x6f0] sm:$0xff] %v1827_v22  ;;  %v1858_v22 = vmul.f32 %v2932_v21, %v4136_v19  ;;  %v1861_v58 = vmul.f32 %v2935_v14, %v4136_v19 }
 0x2f0   :  { %2340 = vst [vmem:[#allocation9 + $0x6f8] sm:$0xff] %v1828_v24  ;;  %v1859_v24 = vmul.f32 %v2933_v23, %v4136_v19 }
 0x2f1   :  { %2341 = vst [vmem:[#allocation9 + $0x700] sm:$0xff] %v1829_v26  ;;  %v1860_v26 = vmul.f32 %v2934_v25, %v4136_v19 }
 0x2f2   :  { %2342 = vst [vmem:[#allocation9 + $0x708] sm:$0xff] %v1830_v27  ;;  %v2936_v27 = vld [vmem:[#allocation7 + $0x808] sm:$0xff] }
 0x2f3   :  { %2343 = vst [vmem:[#allocation9 + $0x710] sm:$0xff] %v1831_v29  ;;  %v1862_v28 = vmul.f32 %v2936_v27, %v4136_v19  ;;  %v2937_v29 = vld [vmem:[#allocation7 + $0x810] sm:$0xff] }
 0x2f4   :  { %2344 = vst [vmem:[#allocation9 + $0x718] sm:$0xff] %v1832_v32  ;;  %v1863_v30 = vmul.f32 %v2937_v29, %v4136_v19  ;;  %v2938_v32 = vld [vmem:[#allocation7 + $0x818] sm:$0xff] }
 0x2f5   :  { %2345 = vst [vmem:[#allocation9 + $0x720] sm:$0xff] %v1833_v34  ;;  %v1864_v33 = vmul.f32 %v2938_v32, %v4136_v19  ;;  %v2939_v34 = vld [vmem:[#allocation7 + $0x820] sm:$0xff] }
 0x2f6   :  { %2346 = vst [vmem:[#allocation9 + $0x728] sm:$0xff] %v1834_v36  ;;  %v1865_v35 = vmul.f32 %v2939_v34, %v4136_v19  ;;  %v2940_v36 = vld [vmem:[#allocation7 + $0x828] sm:$0xff] }
 0x2f7   :  { %2347 = vst [vmem:[#allocation9 + $0x730] sm:$0xff] %v1835_v38  ;;  %v1866_v37 = vmul.f32 %v2940_v36, %v4136_v19  ;;  %v2941_v38 = vld [vmem:[#allocation7 + $0x830] sm:$0xff] }
 0x2f8   :  { %2348 = vst [vmem:[#allocation9 + $0x738] sm:$0xff] %v1836_v1  ;;  %v1867_v39 = vmul.f32 %v2941_v38, %v4136_v19  ;;  %v2942_v1 = vld [vmem:[#allocation7 + $0x838] sm:$0xff] }
 0x2f9   :  { %2349 = vst [vmem:[#allocation9 + $0x740] sm:$0xff] %v1837_v41  ;;  %v1868_v40 = vmul.f32 %v2942_v1, %v4136_v19  ;;  %v2943_v41 = vld [vmem:[#allocation7 + $0x840] sm:$0xff] }
 0x2fa   :  { %2350 = vst [vmem:[#allocation9 + $0x748] sm:$0xff] %v1838_v43  ;;  %v1869_v42 = vmul.f32 %v2943_v41, %v4136_v19  ;;  %v2944_v43 = vld [vmem:[#allocation7 + $0x848] sm:$0xff] }
 0x2fb   :  { %2351 = vst [vmem:[#allocation9 + $0x750] sm:$0xff] %v1839_v45  ;;  %v1870_v44 = vmul.f32 %v2944_v43, %v4136_v19  ;;  %v2945_v45 = vld [vmem:[#allocation7 + $0x850] sm:$0xff] }
 0x2fc   :  { %2352 = vst [vmem:[#allocation9 + $0x758] sm:$0xff] %v1840_v47  ;;  %v1871_v46 = vmul.f32 %v2945_v45, %v4136_v19  ;;  %v2946_v47 = vld [vmem:[#allocation7 + $0x858] sm:$0xff] }
 0x2fd   :  { %2353 = vst [vmem:[#allocation9 + $0x760] sm:$0xff] %v1841_v49  ;;  %v1872_v48 = vmul.f32 %v2946_v47, %v4136_v19  ;;  %v2947_v49 = vld [vmem:[#allocation7 + $0x860] sm:$0xff] }
 0x2fe   :  { %2354 = vst [vmem:[#allocation9 + $0x768] sm:$0xff] %v1842_v51  ;;  %v1873_v50 = vmul.f32 %v2947_v49, %v4136_v19  ;;  %v2948_v51 = vld [vmem:[#allocation7 + $0x868] sm:$0xff] }
 0x2ff   :  { %2355 = vst [vmem:[#allocation9 + $0x770] sm:$0xff] %v1843_v53  ;;  %v1874_v52 = vmul.f32 %v2948_v51, %v4136_v19  ;;  %v2949_v53 = vld [vmem:[#allocation7 + $0x870] sm:$0xff] }
 0x300   :  { %2356 = vst [vmem:[#allocation9 + $0x778] sm:$0xff] %v1844_v55  ;;  %v1875_v54 = vmul.f32 %v2949_v53, %v4136_v19  ;;  %v2950_v55 = vld [vmem:[#allocation7 + $0x878] sm:$0xff] }
 0x301   :  { %2357 = vst [vmem:[#allocation9 + $0x780] sm:$0xff] %v1845_v57  ;;  %v1876_v56 = vmul.f32 %v2950_v55, %v4136_v19  ;;  %v2951_v57 = vld [vmem:[#allocation7 + $0x880] sm:$0xff] }
 0x302   :  { %2358 = vst [vmem:[#allocation9 + $0x788] sm:$0xff] %v1846_v60  ;;  %v1877_v59 = vmul.f32 %v2951_v57, %v4136_v19  ;;  %v2952_v60 = vld [vmem:[#allocation7 + $0x888] sm:$0xff] }
 0x303   :  { %2359 = vst [vmem:[#allocation9 + $0x790] sm:$0xff] %v1847_v62  ;;  %v1878_v61 = vmul.f32 %v2952_v60, %v4136_v19  ;;  %v2953_v62 = vld [vmem:[#allocation7 + $0x890] sm:$0xff] }
 0x304   :  { %2360 = vst [vmem:[#allocation9 + $0x798] sm:$0xff] %v1848_v0  ;;  %v1879_v63 = vmul.f32 %v2953_v62, %v4136_v19  ;;  %v2954_v0 = vld [vmem:[#allocation7 + $0x898] sm:$0xff] }
 0x305   :  { %2361 = vst [vmem:[#allocation9 + $0x7a0] sm:$0xff] %v1849_v3  ;;  %v1880_v2 = vmul.f32 %v2954_v0, %v4136_v19  ;;  %v2955_v3 = vld [vmem:[#allocation7 + $0x8a0] sm:$0xff] }
 0x306   :  { %2362 = vst [vmem:[#allocation9 + $0x7a8] sm:$0xff] %v1850_v4  ;;  %v1881_v31 = vmul.f32 %v2955_v3, %v4136_v19  ;;  %v2956_v4 = vld [vmem:[#allocation7 + $0x8a8] sm:$0xff] }
 0x307   :  { %2363 = vst [vmem:[#allocation9 + $0x7b0] sm:$0xff] %v1851_v6  ;;  %v1882_v5 = vmul.f32 %v2956_v4, %v4136_v19  ;;  %v2957_v6 = vld [vmem:[#allocation7 + $0x8b0] sm:$0xff] }
 0x308   :  { %2364 = vst [vmem:[#allocation9 + $0x7b8] sm:$0xff] %v1852_v8  ;;  %v1883_v7 = vmul.f32 %v2957_v6, %v4136_v19  ;;  %v2958_v8 = vld [vmem:[#allocation7 + $0x8b8] sm:$0xff] }
 0x309   :  { %2365 = vst [vmem:[#allocation9 + $0x7c0] sm:$0xff] %v1853_v10  ;;  %v1884_v9 = vmul.f32 %v2958_v8, %v4136_v19  ;;  %v2959_v10 = vld [vmem:[#allocation7 + $0x8c0] sm:$0xff] }
 0x30a   :  { %2366 = vst [vmem:[#allocation9 + $0x7c8] sm:$0xff] %v1854_v12  ;;  %v1885_v11 = vmul.f32 %v2959_v10, %v4136_v19  ;;  %v2960_v12 = vld [vmem:[#allocation7 + $0x8c8] sm:$0xff] }
 0x30b   :  { %2367 = vst [vmem:[#allocation9 + $0x7d0] sm:$0xff] %v1855_v15  ;;  %v1886_v13 = vmul.f32 %v2960_v12, %v4136_v19  ;;  %v2961_v15 = vld [vmem:[#allocation7 + $0x8d0] sm:$0xff] }
 0x30c   :  { %2368 = vst [vmem:[#allocation9 + $0x7d8] sm:$0xff] %v1856_v17  ;;  %v1887_v16 = vmul.f32 %v2961_v15, %v4136_v19  ;;  %v2962_v17 = vld [vmem:[#allocation7 + $0x8d8] sm:$0xff] }
 0x30d   :  { %2369 = vst [vmem:[#allocation9 + $0x7e0] sm:$0xff] %v1857_v20  ;;  %v1888_v18 = vmul.f32 %v2962_v17, %v4136_v19  ;;  %v2963_v20 = vld [vmem:[#allocation7 + $0x8e0] sm:$0xff] }
 0x30e   :  { %2370 = vst [vmem:[#allocation9 + $0x7e8] sm:$0xff] %v1858_v22  ;;  %v1889_v21 = vmul.f32 %v2963_v20, %v4136_v19  ;;  %v2964_v22 = vld [vmem:[#allocation7 + $0x8e8] sm:$0xff] }
 0x30f   :  { %2371 = vst [vmem:[#allocation9 + $0x7f0] sm:$0xff] %v1859_v24  ;;  %v1890_v23 = vmul.f32 %v2964_v22, %v4136_v19  ;;  %v2965_v24 = vld [vmem:[#allocation7 + $0x8f0] sm:$0xff] }
 0x310   :  { %2372 = vst [vmem:[#allocation9 + $0x7f8] sm:$0xff] %v1860_v26  ;;  %v1891_v25 = vmul.f32 %v2965_v24, %v4136_v19  ;;  %v2966_v26 = vld [vmem:[#allocation7 + $0x8f8] sm:$0xff] }
 0x311   :  { %2373 = vst [vmem:[#allocation9 + $0x800] sm:$0xff] %v1861_v58  ;;  %v1892_v14 = vmul.f32 %v2966_v26, %v4136_v19  ;;  %v2967_v58 = vld [vmem:[#allocation7 + $0x900] sm:$0xff] }
 0x312   :  { %2374 = vst [vmem:[#allocation9 + $0x808] sm:$0xff] %v1862_v28  ;;  %v1893_v27 = vmul.f32 %v2967_v58, %v4136_v19  ;;  %v2968_v28 = vld [vmem:[#allocation7 + $0x908] sm:$0xff] }
 0x313   :  { %2375 = vst [vmem:[#allocation9 + $0x810] sm:$0xff] %v1863_v30  ;;  %v1894_v29 = vmul.f32 %v2968_v28, %v4136_v19  ;;  %v2969_v30 = vld [vmem:[#allocation7 + $0x910] sm:$0xff] }
 0x314   :  { %2376 = vst [vmem:[#allocation9 + $0x818] sm:$0xff] %v1864_v33  ;;  %v1895_v32 = vmul.f32 %v2969_v30, %v4136_v19  ;;  %v2970_v33 = vld [vmem:[#allocation7 + $0x918] sm:$0xff] }
 0x315   :  { %2377 = vst [vmem:[#allocation9 + $0x820] sm:$0xff] %v1865_v35  ;;  %v1896_v34 = vmul.f32 %v2970_v33, %v4136_v19  ;;  %v2971_v35 = vld [vmem:[#allocation7 + $0x920] sm:$0xff] }
 0x316   :  { %2378 = vst [vmem:[#allocation9 + $0x828] sm:$0xff] %v1866_v37  ;;  %v1897_v36 = vmul.f32 %v2971_v35, %v4136_v19  ;;  %v2972_v37 = vld [vmem:[#allocation7 + $0x928] sm:$0xff] }
 0x317   :  { %2379 = vst [vmem:[#allocation9 + $0x830] sm:$0xff] %v1867_v39  ;;  %v1898_v38 = vmul.f32 %v2972_v37, %v4136_v19  ;;  %v2973_v39 = vld [vmem:[#allocation7 + $0x930] sm:$0xff] }
 0x318   :  { %2380 = vst [vmem:[#allocation9 + $0x838] sm:$0xff] %v1868_v40  ;;  %v1899_v1 = vmul.f32 %v2973_v39, %v4136_v19  ;;  %v2974_v40 = vld [vmem:[#allocation7 + $0x938] sm:$0xff] }
 0x319   :  { %2381 = vst [vmem:[#allocation9 + $0x840] sm:$0xff] %v1869_v42  ;;  %v1900_v41 = vmul.f32 %v2974_v40, %v4136_v19  ;;  %v2975_v42 = vld [vmem:[#allocation7 + $0x940] sm:$0xff] }
 0x31a   :  { %2382 = vst [vmem:[#allocation9 + $0x848] sm:$0xff] %v1870_v44  ;;  %v1901_v43 = vmul.f32 %v2975_v42, %v4136_v19  ;;  %v2976_v44 = vld [vmem:[#allocation7 + $0x948] sm:$0xff] }
 0x31b   :  { %2383 = vst [vmem:[#allocation9 + $0x850] sm:$0xff] %v1871_v46  ;;  %v1902_v45 = vmul.f32 %v2976_v44, %v4136_v19  ;;  %v2977_v46 = vld [vmem:[#allocation7 + $0x950] sm:$0xff] }
 0x31c   :  { %2384 = vst [vmem:[#allocation9 + $0x858] sm:$0xff] %v1872_v48  ;;  %v1903_v47 = vmul.f32 %v2977_v46, %v4136_v19  ;;  %v2978_v48 = vld [vmem:[#allocation7 + $0x958] sm:$0xff] }
 0x31d   :  { %2385 = vst [vmem:[#allocation9 + $0x860] sm:$0xff] %v1873_v50  ;;  %v1904_v49 = vmul.f32 %v2978_v48, %v4136_v19  ;;  %v2979_v50 = vld [vmem:[#allocation7 + $0x960] sm:$0xff] }
 0x31e   :  { %2386 = vst [vmem:[#allocation9 + $0x868] sm:$0xff] %v1874_v52  ;;  %v1905_v51 = vmul.f32 %v2979_v50, %v4136_v19  ;;  %v2980_v52 = vld [vmem:[#allocation7 + $0x968] sm:$0xff] }
 0x31f   :  { %2387 = vst [vmem:[#allocation9 + $0x870] sm:$0xff] %v1875_v54  ;;  %v1906_v53 = vmul.f32 %v2980_v52, %v4136_v19  ;;  %v2981_v54 = vld [vmem:[#allocation7 + $0x970] sm:$0xff] }
 0x320   :  { %2388 = vst [vmem:[#allocation9 + $0x878] sm:$0xff] %v1876_v56  ;;  %v1907_v55 = vmul.f32 %v2981_v54, %v4136_v19  ;;  %v2982_v56 = vld [vmem:[#allocation7 + $0x978] sm:$0xff] }
 0x321   :  { %2389 = vst [vmem:[#allocation9 + $0x880] sm:$0xff] %v1877_v59  ;;  %v1908_v57 = vmul.f32 %v2982_v56, %v4136_v19  ;;  %v2983_v59 = vld [vmem:[#allocation7 + $0x980] sm:$0xff] }
 0x322   :  { %2390 = vst [vmem:[#allocation9 + $0x888] sm:$0xff] %v1878_v61  ;;  %v1909_v60 = vmul.f32 %v2983_v59, %v4136_v19  ;;  %v2984_v61 = vld [vmem:[#allocation7 + $0x988] sm:$0xff] }
 0x323   :  { %2391 = vst [vmem:[#allocation9 + $0x890] sm:$0xff] %v1879_v63  ;;  %v1910_v62 = vmul.f32 %v2984_v61, %v4136_v19  ;;  %v2985_v63 = vld [vmem:[#allocation7 + $0x990] sm:$0xff] }
 0x324   :  { %2392 = vst [vmem:[#allocation9 + $0x898] sm:$0xff] %v1880_v2  ;;  %v1911_v0 = vmul.f32 %v2985_v63, %v4136_v19  ;;  %v2986_v2 = vld [vmem:[#allocation7 + $0x998] sm:$0xff] }
 0x325   :  { %2393 = vst [vmem:[#allocation9 + $0x8a0] sm:$0xff] %v1881_v31  ;;  %v1912_v3 = vmul.f32 %v2986_v2, %v4136_v19  ;;  %v2987_v31 = vld [vmem:[#allocation7 + $0x9a0] sm:$0xff] }
 0x326   :  { %2394 = vst [vmem:[#allocation9 + $0x8a8] sm:$0xff] %v1882_v5  ;;  %v1913_v4 = vmul.f32 %v2987_v31, %v4136_v19  ;;  %v2988_v5 = vld [vmem:[#allocation7 + $0x9a8] sm:$0xff] }
 0x327   :  { %2395 = vst [vmem:[#allocation9 + $0x8b0] sm:$0xff] %v1883_v7  ;;  %v1914_v6 = vmul.f32 %v2988_v5, %v4136_v19  ;;  %v2989_v7 = vld [vmem:[#allocation7 + $0x9b0] sm:$0xff] }
 0x328   :  { %2396 = vst [vmem:[#allocation9 + $0x8b8] sm:$0xff] %v1884_v9  ;;  %v1915_v8 = vmul.f32 %v2989_v7, %v4136_v19  ;;  %v2990_v9 = vld [vmem:[#allocation7 + $0x9b8] sm:$0xff] }
 0x329   :  { %2397 = vst [vmem:[#allocation9 + $0x8c0] sm:$0xff] %v1885_v11  ;;  %v1916_v10 = vmul.f32 %v2990_v9, %v4136_v19  ;;  %v2991_v11 = vld [vmem:[#allocation7 + $0x9c0] sm:$0xff] }
 0x32a   :  { %2398 = vst [vmem:[#allocation9 + $0x8c8] sm:$0xff] %v1886_v13  ;;  %v1917_v12 = vmul.f32 %v2991_v11, %v4136_v19  ;;  %v2992_v13 = vld [vmem:[#allocation7 + $0x9c8] sm:$0xff] }
 0x32b   :  { %2399 = vst [vmem:[#allocation9 + $0x8d0] sm:$0xff] %v1887_v16  ;;  %v1918_v15 = vmul.f32 %v2992_v13, %v4136_v19  ;;  %v2993_v16 = vld [vmem:[#allocation7 + $0x9d0] sm:$0xff] }
 0x32c   :  { %2400 = vst [vmem:[#allocation9 + $0x8d8] sm:$0xff] %v1888_v18  ;;  %v1919_v17 = vmul.f32 %v2993_v16, %v4136_v19  ;;  %v2994_v18 = vld [vmem:[#allocation7 + $0x9d8] sm:$0xff] }
 0x32d   :  { %2401 = vst [vmem:[#allocation9 + $0x8e0] sm:$0xff] %v1889_v21  ;;  %v1920_v20 = vmul.f32 %v2994_v18, %v4136_v19  ;;  %v2995_v21 = vld [vmem:[#allocation7 + $0x9e0] sm:$0xff] }
 0x32e   :  { %2402 = vst [vmem:[#allocation9 + $0x8e8] sm:$0xff] %v1890_v23  ;;  %v1921_v22 = vmul.f32 %v2995_v21, %v4136_v19  ;;  %v2996_v23 = vld [vmem:[#allocation7 + $0x9e8] sm:$0xff] }
 0x32f   :  { %2403 = vst [vmem:[#allocation9 + $0x8f0] sm:$0xff] %v1891_v25  ;;  %v1922_v24 = vmul.f32 %v2996_v23, %v4136_v19  ;;  %v2997_v25 = vld [vmem:[#allocation7 + $0x9f0] sm:$0xff] }
 0x330   :  { %2404 = vst [vmem:[#allocation9 + $0x8f8] sm:$0xff] %v1892_v14  ;;  %v1923_v26 = vmul.f32 %v2997_v25, %v4136_v19  ;;  %v2998_v14 = vld [vmem:[#allocation7 + $0x9f8] sm:$0xff] }
 0x331   :  { %2405 = vst [vmem:[#allocation9 + $0x900] sm:$0xff] %v1893_v27  ;;  %v1924_v58 = vmul.f32 %v2998_v14, %v4136_v19  ;;  %v2999_v27 = vld [vmem:[#allocation7 + $0xa00] sm:$0xff] }
 0x332   :  { %2406 = vst [vmem:[#allocation9 + $0x908] sm:$0xff] %v1894_v29  ;;  %v1925_v28 = vmul.f32 %v2999_v27, %v4136_v19  ;;  %v3000_v29 = vld [vmem:[#allocation7 + $0xa08] sm:$0xff] }
 0x333   :  { %2407 = vst [vmem:[#allocation9 + $0x910] sm:$0xff] %v1895_v32  ;;  %v1926_v30 = vmul.f32 %v3000_v29, %v4136_v19  ;;  %v3001_v32 = vld [vmem:[#allocation7 + $0xa10] sm:$0xff] }
 0x334   :  { %2408 = vst [vmem:[#allocation9 + $0x918] sm:$0xff] %v1896_v34  ;;  %v1927_v33 = vmul.f32 %v3001_v32, %v4136_v19  ;;  %v3002_v34 = vld [vmem:[#allocation7 + $0xa18] sm:$0xff] }
 0x335   :  { %2409 = vst [vmem:[#allocation9 + $0x920] sm:$0xff] %v1897_v36  ;;  %v1928_v35 = vmul.f32 %v3002_v34, %v4136_v19  ;;  %v3003_v36 = vld [vmem:[#allocation7 + $0xa20] sm:$0xff] }
 0x336   :  { %2410 = vst [vmem:[#allocation9 + $0x928] sm:$0xff] %v1898_v38  ;;  %v1929_v37 = vmul.f32 %v3003_v36, %v4136_v19  ;;  %v3004_v38 = vld [vmem:[#allocation7 + $0xa28] sm:$0xff] }
 0x337   :  { %2411 = vst [vmem:[#allocation9 + $0x930] sm:$0xff] %v1899_v1  ;;  %v1930_v39 = vmul.f32 %v3004_v38, %v4136_v19  ;;  %v3005_v1 = vld [vmem:[#allocation7 + $0xa30] sm:$0xff] }
 0x338   :  { %2412 = vst [vmem:[#allocation9 + $0x938] sm:$0xff] %v1900_v41  ;;  %v1931_v40 = vmul.f32 %v3005_v1, %v4136_v19  ;;  %v3006_v41 = vld [vmem:[#allocation7 + $0xa38] sm:$0xff] }
 0x339   :  { %2413 = vst [vmem:[#allocation9 + $0x940] sm:$0xff] %v1901_v43  ;;  %v1932_v42 = vmul.f32 %v3006_v41, %v4136_v19  ;;  %v3007_v43 = vld [vmem:[#allocation7 + $0xa40] sm:$0xff] }
 0x33a   :  { %2414 = vst [vmem:[#allocation9 + $0x948] sm:$0xff] %v1902_v45  ;;  %v1933_v44 = vmul.f32 %v3007_v43, %v4136_v19  ;;  %v3008_v45 = vld [vmem:[#allocation7 + $0xa48] sm:$0xff] }
 0x33b   :  { %2415 = vst [vmem:[#allocation9 + $0x950] sm:$0xff] %v1903_v47  ;;  %v1934_v46 = vmul.f32 %v3008_v45, %v4136_v19  ;;  %v3009_v47 = vld [vmem:[#allocation7 + $0xa50] sm:$0xff] }
 0x33c   :  { %2416 = vst [vmem:[#allocation9 + $0x958] sm:$0xff] %v1904_v49  ;;  %v1935_v48 = vmul.f32 %v3009_v47, %v4136_v19  ;;  %v3010_v49 = vld [vmem:[#allocation7 + $0xa58] sm:$0xff] }
 0x33d   :  { %2417 = vst [vmem:[#allocation9 + $0x960] sm:$0xff] %v1905_v51  ;;  %v1936_v50 = vmul.f32 %v3010_v49, %v4136_v19  ;;  %v3011_v51 = vld [vmem:[#allocation7 + $0xa60] sm:$0xff] }
 0x33e   :  { %2418 = vst [vmem:[#allocation9 + $0x968] sm:$0xff] %v1906_v53  ;;  %v1937_v52 = vmul.f32 %v3011_v51, %v4136_v19  ;;  %v3012_v53 = vld [vmem:[#allocation7 + $0xa68] sm:$0xff] }
 0x33f   :  { %2419 = vst [vmem:[#allocation9 + $0x970] sm:$0xff] %v1907_v55  ;;  %v1938_v54 = vmul.f32 %v3012_v53, %v4136_v19  ;;  %v3013_v55 = vld [vmem:[#allocation7 + $0xa70] sm:$0xff] }
 0x340   :  { %2420 = vst [vmem:[#allocation9 + $0x978] sm:$0xff] %v1908_v57  ;;  %v1939_v56 = vmul.f32 %v3013_v55, %v4136_v19  ;;  %v3014_v57 = vld [vmem:[#allocation7 + $0xa78] sm:$0xff] }
 0x341   :  { %2421 = vst [vmem:[#allocation9 + $0x980] sm:$0xff] %v1909_v60  ;;  %v1940_v59 = vmul.f32 %v3014_v57, %v4136_v19  ;;  %v3015_v60 = vld [vmem:[#allocation7 + $0xa80] sm:$0xff] }
 0x342   :  { %2422 = vst [vmem:[#allocation9 + $0x988] sm:$0xff] %v1910_v62  ;;  %v1941_v61 = vmul.f32 %v3015_v60, %v4136_v19  ;;  %v3016_v62 = vld [vmem:[#allocation7 + $0xa88] sm:$0xff] }
 0x343   :  { %2423 = vst [vmem:[#allocation9 + $0x990] sm:$0xff] %v1911_v0  ;;  %v1942_v63 = vmul.f32 %v3016_v62, %v4136_v19  ;;  %v3017_v0 = vld [vmem:[#allocation7 + $0xa90] sm:$0xff] }
 0x344   :  { %2424 = vst [vmem:[#allocation9 + $0x998] sm:$0xff] %v1912_v3  ;;  %v1943_v2 = vmul.f32 %v3017_v0, %v4136_v19  ;;  %v3018_v3 = vld [vmem:[#allocation7 + $0xa98] sm:$0xff] }
 0x345   :  { %2425 = vst [vmem:[#allocation9 + $0x9a0] sm:$0xff] %v1913_v4  ;;  %v1944_v31 = vmul.f32 %v3018_v3, %v4136_v19  ;;  %v3019_v4 = vld [vmem:[#allocation7 + $0xaa0] sm:$0xff] }
 0x346   :  { %2426 = vst [vmem:[#allocation9 + $0x9a8] sm:$0xff] %v1914_v6  ;;  %v1945_v5 = vmul.f32 %v3019_v4, %v4136_v19  ;;  %v3020_v6 = vld [vmem:[#allocation7 + $0xaa8] sm:$0xff] }
 0x347   :  { %2427 = vst [vmem:[#allocation9 + $0x9b0] sm:$0xff] %v1915_v8  ;;  %v1946_v7 = vmul.f32 %v3020_v6, %v4136_v19  ;;  %v3021_v8 = vld [vmem:[#allocation7 + $0xab0] sm:$0xff] }
 0x348   :  { %2428 = vst [vmem:[#allocation9 + $0x9b8] sm:$0xff] %v1916_v10  ;;  %v1947_v9 = vmul.f32 %v3021_v8, %v4136_v19  ;;  %v3022_v10 = vld [vmem:[#allocation7 + $0xab8] sm:$0xff] }
 0x349   :  { %2429 = vst [vmem:[#allocation9 + $0x9c0] sm:$0xff] %v1917_v12  ;;  %v1948_v11 = vmul.f32 %v3022_v10, %v4136_v19  ;;  %v3023_v12 = vld [vmem:[#allocation7 + $0xac0] sm:$0xff] }
 0x34a   :  { %2430 = vst [vmem:[#allocation9 + $0x9c8] sm:$0xff] %v1918_v15  ;;  %v1949_v13 = vmul.f32 %v3023_v12, %v4136_v19  ;;  %v3024_v15 = vld [vmem:[#allocation7 + $0xac8] sm:$0xff] }
 0x34b   :  { %2431 = vst [vmem:[#allocation9 + $0x9d0] sm:$0xff] %v1919_v17  ;;  %v1950_v16 = vmul.f32 %v3024_v15, %v4136_v19  ;;  %v3025_v17 = vld [vmem:[#allocation7 + $0xad0] sm:$0xff] }
 0x34c   :  { %2432 = vst [vmem:[#allocation9 + $0x9d8] sm:$0xff] %v1920_v20  ;;  %v1951_v18 = vmul.f32 %v3025_v17, %v4136_v19  ;;  %v3026_v20 = vld [vmem:[#allocation7 + $0xad8] sm:$0xff] }
 0x34d   :  { %2433 = vst [vmem:[#allocation9 + $0x9e0] sm:$0xff] %v1921_v22  ;;  %v1952_v21 = vmul.f32 %v3026_v20, %v4136_v19  ;;  %v3027_v22 = vld [vmem:[#allocation7 + $0xae0] sm:$0xff] }
 0x34e   :  { %2434 = vst [vmem:[#allocation9 + $0x9e8] sm:$0xff] %v1922_v24  ;;  %v1953_v23 = vmul.f32 %v3027_v22, %v4136_v19  ;;  %v3028_v24 = vld [vmem:[#allocation7 + $0xae8] sm:$0xff] }
 0x34f   :  { %2435 = vst [vmem:[#allocation9 + $0x9f0] sm:$0xff] %v1923_v26  ;;  %v1954_v25 = vmul.f32 %v3028_v24, %v4136_v19  ;;  %v3029_v26 = vld [vmem:[#allocation7 + $0xaf0] sm:$0xff] }
 0x350   :  { %2436 = vst [vmem:[#allocation9 + $0x9f8] sm:$0xff] %v1924_v58  ;;  %v1955_v14 = vmul.f32 %v3029_v26, %v4136_v19  ;;  %v3030_v58 = vld [vmem:[#allocation7 + $0xaf8] sm:$0xff] }
 0x351   :  { %2437 = vst [vmem:[#allocation9 + $0xa00] sm:$0xff] %v1925_v28  ;;  %v1956_v27 = vmul.f32 %v3030_v58, %v4136_v19  ;;  %v3031_v28 = vld [vmem:[#allocation7 + $0xb00] sm:$0xff] }
 0x352   :  { %2438 = vst [vmem:[#allocation9 + $0xa08] sm:$0xff] %v1926_v30  ;;  %v1957_v29 = vmul.f32 %v3031_v28, %v4136_v19  ;;  %v3032_v30 = vld [vmem:[#allocation7 + $0xb08] sm:$0xff] }
 0x353   :  { %2439 = vst [vmem:[#allocation9 + $0xa10] sm:$0xff] %v1927_v33  ;;  %v1958_v32 = vmul.f32 %v3032_v30, %v4136_v19  ;;  %v3033_v33 = vld [vmem:[#allocation7 + $0xb10] sm:$0xff] }
 0x354   :  { %2440 = vst [vmem:[#allocation9 + $0xa18] sm:$0xff] %v1928_v35  ;;  %v1959_v34 = vmul.f32 %v3033_v33, %v4136_v19  ;;  %v3034_v35 = vld [vmem:[#allocation7 + $0xb18] sm:$0xff] }
 0x355   :  { %2441 = vst [vmem:[#allocation9 + $0xa20] sm:$0xff] %v1929_v37  ;;  %v1960_v36 = vmul.f32 %v3034_v35, %v4136_v19  ;;  %v3035_v37 = vld [vmem:[#allocation7 + $0xb20] sm:$0xff] }
 0x356   :  { %2442 = vst [vmem:[#allocation9 + $0xa28] sm:$0xff] %v1930_v39  ;;  %v1961_v38 = vmul.f32 %v3035_v37, %v4136_v19  ;;  %v3036_v39 = vld [vmem:[#allocation7 + $0xb28] sm:$0xff] }
 0x357   :  { %2443 = vst [vmem:[#allocation9 + $0xa30] sm:$0xff] %v1931_v40  ;;  %v1962_v1 = vmul.f32 %v3036_v39, %v4136_v19  ;;  %v3037_v40 = vld [vmem:[#allocation7 + $0xb30] sm:$0xff] }
 0x358   :  { %2444 = vst [vmem:[#allocation9 + $0xa38] sm:$0xff] %v1932_v42  ;;  %v1963_v41 = vmul.f32 %v3037_v40, %v4136_v19  ;;  %v3038_v42 = vld [vmem:[#allocation7 + $0xb38] sm:$0xff] }
 0x359   :  { %2445 = vst [vmem:[#allocation9 + $0xa40] sm:$0xff] %v1933_v44  ;;  %v1964_v43 = vmul.f32 %v3038_v42, %v4136_v19  ;;  %v3039_v44 = vld [vmem:[#allocation7 + $0xb40] sm:$0xff] }
 0x35a   :  { %2446 = vst [vmem:[#allocation9 + $0xa48] sm:$0xff] %v1934_v46  ;;  %v1965_v45 = vmul.f32 %v3039_v44, %v4136_v19  ;;  %v3040_v46 = vld [vmem:[#allocation7 + $0xb48] sm:$0xff] }
 0x35b   :  { %2447 = vst [vmem:[#allocation9 + $0xa50] sm:$0xff] %v1935_v48  ;;  %v1966_v47 = vmul.f32 %v3040_v46, %v4136_v19  ;;  %v3041_v48 = vld [vmem:[#allocation7 + $0xb50] sm:$0xff] }
 0x35c   :  { %2448 = vst [vmem:[#allocation9 + $0xa58] sm:$0xff] %v1936_v50  ;;  %v1967_v49 = vmul.f32 %v3041_v48, %v4136_v19  ;;  %v3042_v50 = vld [vmem:[#allocation7 + $0xb58] sm:$0xff] }
 0x35d   :  { %2449 = vst [vmem:[#allocation9 + $0xa60] sm:$0xff] %v1937_v52  ;;  %v1968_v51 = vmul.f32 %v3042_v50, %v4136_v19  ;;  %v3043_v52 = vld [vmem:[#allocation7 + $0xb60] sm:$0xff] }
 0x35e   :  { %2450 = vst [vmem:[#allocation9 + $0xa68] sm:$0xff] %v1938_v54  ;;  %v1969_v53 = vmul.f32 %v3043_v52, %v4136_v19  ;;  %v3044_v54 = vld [vmem:[#allocation7 + $0xb68] sm:$0xff] }
 0x35f   :  { %2451 = vst [vmem:[#allocation9 + $0xa70] sm:$0xff] %v1939_v56  ;;  %v1970_v55 = vmul.f32 %v3044_v54, %v4136_v19  ;;  %v3045_v56 = vld [vmem:[#allocation7 + $0xb70] sm:$0xff] }
 0x360   :  { %2452 = vst [vmem:[#allocation9 + $0xa78] sm:$0xff] %v1940_v59  ;;  %v1971_v57 = vmul.f32 %v3045_v56, %v4136_v19  ;;  %v3046_v59 = vld [vmem:[#allocation7 + $0xb78] sm:$0xff] }
 0x361   :  { %2453 = vst [vmem:[#allocation9 + $0xa80] sm:$0xff] %v1941_v61  ;;  %v1972_v60 = vmul.f32 %v3046_v59, %v4136_v19  ;;  %v3047_v61 = vld [vmem:[#allocation7 + $0xb80] sm:$0xff] }
 0x362   :  { %2454 = vst [vmem:[#allocation9 + $0xa88] sm:$0xff] %v1942_v63  ;;  %v1973_v62 = vmul.f32 %v3047_v61, %v4136_v19  ;;  %v3048_v63 = vld [vmem:[#allocation7 + $0xb88] sm:$0xff] }
 0x363   :  { %2455 = vst [vmem:[#allocation9 + $0xa90] sm:$0xff] %v1943_v2  ;;  %v1974_v0 = vmul.f32 %v3048_v63, %v4136_v19  ;;  %v3049_v2 = vld [vmem:[#allocation7 + $0xb90] sm:$0xff] }
 0x364   :  { %2456 = vst [vmem:[#allocation9 + $0xa98] sm:$0xff] %v1944_v31  ;;  %v1975_v3 = vmul.f32 %v3049_v2, %v4136_v19  ;;  %v3050_v31 = vld [vmem:[#allocation7 + $0xb98] sm:$0xff] }
 0x365   :  { %2457 = vst [vmem:[#allocation9 + $0xaa0] sm:$0xff] %v1945_v5  ;;  %v1976_v4 = vmul.f32 %v3050_v31, %v4136_v19  ;;  %v3051_v5 = vld [vmem:[#allocation7 + $0xba0] sm:$0xff] }
 0x366   :  { %2458 = vst [vmem:[#allocation9 + $0xaa8] sm:$0xff] %v1946_v7  ;;  %v1977_v6 = vmul.f32 %v3051_v5, %v4136_v19  ;;  %v3052_v7 = vld [vmem:[#allocation7 + $0xba8] sm:$0xff] }
 0x367   :  { %2459 = vst [vmem:[#allocation9 + $0xab0] sm:$0xff] %v1947_v9  ;;  %v1978_v8 = vmul.f32 %v3052_v7, %v4136_v19  ;;  %v3053_v9 = vld [vmem:[#allocation7 + $0xbb0] sm:$0xff] }
 0x368   :  { %2460 = vst [vmem:[#allocation9 + $0xab8] sm:$0xff] %v1948_v11  ;;  %v1979_v10 = vmul.f32 %v3053_v9, %v4136_v19  ;;  %v3054_v11 = vld [vmem:[#allocation7 + $0xbb8] sm:$0xff] }
 0x369   :  { %2461 = vst [vmem:[#allocation9 + $0xac0] sm:$0xff] %v1949_v13  ;;  %v1980_v12 = vmul.f32 %v3054_v11, %v4136_v19  ;;  %v3055_v13 = vld [vmem:[#allocation7 + $0xbc0] sm:$0xff] }
 0x36a   :  { %2462 = vst [vmem:[#allocation9 + $0xac8] sm:$0xff] %v1950_v16  ;;  %v1981_v15 = vmul.f32 %v3055_v13, %v4136_v19  ;;  %v3056_v16 = vld [vmem:[#allocation7 + $0xbc8] sm:$0xff] }
 0x36b   :  { %2463 = vst [vmem:[#allocation9 + $0xad0] sm:$0xff] %v1951_v18  ;;  %v1982_v17 = vmul.f32 %v3056_v16, %v4136_v19  ;;  %v3057_v18 = vld [vmem:[#allocation7 + $0xbd0] sm:$0xff] }
 0x36c   :  { %2464 = vst [vmem:[#allocation9 + $0xad8] sm:$0xff] %v1952_v21  ;;  %v1983_v20 = vmul.f32 %v3057_v18, %v4136_v19  ;;  %v3058_v21 = vld [vmem:[#allocation7 + $0xbd8] sm:$0xff] }
 0x36d   :  { %2465 = vst [vmem:[#allocation9 + $0xae0] sm:$0xff] %v1953_v23  ;;  %v1984_v22 = vmul.f32 %v3058_v21, %v4136_v19  ;;  %v3059_v23 = vld [vmem:[#allocation7 + $0xbe0] sm:$0xff] }
 0x36e   :  { %2466 = vst [vmem:[#allocation9 + $0xae8] sm:$0xff] %v1954_v25  ;;  %v1985_v24 = vmul.f32 %v3059_v23, %v4136_v19  ;;  %v3060_v25 = vld [vmem:[#allocation7 + $0xbe8] sm:$0xff] }
 0x36f   :  { %2467 = vst [vmem:[#allocation9 + $0xaf0] sm:$0xff] %v1955_v14  ;;  %v1986_v26 = vmul.f32 %v3060_v25, %v4136_v19  ;;  %v3061_v14 = vld [vmem:[#allocation7 + $0xbf0] sm:$0xff] }
 0x370   :  { %2468 = vst [vmem:[#allocation9 + $0xaf8] sm:$0xff] %v1956_v27  ;;  %v1987_v58 = vmul.f32 %v3061_v14, %v4136_v19  ;;  %v3062_v27 = vld [vmem:[#allocation7 + $0xbf8] sm:$0xff] }
 0x371   :  { %2469 = vst [vmem:[#allocation9 + $0xb00] sm:$0xff] %v1957_v29  ;;  %v1988_v28 = vmul.f32 %v3062_v27, %v4136_v19  ;;  %v3063_v29 = vld [vmem:[#allocation7 + $0xc00] sm:$0xff] }
 0x372   :  { %2470 = vst [vmem:[#allocation9 + $0xb08] sm:$0xff] %v1958_v32  ;;  %v1989_v30 = vmul.f32 %v3063_v29, %v4136_v19  ;;  %v3064_v32 = vld [vmem:[#allocation7 + $0xc08] sm:$0xff] }
 0x373   :  { %2471 = vst [vmem:[#allocation9 + $0xb10] sm:$0xff] %v1959_v34  ;;  %v1990_v33 = vmul.f32 %v3064_v32, %v4136_v19  ;;  %v3065_v34 = vld [vmem:[#allocation7 + $0xc10] sm:$0xff] }
 0x374   :  { %2472 = vst [vmem:[#allocation9 + $0xb18] sm:$0xff] %v1960_v36  ;;  %v1991_v35 = vmul.f32 %v3065_v34, %v4136_v19  ;;  %v3066_v36 = vld [vmem:[#allocation7 + $0xc18] sm:$0xff] }
 0x375   :  { %2473 = vst [vmem:[#allocation9 + $0xb20] sm:$0xff] %v1961_v38  ;;  %v1992_v37 = vmul.f32 %v3066_v36, %v4136_v19  ;;  %v3067_v38 = vld [vmem:[#allocation7 + $0xc20] sm:$0xff] }
 0x376   :  { %2474 = vst [vmem:[#allocation9 + $0xb28] sm:$0xff] %v1962_v1  ;;  %v1993_v39 = vmul.f32 %v3067_v38, %v4136_v19  ;;  %v3068_v1 = vld [vmem:[#allocation7 + $0xc28] sm:$0xff] }
 0x377   :  { %2475 = vst [vmem:[#allocation9 + $0xb30] sm:$0xff] %v1963_v41  ;;  %v1994_v40 = vmul.f32 %v3068_v1, %v4136_v19  ;;  %v3069_v41 = vld [vmem:[#allocation7 + $0xc30] sm:$0xff] }
 0x378   :  { %2476 = vst [vmem:[#allocation9 + $0xb38] sm:$0xff] %v1964_v43  ;;  %v1995_v42 = vmul.f32 %v3069_v41, %v4136_v19  ;;  %v3070_v43 = vld [vmem:[#allocation7 + $0xc38] sm:$0xff] }
 0x379   :  { %2477 = vst [vmem:[#allocation9 + $0xb40] sm:$0xff] %v1965_v45  ;;  %v1996_v44 = vmul.f32 %v3070_v43, %v4136_v19  ;;  %v3071_v45 = vld [vmem:[#allocation7 + $0xc40] sm:$0xff] }
 0x37a   :  { %2478 = vst [vmem:[#allocation9 + $0xb48] sm:$0xff] %v1966_v47  ;;  %v1997_v46 = vmul.f32 %v3071_v45, %v4136_v19  ;;  %v3072_v47 = vld [vmem:[#allocation7 + $0xc48] sm:$0xff] }
 0x37b   :  { %2479 = vst [vmem:[#allocation9 + $0xb50] sm:$0xff] %v1967_v49  ;;  %v1998_v48 = vmul.f32 %v3072_v47, %v4136_v19  ;;  %v3073_v49 = vld [vmem:[#allocation7 + $0xc50] sm:$0xff] }
 0x37c   :  { %2480 = vst [vmem:[#allocation9 + $0xb58] sm:$0xff] %v1968_v51  ;;  %v1999_v50 = vmul.f32 %v3073_v49, %v4136_v19  ;;  %v3074_v51 = vld [vmem:[#allocation7 + $0xc58] sm:$0xff] }
 0x37d   :  { %2481 = vst [vmem:[#allocation9 + $0xb60] sm:$0xff] %v1969_v53  ;;  %v2000_v52 = vmul.f32 %v3074_v51, %v4136_v19  ;;  %v3075_v53 = vld [vmem:[#allocation7 + $0xc60] sm:$0xff] }
 0x37e   :  { %2482 = vst [vmem:[#allocation9 + $0xb68] sm:$0xff] %v1970_v55  ;;  %v2001_v54 = vmul.f32 %v3075_v53, %v4136_v19  ;;  %v3076_v55 = vld [vmem:[#allocation7 + $0xc68] sm:$0xff] }
 0x37f   :  { %2483 = vst [vmem:[#allocation9 + $0xb70] sm:$0xff] %v1971_v57  ;;  %v2002_v56 = vmul.f32 %v3076_v55, %v4136_v19  ;;  %v3077_v57 = vld [vmem:[#allocation7 + $0xc70] sm:$0xff] }
 0x380   :  { %2484 = vst [vmem:[#allocation9 + $0xb78] sm:$0xff] %v1972_v60  ;;  %v2003_v59 = vmul.f32 %v3077_v57, %v4136_v19  ;;  %v3078_v60 = vld [vmem:[#allocation7 + $0xc78] sm:$0xff] }
 0x381   :  { %2485 = vst [vmem:[#allocation9 + $0xb80] sm:$0xff] %v1973_v62  ;;  %v2004_v61 = vmul.f32 %v3078_v60, %v4136_v19  ;;  %v3079_v62 = vld [vmem:[#allocation7 + $0xc80] sm:$0xff] }
 0x382   :  { %2486 = vst [vmem:[#allocation9 + $0xb88] sm:$0xff] %v1974_v0  ;;  %v2005_v63 = vmul.f32 %v3079_v62, %v4136_v19  ;;  %v3080_v0 = vld [vmem:[#allocation7 + $0xc88] sm:$0xff] }
 0x383   :  { %2487 = vst [vmem:[#allocation9 + $0xb90] sm:$0xff] %v1975_v3  ;;  %v2006_v2 = vmul.f32 %v3080_v0, %v4136_v19  ;;  %v3081_v3 = vld [vmem:[#allocation7 + $0xc90] sm:$0xff] }
 0x384   :  { %2488 = vst [vmem:[#allocation9 + $0xb98] sm:$0xff] %v1976_v4  ;;  %v2007_v31 = vmul.f32 %v3081_v3, %v4136_v19  ;;  %v3082_v4 = vld [vmem:[#allocation7 + $0xc98] sm:$0xff] }
 0x385   :  { %2489 = vst [vmem:[#allocation9 + $0xba0] sm:$0xff] %v1977_v6  ;;  %v2008_v5 = vmul.f32 %v3082_v4, %v4136_v19  ;;  %v3083_v6 = vld [vmem:[#allocation7 + $0xca0] sm:$0xff] }
 0x386   :  { %2490 = vst [vmem:[#allocation9 + $0xba8] sm:$0xff] %v1978_v8  ;;  %v2009_v7 = vmul.f32 %v3083_v6, %v4136_v19  ;;  %v3084_v8 = vld [vmem:[#allocation7 + $0xca8] sm:$0xff] }
 0x387   :  { %2491 = vst [vmem:[#allocation9 + $0xbb0] sm:$0xff] %v1979_v10  ;;  %v2010_v9 = vmul.f32 %v3084_v8, %v4136_v19  ;;  %v3085_v10 = vld [vmem:[#allocation7 + $0xcb0] sm:$0xff] }
 0x388   :  { %2492 = vst [vmem:[#allocation9 + $0xbb8] sm:$0xff] %v1980_v12  ;;  %v2011_v11 = vmul.f32 %v3085_v10, %v4136_v19  ;;  %v3086_v12 = vld [vmem:[#allocation7 + $0xcb8] sm:$0xff] }
 0x389   :  { %2493 = vst [vmem:[#allocation9 + $0xbc0] sm:$0xff] %v1981_v15  ;;  %v2012_v13 = vmul.f32 %v3086_v12, %v4136_v19  ;;  %v3087_v15 = vld [vmem:[#allocation7 + $0xcc0] sm:$0xff] }
 0x38a   :  { %2494 = vst [vmem:[#allocation9 + $0xbc8] sm:$0xff] %v1982_v17  ;;  %v2013_v16 = vmul.f32 %v3087_v15, %v4136_v19  ;;  %v3088_v17 = vld [vmem:[#allocation7 + $0xcc8] sm:$0xff] }
 0x38b   :  { %2495 = vst [vmem:[#allocation9 + $0xbd0] sm:$0xff] %v1983_v20  ;;  %v2014_v18 = vmul.f32 %v3088_v17, %v4136_v19  ;;  %v3089_v20 = vld [vmem:[#allocation7 + $0xcd0] sm:$0xff] }
 0x38c   :  { %2496 = vst [vmem:[#allocation9 + $0xbd8] sm:$0xff] %v1984_v22  ;;  %v2015_v21 = vmul.f32 %v3089_v20, %v4136_v19  ;;  %v3090_v22 = vld [vmem:[#allocation7 + $0xcd8] sm:$0xff] }
 0x38d   :  { %2497 = vst [vmem:[#allocation9 + $0xbe0] sm:$0xff] %v1985_v24  ;;  %v2016_v23 = vmul.f32 %v3090_v22, %v4136_v19  ;;  %v3091_v24 = vld [vmem:[#allocation7 + $0xce0] sm:$0xff] }
 0x38e   :  { %2498 = vst [vmem:[#allocation9 + $0xbe8] sm:$0xff] %v1986_v26  ;;  %v2017_v25 = vmul.f32 %v3091_v24, %v4136_v19  ;;  %v3092_v26 = vld [vmem:[#allocation7 + $0xce8] sm:$0xff] }
 0x38f   :  { %2499 = vst [vmem:[#allocation9 + $0xbf0] sm:$0xff] %v1987_v58  ;;  %v2018_v14 = vmul.f32 %v3092_v26, %v4136_v19  ;;  %v3093_v58 = vld [vmem:[#allocation7 + $0xcf0] sm:$0xff] }
 0x390   :  { %2500 = vst [vmem:[#allocation9 + $0xbf8] sm:$0xff] %v1988_v28  ;;  %v2019_v27 = vmul.f32 %v3093_v58, %v4136_v19  ;;  %v3094_v28 = vld [vmem:[#allocation7 + $0xcf8] sm:$0xff] }
 0x391   :  { %2501 = vst [vmem:[#allocation9 + $0xc00] sm:$0xff] %v1989_v30  ;;  %v2020_v29 = vmul.f32 %v3094_v28, %v4136_v19  ;;  %v3095_v30 = vld [vmem:[#allocation7 + $0xd00] sm:$0xff] }
 0x392   :  { %2502 = vst [vmem:[#allocation9 + $0xc08] sm:$0xff] %v1990_v33  ;;  %v2021_v32 = vmul.f32 %v3095_v30, %v4136_v19  ;;  %v3096_v33 = vld [vmem:[#allocation7 + $0xd08] sm:$0xff] }
 0x393   :  { %2503 = vst [vmem:[#allocation9 + $0xc10] sm:$0xff] %v1991_v35  ;;  %v2022_v34 = vmul.f32 %v3096_v33, %v4136_v19  ;;  %v3097_v35 = vld [vmem:[#allocation7 + $0xd10] sm:$0xff] }
 0x394   :  { %2504 = vst [vmem:[#allocation9 + $0xc18] sm:$0xff] %v1992_v37  ;;  %v2023_v36 = vmul.f32 %v3097_v35, %v4136_v19  ;;  %v3098_v37 = vld [vmem:[#allocation7 + $0xd18] sm:$0xff] }
 0x395   :  { %2505 = vst [vmem:[#allocation9 + $0xc20] sm:$0xff] %v1993_v39  ;;  %v2024_v38 = vmul.f32 %v3098_v37, %v4136_v19  ;;  %v3099_v39 = vld [vmem:[#allocation7 + $0xd20] sm:$0xff] }
 0x396   :  { %2506 = vst [vmem:[#allocation9 + $0xc28] sm:$0xff] %v1994_v40  ;;  %v2025_v1 = vmul.f32 %v3099_v39, %v4136_v19  ;;  %v3100_v40 = vld [vmem:[#allocation7 + $0xd28] sm:$0xff] }
 0x397   :  { %2507 = vst [vmem:[#allocation9 + $0xc30] sm:$0xff] %v1995_v42  ;;  %v2026_v41 = vmul.f32 %v3100_v40, %v4136_v19  ;;  %v3101_v42 = vld [vmem:[#allocation7 + $0xd30] sm:$0xff] }
 0x398   :  { %2508 = vst [vmem:[#allocation9 + $0xc38] sm:$0xff] %v1996_v44  ;;  %v2027_v43 = vmul.f32 %v3101_v42, %v4136_v19  ;;  %v3102_v44 = vld [vmem:[#allocation7 + $0xd38] sm:$0xff] }
 0x399   :  { %2509 = vst [vmem:[#allocation9 + $0xc40] sm:$0xff] %v1997_v46  ;;  %v2028_v45 = vmul.f32 %v3102_v44, %v4136_v19  ;;  %v3103_v46 = vld [vmem:[#allocation7 + $0xd40] sm:$0xff] }
 0x39a   :  { %2510 = vst [vmem:[#allocation9 + $0xc48] sm:$0xff] %v1998_v48  ;;  %v2029_v47 = vmul.f32 %v3103_v46, %v4136_v19  ;;  %v3104_v48 = vld [vmem:[#allocation7 + $0xd48] sm:$0xff] }
 0x39b   :  { %2511 = vst [vmem:[#allocation9 + $0xc50] sm:$0xff] %v1999_v50  ;;  %v2030_v49 = vmul.f32 %v3104_v48, %v4136_v19  ;;  %v3105_v50 = vld [vmem:[#allocation7 + $0xd50] sm:$0xff] }
 0x39c   :  { %2512 = vst [vmem:[#allocation9 + $0xc58] sm:$0xff] %v2000_v52  ;;  %v2031_v51 = vmul.f32 %v3105_v50, %v4136_v19  ;;  %v3106_v52 = vld [vmem:[#allocation7 + $0xd58] sm:$0xff] }
 0x39d   :  { %2513 = vst [vmem:[#allocation9 + $0xc60] sm:$0xff] %v2001_v54  ;;  %v2032_v53 = vmul.f32 %v3106_v52, %v4136_v19  ;;  %v3107_v54 = vld [vmem:[#allocation7 + $0xd60] sm:$0xff] }
 0x39e   :  { %2514 = vst [vmem:[#allocation9 + $0xc68] sm:$0xff] %v2002_v56  ;;  %v2033_v55 = vmul.f32 %v3107_v54, %v4136_v19  ;;  %v3108_v56 = vld [vmem:[#allocation7 + $0xd68] sm:$0xff] }
 0x39f   :  { %2515 = vst [vmem:[#allocation9 + $0xc70] sm:$0xff] %v2003_v59  ;;  %v2034_v57 = vmul.f32 %v3108_v56, %v4136_v19  ;;  %v3109_v59 = vld [vmem:[#allocation7 + $0xd70] sm:$0xff] }
 0x3a0   :  { %2516 = vst [vmem:[#allocation9 + $0xc78] sm:$0xff] %v2004_v61  ;;  %v2035_v60 = vmul.f32 %v3109_v59, %v4136_v19  ;;  %v3110_v61 = vld [vmem:[#allocation7 + $0xd78] sm:$0xff] }
 0x3a1   :  { %2517 = vst [vmem:[#allocation9 + $0xc80] sm:$0xff] %v2005_v63  ;;  %v2036_v62 = vmul.f32 %v3110_v61, %v4136_v19  ;;  %v3111_v63 = vld [vmem:[#allocation7 + $0xd80] sm:$0xff] }
 0x3a2   :  { %2518 = vst [vmem:[#allocation9 + $0xc88] sm:$0xff] %v2006_v2  ;;  %v2037_v0 = vmul.f32 %v3111_v63, %v4136_v19  ;;  %v3112_v2 = vld [vmem:[#allocation7 + $0xd88] sm:$0xff] }
 0x3a3   :  { %2519 = vst [vmem:[#allocation9 + $0xc90] sm:$0xff] %v2007_v31  ;;  %v2038_v3 = vmul.f32 %v3112_v2, %v4136_v19  ;;  %v3113_v31 = vld [vmem:[#allocation7 + $0xd90] sm:$0xff] }
 0x3a4   :  { %2520 = vst [vmem:[#allocation9 + $0xc98] sm:$0xff] %v2008_v5  ;;  %v2039_v4 = vmul.f32 %v3113_v31, %v4136_v19  ;;  %v3114_v5 = vld [vmem:[#allocation7 + $0xd98] sm:$0xff] }
 0x3a5   :  { %2521 = vst [vmem:[#allocation9 + $0xca0] sm:$0xff] %v2009_v7  ;;  %v2040_v6 = vmul.f32 %v3114_v5, %v4136_v19  ;;  %v3115_v7 = vld [vmem:[#allocation7 + $0xda0] sm:$0xff] }
 0x3a6   :  { %2522 = vst [vmem:[#allocation9 + $0xca8] sm:$0xff] %v2010_v9  ;;  %v2041_v8 = vmul.f32 %v3115_v7, %v4136_v19  ;;  %v3116_v9 = vld [vmem:[#allocation7 + $0xda8] sm:$0xff] }
 0x3a7   :  { %2523 = vst [vmem:[#allocation9 + $0xcb0] sm:$0xff] %v2011_v11  ;;  %v2042_v10 = vmul.f32 %v3116_v9, %v4136_v19  ;;  %v3117_v11 = vld [vmem:[#allocation7 + $0xdb0] sm:$0xff] }
 0x3a8   :  { %2524 = vst [vmem:[#allocation9 + $0xcb8] sm:$0xff] %v2012_v13  ;;  %v2043_v12 = vmul.f32 %v3117_v11, %v4136_v19  ;;  %v3118_v13 = vld [vmem:[#allocation7 + $0xdb8] sm:$0xff] }
 0x3a9   :  { %2525 = vst [vmem:[#allocation9 + $0xcc0] sm:$0xff] %v2013_v16  ;;  %v2044_v15 = vmul.f32 %v3118_v13, %v4136_v19  ;;  %v3119_v16 = vld [vmem:[#allocation7 + $0xdc0] sm:$0xff] }
 0x3aa   :  { %2526 = vst [vmem:[#allocation9 + $0xcc8] sm:$0xff] %v2014_v18  ;;  %v2045_v17 = vmul.f32 %v3119_v16, %v4136_v19  ;;  %v3120_v18 = vld [vmem:[#allocation7 + $0xdc8] sm:$0xff] }
 0x3ab   :  { %2527 = vst [vmem:[#allocation9 + $0xcd0] sm:$0xff] %v2015_v21  ;;  %v2046_v20 = vmul.f32 %v3120_v18, %v4136_v19  ;;  %v3121_v21 = vld [vmem:[#allocation7 + $0xdd0] sm:$0xff] }
 0x3ac   :  { %2528 = vst [vmem:[#allocation9 + $0xcd8] sm:$0xff] %v2016_v23  ;;  %v2047_v22 = vmul.f32 %v3121_v21, %v4136_v19  ;;  %v3122_v23 = vld [vmem:[#allocation7 + $0xdd8] sm:$0xff] }
 0x3ad   :  { %2529 = vst [vmem:[#allocation9 + $0xce0] sm:$0xff] %v2017_v25  ;;  %v2048_v24 = vmul.f32 %v3122_v23, %v4136_v19  ;;  %v3123_v25 = vld [vmem:[#allocation7 + $0xde0] sm:$0xff] }
 0x3ae   :  { %2530 = vst [vmem:[#allocation9 + $0xce8] sm:$0xff] %v2018_v14  ;;  %v2049_v26 = vmul.f32 %v3123_v25, %v4136_v19  ;;  %v3124_v14 = vld [vmem:[#allocation7 + $0xde8] sm:$0xff] }
 0x3af   :  { %2531 = vst [vmem:[#allocation9 + $0xcf0] sm:$0xff] %v2019_v27  ;;  %v2050_v58 = vmul.f32 %v3124_v14, %v4136_v19  ;;  %v3125_v27 = vld [vmem:[#allocation7 + $0xdf0] sm:$0xff] }
 0x3b0   :  { %2532 = vst [vmem:[#allocation9 + $0xcf8] sm:$0xff] %v2020_v29  ;;  %v2051_v28 = vmul.f32 %v3125_v27, %v4136_v19  ;;  %v3126_v29 = vld [vmem:[#allocation7 + $0xdf8] sm:$0xff] }
 0x3b1   :  { %2533 = vst [vmem:[#allocation9 + $0xd00] sm:$0xff] %v2021_v32  ;;  %v2052_v30 = vmul.f32 %v3126_v29, %v4136_v19  ;;  %v3127_v32 = vld [vmem:[#allocation7 + $0xe00] sm:$0xff] }
 0x3b2   :  { %2534 = vst [vmem:[#allocation9 + $0xd08] sm:$0xff] %v2022_v34  ;;  %v2053_v33 = vmul.f32 %v3127_v32, %v4136_v19  ;;  %v3128_v34 = vld [vmem:[#allocation7 + $0xe08] sm:$0xff] }
 0x3b3   :  { %2535 = vst [vmem:[#allocation9 + $0xd10] sm:$0xff] %v2023_v36  ;;  %v2054_v35 = vmul.f32 %v3128_v34, %v4136_v19  ;;  %v3129_v36 = vld [vmem:[#allocation7 + $0xe10] sm:$0xff] }
 0x3b4   :  { %2536 = vst [vmem:[#allocation9 + $0xd18] sm:$0xff] %v2024_v38  ;;  %v2055_v37 = vmul.f32 %v3129_v36, %v4136_v19  ;;  %v3130_v38 = vld [vmem:[#allocation7 + $0xe18] sm:$0xff] }
 0x3b5   :  { %2537 = vst [vmem:[#allocation9 + $0xd20] sm:$0xff] %v2025_v1  ;;  %v2056_v39 = vmul.f32 %v3130_v38, %v4136_v19  ;;  %v3131_v1 = vld [vmem:[#allocation7 + $0xe20] sm:$0xff] }
 0x3b6   :  { %2538 = vst [vmem:[#allocation9 + $0xd28] sm:$0xff] %v2026_v41  ;;  %v2057_v40 = vmul.f32 %v3131_v1, %v4136_v19  ;;  %v3132_v41 = vld [vmem:[#allocation7 + $0xe28] sm:$0xff] }
 0x3b7   :  { %2539 = vst [vmem:[#allocation9 + $0xd30] sm:$0xff] %v2027_v43  ;;  %v2058_v42 = vmul.f32 %v3132_v41, %v4136_v19  ;;  %v3133_v43 = vld [vmem:[#allocation7 + $0xe30] sm:$0xff] }
 0x3b8   :  { %2540 = vst [vmem:[#allocation9 + $0xd38] sm:$0xff] %v2028_v45  ;;  %v2059_v44 = vmul.f32 %v3133_v43, %v4136_v19  ;;  %v3134_v45 = vld [vmem:[#allocation7 + $0xe38] sm:$0xff] }
 0x3b9   :  { %2541 = vst [vmem:[#allocation9 + $0xd40] sm:$0xff] %v2029_v47  ;;  %v2060_v46 = vmul.f32 %v3134_v45, %v4136_v19  ;;  %v3135_v47 = vld [vmem:[#allocation7 + $0xe40] sm:$0xff] }
 0x3ba   :  { %2542 = vst [vmem:[#allocation9 + $0xd48] sm:$0xff] %v2030_v49  ;;  %v2061_v48 = vmul.f32 %v3135_v47, %v4136_v19  ;;  %v3136_v49 = vld [vmem:[#allocation7 + $0xe48] sm:$0xff] }
 0x3bb   :  { %2543 = vst [vmem:[#allocation9 + $0xd50] sm:$0xff] %v2031_v51  ;;  %v2062_v50 = vmul.f32 %v3136_v49, %v4136_v19  ;;  %v3137_v51 = vld [vmem:[#allocation7 + $0xe50] sm:$0xff] }
 0x3bc   :  { %2544 = vst [vmem:[#allocation9 + $0xd58] sm:$0xff] %v2032_v53  ;;  %v2063_v52 = vmul.f32 %v3137_v51, %v4136_v19  ;;  %v3138_v53 = vld [vmem:[#allocation7 + $0xe58] sm:$0xff] }
 0x3bd   :  { %2545 = vst [vmem:[#allocation9 + $0xd60] sm:$0xff] %v2033_v55  ;;  %v2064_v54 = vmul.f32 %v3138_v53, %v4136_v19  ;;  %v3139_v55 = vld [vmem:[#allocation7 + $0xe60] sm:$0xff] }
 0x3be   :  { %2546 = vst [vmem:[#allocation9 + $0xd68] sm:$0xff] %v2034_v57  ;;  %v2065_v56 = vmul.f32 %v3139_v55, %v4136_v19  ;;  %v3140_v57 = vld [vmem:[#allocation7 + $0xe68] sm:$0xff] }
 0x3bf   :  { %2547 = vst [vmem:[#allocation9 + $0xd70] sm:$0xff] %v2035_v60  ;;  %v2066_v59 = vmul.f32 %v3140_v57, %v4136_v19  ;;  %v3141_v60 = vld [vmem:[#allocation7 + $0xe70] sm:$0xff] }
 0x3c0   :  { %2548 = vst [vmem:[#allocation9 + $0xd78] sm:$0xff] %v2036_v62  ;;  %v2067_v61 = vmul.f32 %v3141_v60, %v4136_v19  ;;  %v3142_v62 = vld [vmem:[#allocation7 + $0xe78] sm:$0xff] }
 0x3c1   :  { %2549 = vst [vmem:[#allocation9 + $0xd80] sm:$0xff] %v2037_v0  ;;  %v2068_v63 = vmul.f32 %v3142_v62, %v4136_v19  ;;  %v3143_v0 = vld [vmem:[#allocation7 + $0xe80] sm:$0xff] }
 0x3c2   :  { %2550 = vst [vmem:[#allocation9 + $0xd88] sm:$0xff] %v2038_v3  ;;  %v2069_v2 = vmul.f32 %v3143_v0, %v4136_v19  ;;  %v3144_v3 = vld [vmem:[#allocation7 + $0xe88] sm:$0xff] }
 0x3c3   :  { %2551 = vst [vmem:[#allocation9 + $0xd90] sm:$0xff] %v2039_v4  ;;  %v2070_v31 = vmul.f32 %v3144_v3, %v4136_v19  ;;  %v3145_v4 = vld [vmem:[#allocation7 + $0xe90] sm:$0xff] }
 0x3c4   :  { %2552 = vst [vmem:[#allocation9 + $0xd98] sm:$0xff] %v2040_v6  ;;  %v2071_v5 = vmul.f32 %v3145_v4, %v4136_v19  ;;  %v3146_v6 = vld [vmem:[#allocation7 + $0xe98] sm:$0xff] }
 0x3c5   :  { %2553 = vst [vmem:[#allocation9 + $0xda0] sm:$0xff] %v2041_v8  ;;  %v2072_v7 = vmul.f32 %v3146_v6, %v4136_v19  ;;  %v3147_v8 = vld [vmem:[#allocation7 + $0xea0] sm:$0xff] }
 0x3c6   :  { %2554 = vst [vmem:[#allocation9 + $0xda8] sm:$0xff] %v2042_v10  ;;  %v2073_v9 = vmul.f32 %v3147_v8, %v4136_v19  ;;  %v3148_v10 = vld [vmem:[#allocation7 + $0xea8] sm:$0xff] }
 0x3c7   :  { %2555 = vst [vmem:[#allocation9 + $0xdb0] sm:$0xff] %v2043_v12  ;;  %v2074_v11 = vmul.f32 %v3148_v10, %v4136_v19  ;;  %v3149_v12 = vld [vmem:[#allocation7 + $0xeb0] sm:$0xff] }
 0x3c8   :  { %2556 = vst [vmem:[#allocation9 + $0xdb8] sm:$0xff] %v2044_v15  ;;  %v2075_v13 = vmul.f32 %v3149_v12, %v4136_v19  ;;  %v3150_v15 = vld [vmem:[#allocation7 + $0xeb8] sm:$0xff] }
 0x3c9   :  { %2557 = vst [vmem:[#allocation9 + $0xdc0] sm:$0xff] %v2045_v17  ;;  %v2076_v16 = vmul.f32 %v3150_v15, %v4136_v19  ;;  %v3151_v17 = vld [vmem:[#allocation7 + $0xec0] sm:$0xff] }
 0x3ca   :  { %2558 = vst [vmem:[#allocation9 + $0xdc8] sm:$0xff] %v2046_v20  ;;  %v2077_v18 = vmul.f32 %v3151_v17, %v4136_v19  ;;  %v3152_v20 = vld [vmem:[#allocation7 + $0xec8] sm:$0xff] }
 0x3cb   :  { %2559 = vst [vmem:[#allocation9 + $0xdd0] sm:$0xff] %v2047_v22  ;;  %v2078_v21 = vmul.f32 %v3152_v20, %v4136_v19  ;;  %v3153_v22 = vld [vmem:[#allocation7 + $0xed0] sm:$0xff] }
 0x3cc   :  { %2560 = vst [vmem:[#allocation9 + $0xdd8] sm:$0xff] %v2048_v24  ;;  %v2079_v23 = vmul.f32 %v3153_v22, %v4136_v19  ;;  %v3154_v24 = vld [vmem:[#allocation7 + $0xed8] sm:$0xff] }
 0x3cd   :  { %2561 = vst [vmem:[#allocation9 + $0xde0] sm:$0xff] %v2049_v26  ;;  %v2080_v25 = vmul.f32 %v3154_v24, %v4136_v19  ;;  %v3155_v26 = vld [vmem:[#allocation7 + $0xee0] sm:$0xff]  ;;  %v3185_v22 = vld [vmem:[#allocation5] ss:$0 sm:$0xff]  ;;  %v3186_v24 = vld [vmem:[#allocation7 + $0xfd0] sm:$0xff] }
 0x3ce   :  { %2562 = vst [vmem:[#allocation9 + $0xde8] sm:$0xff] %v2050_v58  ;;  %v2081_v14 = vmul.f32 %v3155_v26, %v4136_v19  ;;  %v3156_v58 = vld [vmem:[#allocation7 + $0xee8] sm:$0xff]  ;;  %v3187_v26 = vld [vmem:[#allocation7 + $0xfd8] sm:$0xff] }
 0x3cf   :  { %2563 = vst [vmem:[#allocation9 + $0xdf0] sm:$0xff] %v2051_v28  ;;  %v2082_v27 = vmul.f32 %v3156_v58, %v4136_v19  ;;  %v3157_v28 = vld [vmem:[#allocation7 + $0xef0] sm:$0xff]  ;;  %v3188_v58 = vld [vmem:[#allocation7 + $0xfe0] sm:$0xff] }
 0x3d0   :  { %2564 = vst [vmem:[#allocation9 + $0xdf8] sm:$0xff] %v2052_v30  ;;  %v2083_v29 = vmul.f32 %v3157_v28, %v4136_v19  ;;  %v3158_v30 = vld [vmem:[#allocation7 + $0xef8] sm:$0xff]  ;;  %v3189_v28 = vld [vmem:[#allocation7 + $0xfe8] sm:$0xff] }
 0x3d1   :  { %2565 = vst [vmem:[#allocation9 + $0xe00] sm:$0xff] %v2053_v33  ;;  %v2084_v32 = vmul.f32 %v3158_v30, %v4136_v19  ;;  %v3159_v33 = vld [vmem:[#allocation7 + $0xf00] sm:$0xff]  ;;  %v3190_v30 = vld [vmem:[#allocation7 + $0xff0] sm:$0xff] }
 0x3d2   :  { %2566 = vst [vmem:[#allocation9 + $0xe08] sm:$0xff] %v2054_v35  ;;  %v2085_v34 = vmul.f32 %v3159_v33, %v4136_v19  ;;  %v3160_v35 = vld [vmem:[#allocation7 + $0xf08] sm:$0xff] }
 0x3d3   :  { %2567 = vst [vmem:[#allocation9 + $0xe10] sm:$0xff] %v2055_v37  ;;  %v2086_v36 = vmul.f32 %v3160_v35, %v4136_v19  ;;  %v3161_v37 = vld [vmem:[#allocation7 + $0xf10] sm:$0xff] }
 0x3d4   :  { %2568 = vst [vmem:[#allocation9 + $0xe18] sm:$0xff] %v2056_v39  ;;  %v2087_v38 = vmul.f32 %v3161_v37, %v4136_v19  ;;  %v3162_v39 = vld [vmem:[#allocation7 + $0xf18] sm:$0xff] }
 0x3d5   :  { %2569 = vst [vmem:[#allocation9 + $0xe20] sm:$0xff] %v2057_v40  ;;  %v2088_v1 = vmul.f32 %v3162_v39, %v4136_v19  ;;  %v3163_v40 = vld [vmem:[#allocation7 + $0xf20] sm:$0xff] }
 0x3d6   :  { %2570 = vst [vmem:[#allocation9 + $0xe28] sm:$0xff] %v2058_v42  ;;  %v2089_v41 = vmul.f32 %v3163_v40, %v4136_v19  ;;  %v3164_v42 = vld [vmem:[#allocation7 + $0xf28] sm:$0xff] }
 0x3d7   :  { %2571 = vst [vmem:[#allocation9 + $0xe30] sm:$0xff] %v2059_v44  ;;  %v2090_v43 = vmul.f32 %v3164_v42, %v4136_v19  ;;  %v3165_v44 = vld [vmem:[#allocation7 + $0xf30] sm:$0xff] }
 0x3d8   :  { %2572 = vst [vmem:[#allocation9 + $0xe38] sm:$0xff] %v2060_v46  ;;  %v2091_v45 = vmul.f32 %v3165_v44, %v4136_v19  ;;  %v3166_v46 = vld [vmem:[#allocation7 + $0xf38] sm:$0xff] }
 0x3d9   :  { %2573 = vst [vmem:[#allocation9 + $0xe40] sm:$0xff] %v2061_v48  ;;  %v2092_v47 = vmul.f32 %v3166_v46, %v4136_v19  ;;  %v3167_v48 = vld [vmem:[#allocation7 + $0xf40] sm:$0xff] }
 0x3da   :  { %2574 = vst [vmem:[#allocation9 + $0xe48] sm:$0xff] %v2062_v50  ;;  %v2093_v49 = vmul.f32 %v3167_v48, %v4136_v19  ;;  %v3168_v50 = vld [vmem:[#allocation7 + $0xf48] sm:$0xff] }
 0x3db   :  { %2575 = vst [vmem:[#allocation9 + $0xe50] sm:$0xff] %v2063_v52  ;;  %v2094_v51 = vmul.f32 %v3168_v50, %v4136_v19  ;;  %v3169_v52 = vld [vmem:[#allocation7 + $0xf50] sm:$0xff] }
 0x3dc   :  { %2576 = vst [vmem:[#allocation9 + $0xe58] sm:$0xff] %v2064_v54  ;;  %v2095_v53 = vmul.f32 %v3169_v52, %v4136_v19  ;;  %v3170_v54 = vld [vmem:[#allocation7 + $0xf58] sm:$0xff] }
 0x3dd   :  { %2577 = vst [vmem:[#allocation9 + $0xe60] sm:$0xff] %v2065_v56  ;;  %v2096_v55 = vmul.f32 %v3170_v54, %v4136_v19  ;;  %v3171_v56 = vld [vmem:[#allocation7 + $0xf60] sm:$0xff] }
 0x3de   :  { %2578 = vst [vmem:[#allocation9 + $0xe68] sm:$0xff] %v2066_v59  ;;  %v2097_v57 = vmul.f32 %v3171_v56, %v4136_v19  ;;  %v3172_v59 = vld [vmem:[#allocation7 + $0xf68] sm:$0xff] }
 0x3df   :  { %2579 = vst [vmem:[#allocation9 + $0xe70] sm:$0xff] %v2067_v61  ;;  %v2098_v60 = vmul.f32 %v3172_v59, %v4136_v19  ;;  %v3173_v61 = vld [vmem:[#allocation7 + $0xf70] sm:$0xff] }
 0x3e0   :  { %2580 = vst [vmem:[#allocation9 + $0xe78] sm:$0xff] %v2068_v63  ;;  %v2099_v62 = vmul.f32 %v3173_v61, %v4136_v19  ;;  %v3174_v63 = vld [vmem:[#allocation7 + $0xf78] sm:$0xff] }
 0x3e1   :  { %2581 = vst [vmem:[#allocation9 + $0xe80] sm:$0xff] %v2069_v2  ;;  %v2100_v0 = vmul.f32 %v3174_v63, %v4136_v19  ;;  %v3175_v2 = vld [vmem:[#allocation7 + $0xf80] sm:$0xff] }
 0x3e2   :  { %2582 = vst [vmem:[#allocation9 + $0xe88] sm:$0xff] %v2070_v31  ;;  %v2101_v3 = vmul.f32 %v3175_v2, %v4136_v19  ;;  %v3176_v31 = vld [vmem:[#allocation7 + $0xf88] sm:$0xff] }
 0x3e3   :  { %2583 = vst [vmem:[#allocation9 + $0xe90] sm:$0xff] %v2071_v5  ;;  %v2102_v4 = vmul.f32 %v3176_v31, %v4136_v19  ;;  %v3177_v5 = vld [vmem:[#allocation7 + $0xf90] sm:$0xff] }
 0x3e4   :  { %2584 = vst [vmem:[#allocation9 + $0xe98] sm:$0xff] %v2072_v7  ;;  %v2103_v6 = vmul.f32 %v3177_v5, %v4136_v19  ;;  %v3178_v7 = vld [vmem:[#allocation7 + $0xf98] sm:$0xff] }
 0x3e5   :  { %2585 = vst [vmem:[#allocation9 + $0xea0] sm:$0xff] %v2073_v9  ;;  %v2104_v8 = vmul.f32 %v3178_v7, %v4136_v19  ;;  %v3179_v9 = vld [vmem:[#allocation7 + $0xfa0] sm:$0xff] }
 0x3e6   :  { %2586 = vst [vmem:[#allocation9 + $0xea8] sm:$0xff] %v2074_v11  ;;  %v2105_v10 = vmul.f32 %v3179_v9, %v4136_v19  ;;  %v3180_v11 = vld [vmem:[#allocation7 + $0xfa8] sm:$0xff] }
 0x3e7   :  { %2587 = vst [vmem:[#allocation9 + $0xeb0] sm:$0xff] %v2075_v13  ;;  %v2106_v12 = vmul.f32 %v3180_v11, %v4136_v19  ;;  %v3181_v13 = vld [vmem:[#allocation7 + $0xfb0] sm:$0xff] }
 0x3e8   :  { %2588 = vst [vmem:[#allocation9 + $0xeb8] sm:$0xff] %v2076_v16  ;;  %v2107_v15 = vmul.f32 %v3181_v13, %v4136_v19  ;;  %v3182_v16 = vld [vmem:[#allocation7 + $0xfb8] sm:$0xff] }
 0x3e9   :  { %2589 = vst [vmem:[#allocation9 + $0xec0] sm:$0xff] %v2077_v18  ;;  %v2108_v17 = vmul.f32 %v3182_v16, %v4136_v19  ;;  %v3183_v18 = vld [vmem:[#allocation7 + $0xfc0] sm:$0xff] }
 0x3ea   :  { %2590 = vst [vmem:[#allocation9 + $0xec8] sm:$0xff] %v2078_v21  ;;  %v2109_v20 = vmul.f32 %v3183_v18, %v4136_v19  ;;  %v3184_v21 = vld [vmem:[#allocation7 + $0xfc8] sm:$0xff]  ;;  %v3191_v19 = vld [vmem:[#allocation7 + $0xff8] sm:$0xff] }
 0x3eb   :  { %2591 = vst [vmem:[#allocation9 + $0xed0] sm:$0xff] %v2079_v23  ;;  %v2110_v23 = vmul.f32 %v3185_v22, %v3184_v21  ;;  %v2116_v33 = vmul.f32 %v3191_v19, %v3185_v22 }
 0x3ec   :  { %2592 = vst [vmem:[#allocation9 + $0xed8] sm:$0xff] %v2080_v25  ;;  %v2111_v25 = vmul.f32 %v3186_v24, %v3185_v22 }
 0x3ed   :  { %2593 = vst [vmem:[#allocation9 + $0xee0] sm:$0xff] %v2081_v14  ;;  %v2112_v14 = vmul.f32 %v3187_v26, %v3185_v22 }
 0x3ee   :  { %2594 = vst [vmem:[#allocation9 + $0xee8] sm:$0xff] %v2082_v27  ;;  %v2113_v27 = vmul.f32 %v3188_v58, %v3185_v22 }
 0x3ef   :  { %2595 = vst [vmem:[#allocation9 + $0xef0] sm:$0xff] %v2083_v29  ;;  %v2114_v29 = vmul.f32 %v3189_v28, %v3185_v22 }
 0x3f0   :  { %2596 = vst [vmem:[#allocation9 + $0xef8] sm:$0xff] %v2084_v32  ;;  %v2115_v32 = vmul.f32 %v3190_v30, %v3185_v22 }
 0x3f1   :  { %2597 = vst [vmem:[#allocation9 + $0xf00] sm:$0xff] %v2085_v34 }
 0x3f2   :  { %2598 = vst [vmem:[#allocation9 + $0xf08] sm:$0xff] %v2086_v36 }
 0x3f3   :  { %2599 = vst [vmem:[#allocation9 + $0xf10] sm:$0xff] %v2087_v38 }
 0x3f4   :  { %2600 = vst [vmem:[#allocation9 + $0xf18] sm:$0xff] %v2088_v1 }
 0x3f5   :  { %2601 = vst [vmem:[#allocation9 + $0xf20] sm:$0xff] %v2089_v41 }
 0x3f6   :  { %2602 = vst [vmem:[#allocation9 + $0xf28] sm:$0xff] %v2090_v43 }
 0x3f7   :  { %2603 = vst [vmem:[#allocation9 + $0xf30] sm:$0xff] %v2091_v45 }
 0x3f8   :  { %2604 = vst [vmem:[#allocation9 + $0xf38] sm:$0xff] %v2092_v47 }
 0x3f9   :  { %2605 = vst [vmem:[#allocation9 + $0xf40] sm:$0xff] %v2093_v49 }
 0x3fa   :  { %2606 = vst [vmem:[#allocation9 + $0xf48] sm:$0xff] %v2094_v51 }
 0x3fb   :  { %2607 = vst [vmem:[#allocation9 + $0xf50] sm:$0xff] %v2095_v53 }
 0x3fc   :  { %2608 = vst [vmem:[#allocation9 + $0xf58] sm:$0xff] %v2096_v55 }
 0x3fd   :  { %2609 = vst [vmem:[#allocation9 + $0xf60] sm:$0xff] %v2097_v57 }
 0x3fe   :  { %2610 = vst [vmem:[#allocation9 + $0xf68] sm:$0xff] %v2098_v60 }
 0x3ff   :  { %2611 = vst [vmem:[#allocation9 + $0xf70] sm:$0xff] %v2099_v62 }
 0x400   :  { %2612 = vst [vmem:[#allocation9 + $0xf78] sm:$0xff] %v2100_v0 }
 0x401   :  { %2613 = vst [vmem:[#allocation9 + $0xf80] sm:$0xff] %v2101_v3 }
 0x402   :  { %2614 = vst [vmem:[#allocation9 + $0xf88] sm:$0xff] %v2102_v4 }
 0x403   :  { %2615 = vst [vmem:[#allocation9 + $0xf90] sm:$0xff] %v2103_v6 }
 0x404   :  { %2616 = vst [vmem:[#allocation9 + $0xf98] sm:$0xff] %v2104_v8 }
 0x405   :  { %2617 = vst [vmem:[#allocation9 + $0xfa0] sm:$0xff] %v2105_v10 }
 0x406   :  { %2618 = vst [vmem:[#allocation9 + $0xfa8] sm:$0xff] %v2106_v12 }
 0x407   :  { %2619 = vst [vmem:[#allocation9 + $0xfb0] sm:$0xff] %v2107_v15 }
 0x408   :  { %2620 = vst [vmem:[#allocation9 + $0xfb8] sm:$0xff] %v2108_v17 }
 0x409   :  { %2621 = vst [vmem:[#allocation9 + $0xfc0] sm:$0xff] %v2109_v20 }
 0x40a   :  { %2622 = vst [vmem:[#allocation9 + $0xfc8] sm:$0xff] %v2110_v23 }
 0x40b   :  { %2623 = vst [vmem:[#allocation9 + $0xfd0] sm:$0xff] %v2111_v25 }
 0x40c   :  { %2624 = vst [vmem:[#allocation9 + $0xfd8] sm:$0xff] %v2112_v14 }
 0x40d   :  { %2625 = vst [vmem:[#allocation9 + $0xfe0] sm:$0xff] %v2113_v27 }
 0x40e   :  { %2626 = vst [vmem:[#allocation9 + $0xfe8] sm:$0xff] %v2114_v29 }
 0x40f   :  { %2627 = vst [vmem:[#allocation9 + $0xff0] sm:$0xff] %v2115_v32 }
 0x410   :  { %2628 = vst [vmem:[#allocation9 + $0xff8] sm:$0xff] %v2116_v33 }
 0x411   :  { %2654 = dma.vmem_to_hbm [thread:$0]  %s2647_s8, 65536, %s2649_s11, [#allocation10], %s3323_s29, %s3323_s29, %s3324_s30  }
 0x412   :  { %3316 = dma.done.wait [#allocation4], 65536  }
 0x413   :  { %3317 = vsyncadd [#allocation4], 4294901760 }
 0x414   :  { %3318 = dma.done.wait [#allocation10], 65536  }
 0x415   :  { %3319 = vsyncadd [#allocation10], 4294901760 }
 0x416   :  { %2663 = vsyncpa [#allocation3], 1 }
 0x417   :  { %2664 = vsyncpa [#allocation6], 1 }
 0x418   :  { %2665 = vsyncpa [#allocation4], 1 }
 0x419   :  { %2666 = vsyncpa [#allocation10], 1 }

</bundles_post_ra>
